<compile_context>
chip_gen: v7x
topology: tpu7x:2x2x1
jax: 0.10.0
libtpu: 0.0.40
codegen_flags: <defaults>
</compile_context>

<pallas_src>
import jax
import jax.numpy as jnp
import numpy as np
from jax.experimental import pallas as pl
from jax.experimental.pallas import tpu as pltpu

EPS = 1e-5
LANES = 128
_VMEM_LIMIT = 32 * 1024 * 1024


def _round_up(x, m):
    return (x + m - 1) // m * m


# ----------------------------- MaxPool3d(2) --------------------------------

def maxpool3d(x):
    """MaxPool3d(kernel=2, stride=2). x: (N, D0, H0, W0, C) -> (N, D, H, W, C) bf16."""
    N, D0, H0, W0, C = x.shape
    assert D0 % 2 == 0 and H0 % 2 == 0 and W0 % 2 == 0
    D, H, W = D0 // 2, H0 // 2, W0 // 2
    # Free reshape: the two W-neighbours of each pooling window land next to
    # the channels in the lane dim (no data movement, no gather in HBM).
    xr = x.reshape(N, D0, H0, W, 2 * C)

    def kernel(x_ref, o_ref):
        xx = x_ref[0]                                     # (2, H0, W, 2C)
        a = jnp.maximum(xx[0], xx[1])                     # depth pair  -> (H0, W, 2C)
        a = jnp.maximum(a[..., :C], a[..., C:])           # width pair  -> (H0, W, C)
        a = a.reshape(H, 2, W, C)                         # leading-dim split (free)
        a = jnp.maximum(a[:, 0], a[:, 1])                 # height pair -> (H, W, C)
        o_ref[0, 0] = a.astype(jnp.bfloat16)

    return pl.pallas_call(
        kernel,
        out_shape=jax.ShapeDtypeStruct((N, D, H, W, C), jnp.bfloat16),
        grid=(N, D),
        in_specs=[pl.BlockSpec((1, 2, H0, W, 2 * C),
                               lambda n, d: (n, d, 0, 0, 0))],
        out_specs=pl.BlockSpec((1, 1, H, W, C),
                               lambda n, d: (n, d, 0, 0, 0)),
        compiler_params=pltpu.CompilerParams(
            dimension_semantics=("parallel", "parallel"),
            vmem_limit_bytes=_VMEM_LIMIT),
    )(xr)


# ------------------- Conv3d(k=3, p=1) (+ fused producer BN+ReLU) -----------

def _make_conv_kernel(width, apply_in_bn):
    """Kernel for one (n, d) depth slice; rows are the flattened H*W plane.

    Inputs : x0,x1,x2 (1,1,R,Ca) depth slices d-1,d,d+1 (clamped index map),
             w (27,Ca,Cf) bf16, b (1,Cf) f32, masks (9,R,1) f32,
             [in_scale,in_shift (1,Ca) f32 -- fused producer BN+ReLU].
    Outputs: y (1,1,R,Cf) f32 pre-BN conv output,
             st (1,1,2,Cf) f32 per-step [sum, sum-of-squares] partials.
    """
    def kernel(*args):
        if apply_in_bn:
            (x0_ref, x1_ref, x2_ref, w_ref, b_ref, m_ref,
             isc_ref, ish_ref, y_ref, st_ref) = args
        else:
            (x0_ref, x1_ref, x2_ref, w_ref, b_ref, m_ref,
             y_ref, st_ref) = args
        x_refs = (x0_ref, x1_ref, x2_ref)

        d = pl.program_id(1)
        nd = pl.num_programs(1)
        R, Cf = y_ref.shape[2], y_ref.shape[3]

        masks = [m_ref[t] for t in range(9)]              # each (R, 1) f32
        if apply_in_bn:
            isc = isc_ref[...]
            ish = ish_ref[...]

        acc = jnp.zeros((R, Cf), jnp.float32)
        for kd in range(3):
            z = x_refs[kd][0, 0].astype(jnp.float32)      # (R, Ca)
            if apply_in_bn:
                # Fused BatchNorm + ReLU of the producer layer.
                z = jnp.maximum(z * isc + ish, 0.0)
            if kd != 1:
                # Zero-padding in depth: kill out-of-range depth taps.
                src_d = d - 1 + kd
                valid = jnp.logical_and(src_d >= 0, src_d <= nd - 1)
                z = z * valid.astype(jnp.float32)
            for kh in range(3):
                for kw in range(3):
                    t = kh * 3 + kw
                    off = (kh - 1) * width + (kw - 1)
                    zt = pltpu.roll(z, (-off) % R, axis=0) if off != 0 else z
                    if t != 4:  # centre tap needs no H/W border mask
                        zt = zt * masks[t]
                    acc = acc + jnp.dot(zt.astype(jnp.bfloat16),
                                        w_ref[kd * 9 + t],
                                        preferred_element_type=jnp.float32)
        acc = acc + b_ref[...]
        y_ref[0, 0] = acc
        # Per-step partial BN statistics (reduced in the wrapper).
        st_ref[0, 0, 0:1, :] = jnp.sum(acc, axis=0, keepdims=True)
        st_ref[0, 0, 1:2, :] = jnp.sum(acc * acc, axis=0, keepdims=True)
    return kernel


def _conv_layer(a, w27, bias, tap_masks, width, in_scale=None, in_shift=None):
    """Conv3d(k=3, p=1) over a: (N, D, R=H*W, Ca). Returns (y, partial_stats)."""
    N, D, R, Ca = a.shape
    Cf = w27.shape[-1]
    apply_in_bn = in_scale is not None

    def x_spec(kd):
        def idx(n, d, kd=kd, D=D):
            return (n, jnp.minimum(jnp.maximum(d - 1 + kd, 0), D - 1), 0, 0)
        return pl.BlockSpec((1, 1, R, Ca), idx)

    in_specs = [x_spec(0), x_spec(1), x_spec(2),
                pl.BlockSpec((27, Ca, Cf), lambda n, d: (0, 0, 0)),
                pl.BlockSpec((1, Cf), lambda n, d: (0, 0)),
                pl.BlockSpec((9, R, 1), lambda n, d: (0, 0, 0))]
    inputs = [a, a, a, w27, bias, tap_masks]
    if apply_in_bn:
        in_specs += [pl.BlockSpec((1, Ca), lambda n, d: (0, 0)),
                     pl.BlockSpec((1, Ca), lambda n, d: (0, 0))]
        inputs += [in_scale, in_shift]

    y, st = pl.pallas_call(
        _make_conv_kernel(width, apply_in_bn),
        out_shape=(jax.ShapeDtypeStruct((N, D, R, Cf), jnp.float32),
                   jax.ShapeDtypeStruct((N, D, 2, Cf), jnp.float32)),
        grid=(N, D),
        in_specs=in_specs,
        out_specs=(pl.BlockSpec((1, 1, R, Cf), lambda n, d: (n, d, 0, 0)),
                   pl.BlockSpec((1, 1, 2, Cf), lambda n, d: (n, d, 0, 0))),
        compiler_params=pltpu.CompilerParams(
            dimension_semantics=("parallel", "parallel"),
            vmem_limit_bytes=_VMEM_LIMIT),
    )(*inputs)
    return y, st


# ----------------------------- final BN + ReLU ------------------------------

def _bn_relu_kernel(y_ref, sc_ref, sh_ref, o_ref):
    o_ref[0, 0] = jnp.maximum(y_ref[0, 0] * sc_ref[...] + sh_ref[...], 0.0)


def _bn_relu(y, scale, shift):
    N, D, R, Cf = y.shape
    return pl.pallas_call(
        _bn_relu_kernel,
        out_shape=jax.ShapeDtypeStruct((N, D, R, Cf), jnp.float32),
        grid=(N, D),
        in_specs=[pl.BlockSpec((1, 1, R, Cf), lambda n, d: (n, d, 0, 0)),
                  pl.BlockSpec((1, Cf), lambda n, d: (0, 0)),
                  pl.BlockSpec((1, Cf), lambda n, d: (0, 0))],
        out_specs=pl.BlockSpec((1, 1, R, Cf), lambda n, d: (n, d, 0, 0)),
        compiler_params=pltpu.CompilerParams(
            dimension_semantics=("parallel", "parallel"),
            vmem_limit_bytes=_VMEM_LIMIT),
    )(y, scale, shift)


# ----------------------------- helpers --------------------------------------

def _tap_masks(H, W):
    """(9, H*W, 1) f32: validity of each 3x3 in-plane tap per output row."""
    r = np.arange(H * W)
    h, w = r // W, r % W
    cols = []
    for kh in range(3):
        for kw in range(3):
            m = np.ones(H * W, bool)
            if kh == 0:
                m &= h >= 1
            if kh == 2:
                m &= h <= H - 2
            if kw == 0:
                m &= w >= 1
            if kw == 2:
                m &= w <= W - 2
            cols.append(m)
    return jnp.asarray(np.stack(cols, axis=0).astype(np.float32)[..., None])


def _prep_weights(w, b, Ca, Cf):
    """w: (3,3,3,Cin,Cout) -> (27, Ca, Cf) bf16 (zero-padded); b -> (1, Cf) f32."""
    Ci, Co = w.shape[3], w.shape[4]
    wp = jnp.zeros((3, 3, 3, Ca, Cf), jnp.float32).at[:, :, :, :Ci, :Co].set(w)
    bp = jnp.zeros((Cf,), jnp.float32).at[:Co].set(b)
    return wp.reshape(27, Ca, Cf).astype(jnp.bfloat16), bp.reshape(1, Cf)


def _bn_affine(stats, gamma, beta, count, Cf):
    """Training-mode BN scale/shift from per-step [sum, sumsq] partials."""
    Co = gamma.shape[0]
    s = jnp.sum(stats, axis=(0, 1))                       # (2, Cf)
    mean = s[0, :Co] / count
    var = jnp.maximum(s[1, :Co] / count - mean * mean, 0.0)
    # TODO(synk): E[x^2]-E[x]^2 can lose precision for very large N*D*H*W;
    # a compensated / Welford reduction would be more robust.
    scale = gamma / jnp.sqrt(var + EPS)
    shift = beta - mean * scale
    scale_p = jnp.zeros((Cf,), jnp.float32).at[:Co].set(scale)
    shift_p = jnp.zeros((Cf,), jnp.float32).at[:Co].set(shift)
    return scale_p.reshape(1, Cf), shift_p.reshape(1, Cf)


# ----------------------------- Down module ----------------------------------

def init_down_params(key, in_size, out_size):
    k1, k2, k3, k4 = jax.random.split(key, 4)
    return {
        "w1": 0.1 * jax.random.normal(k1, (3, 3, 3, in_size, out_size), jnp.float32),
        "b1": 0.1 * jax.random.normal(k2, (out_size,), jnp.float32),
        "g1": jnp.ones((out_size,), jnp.float32),          # BatchNorm3d default init
        "be1": jnp.zeros((out_size,), jnp.float32),
        "w2": 0.1 * jax.random.normal(k3, (3, 3, 3, out_size, out_size), jnp.float32),
        "b2": 0.1 * jax.random.normal(k4, (out_size,), jnp.float32),
        "g2": jnp.ones((out_size,), jnp.float32),
        "be2": jnp.zeros((out_size,), jnp.float32),
    }


def down_forward(x_ncdhw, params):
    """Equivalent of Down(in_size, out_size).forward. x: (N, Cin, D0, H0, W0)."""
    N, Ci, D0, H0, W0 = x_ncdhw.shape
    Co = params["b1"].shape[0]
    D, H, W = D0 // 2, H0 // 2, W0 // 2
    R = H * W
    Cop = _round_up(Co, LANES)

    x = jnp.transpose(x_ncdhw, (0, 2, 3, 4, 1))            # -> NDHWC (module glue)
    pooled = maxpool3d(x)                                  # (N, D, H, W, Ci) bf16
    a0 = pooled.reshape(N, D, R, Ci)                       # free reshape

    masks = _tap_masks(H, W)
    count = N * D * R

    # conv1 (+ per-step BN stats)
    w1, b1 = _prep_weights(params["w1"], params["b1"], Ci, Cop)
    y1, st1 = _conv_layer(a0, w1, b1, masks, W)
    sc1, sh1 = _bn_affine(st1, params["g1"], params["be1"], count, Cop)

    # conv2 with BN1+ReLU fused into its input path (+ per-step BN stats)
    w2, b2 = _prep_weights(params["w2"], params["b2"], Cop, Cop)
    y2, st2 = _conv_layer(y1, w2, b2, masks, W, in_scale=sc1, in_shift=sh1)
    sc2, sh2 = _bn_affine(st2, params["g2"], params["be2"], count, Cop)

    out = _bn_relu(y2, sc2, sh2)                            # (N, D, R, Cop) f32
    out = out.reshape(N, D, H, W, Cop)[..., :Co]
    return jnp.transpose(out, (0, 4, 1, 2, 3))              # back to NCDHW
    # TODO(synk): BatchNorm running_mean/var buffer updates are not modeled
    # (they do not affect the forward output).


if __name__ == "__main__":
    key = jax.random.PRNGKey(0)
    kx, kp = jax.random.split(key)

    N, Cin, Cout = 2, 4, 8
    D = H = W = 8
    x = jax.random.normal(kx, (N, Cin, D, H, W), jnp.float32)
    params = init_down_params(kp, Cin, Cout)

    out = jax.jit(down_forward)(x, params)
    out = jax.block_until_ready(out)

    assert out.shape == (N, Cout, D // 2, H // 2, W // 2), out.shape
    assert out.dtype == jnp.float32
    assert bool(jnp.all(jnp.isfinite(out)))
    assert bool(jnp.all(out >= 0.0))   # ReLU output
    print("KERNEL_OK")
</pallas_src>

<mosaic_0001>
module attributes {stable_mosaic.version = 11 : i64} {
  func.func @kernel(%arg0: i32, %arg1: i32, %arg2: memref<1x2x8x4x8xf32, #tpu.memory_space<vmem>>, %arg3: memref<1x1x4x4x4xbf16, #tpu.memory_space<vmem>>) attributes {dimension_semantics = [#tpu.dimension_semantics<parallel>, #tpu.dimension_semantics<parallel>], iteration_bounds = array<i64: 2, 4>, scalar_prefetch = 0 : i64, scratch_operands = 0 : i64, tpu.core_type = #tpu.core_type<tc>, window_params = [{transform_indices = @transform_0, window_bounds = array<i64: 1, 2, 8, 4, 8>}, {transform_indices = @transform_1, window_bounds = array<i64: 1, 1, 4, 4, 4>}]} {
    %c0 = arith.constant 0 : index
    %c0_0 = arith.constant 0 : index
    %c0_1 = arith.constant 0 : index
    %c0_2 = arith.constant 0 : index
    %c0_3 = arith.constant 0 : index
    %0 = vector.load %arg2[%c0, %c0_0, %c0_1, %c0_2, %c0_3] : memref<1x2x8x4x8xf32, #tpu.memory_space<vmem>>, vector<1x2x8x4x8xf32>
    %1 = vector.shape_cast %0 : vector<1x2x8x4x8xf32> to vector<2x8x4x8xf32>
    %2 = vector.extract_strided_slice %1 {offsets = [0, 0, 0, 0], sizes = [1, 8, 4, 8], strides = [1, 1, 1, 1]} : vector<2x8x4x8xf32> to vector<1x8x4x8xf32>
    %3 = vector.shape_cast %2 : vector<1x8x4x8xf32> to vector<8x4x8xf32>
    %4 = vector.extract_strided_slice %1 {offsets = [1, 0, 0, 0], sizes = [1, 8, 4, 8], strides = [1, 1, 1, 1]} : vector<2x8x4x8xf32> to vector<1x8x4x8xf32>
    %5 = vector.shape_cast %4 : vector<1x8x4x8xf32> to vector<8x4x8xf32>
    %6 = arith.maximumf %3, %5 : vector<8x4x8xf32>
    %7 = vector.extract_strided_slice %6 {offsets = [0, 0, 0], sizes = [8, 4, 4], strides = [1, 1, 1]} : vector<8x4x8xf32> to vector<8x4x4xf32>
    %8 = vector.extract_strided_slice %6 {offsets = [0, 0, 4], sizes = [8, 4, 4], strides = [1, 1, 1]} : vector<8x4x8xf32> to vector<8x4x4xf32>
    %9 = arith.maximumf %7, %8 : vector<8x4x4xf32>
    %10 = vector.shape_cast %9 : vector<8x4x4xf32> to vector<4x2x4x4xf32>
    %11 = vector.extract_strided_slice %10 {offsets = [0, 0, 0, 0], sizes = [4, 1, 4, 4], strides = [1, 1, 1, 1]} : vector<4x2x4x4xf32> to vector<4x1x4x4xf32>
    %12 = vector.shape_cast %11 : vector<4x1x4x4xf32> to vector<4x4x4xf32>
    %13 = vector.extract_strided_slice %10 {offsets = [0, 1, 0, 0], sizes = [4, 1, 4, 4], strides = [1, 1, 1, 1]} : vector<4x2x4x4xf32> to vector<4x1x4x4xf32>
    %14 = vector.shape_cast %13 : vector<4x1x4x4xf32> to vector<4x4x4xf32>
    %15 = arith.maximumf %12, %14 : vector<4x4x4xf32>
    %16 = arith.truncf %15 : vector<4x4x4xf32> to vector<4x4x4xbf16>
    %c0_4 = arith.constant 0 : index
    %c0_5 = arith.constant 0 : index
    %c0_6 = arith.constant 0 : index
    %c0_7 = arith.constant 0 : index
    %c0_8 = arith.constant 0 : index
    %17 = vector.load %arg3[%c0_4, %c0_5, %c0_6, %c0_7, %c0_8] : memref<1x1x4x4x4xbf16, #tpu.memory_space<vmem>>, vector<1x1x4x4x4xbf16>
    %18 = vector.shape_cast %17 : vector<1x1x4x4x4xbf16> to vector<4x4x4xbf16>
    %19 = vector.shape_cast %16 : vector<4x4x4xbf16> to vector<1x1x4x4x4xbf16>
    tpu.vector_store %arg3[%c0_4, %c0_5, %c0_6, %c0_7, %c0_8], %19 {strides = array<i32>} : memref<1x1x4x4x4xbf16, #tpu.memory_space<vmem>>, vector<1x1x4x4x4xbf16>,
    return
  }
  func.func @transform_0(%arg0: i32, %arg1: i32) -> (i32, i32, i32, i32, i32) {
    %c0_i32 = arith.constant 0 : i32
    %c0_i32_0 = arith.constant 0 : i32
    %c0_i32_1 = arith.constant 0 : i32
    %c0_i32_2 = arith.constant 0 : i32
    return %arg0, %arg1, %c0_i32, %c0_i32_0, %c0_i32_1 : i32, i32, i32, i32, i32
  }
  func.func @transform_1(%arg0: i32, %arg1: i32) -> (i32, i32, i32, i32, i32) {
    %c0_i32 = arith.constant 0 : i32
    %c0_i32_0 = arith.constant 0 : i32
    %c0_i32_1 = arith.constant 0 : i32
    %c0_i32_2 = arith.constant 0 : i32
    return %arg0, %arg1, %c0_i32, %c0_i32_0, %c0_i32_1 : i32, i32, i32, i32, i32
  }
}

module attributes {stable_mosaic.version = 11 : i64} {
  func.func @kernel(%arg0: i32, %arg1: i32, %arg2: memref<1x1x16x4xbf16, #tpu.memory_space<vmem>>, %arg3: memref<1x1x16x4xbf16, #tpu.memory_space<vmem>>, %arg4: memref<1x1x16x4xbf16, #tpu.memory_space<vmem>>, %arg5: memref<27x4x128xbf16, #tpu.memory_space<vmem>>, %arg6: memref<1x128xf32, #tpu.memory_space<vmem>>, %arg7: memref<9x16x1xf32, #tpu.memory_space<vmem>>, %arg8: memref<1x1x16x128xf32, #tpu.memory_space<vmem>>, %arg9: memref<1x1x2x128xf32, #tpu.memory_space<vmem>>) attributes {dimension_semantics = [#tpu.dimension_semantics<parallel>, #tpu.dimension_semantics<parallel>], iteration_bounds = array<i64: 2, 4>, scalar_prefetch = 0 : i64, scratch_operands = 0 : i64, tpu.core_type = #tpu.core_type<tc>, window_params = [{transform_indices = @transform_0, window_bounds = array<i64: 1, 1, 16, 4>}, {transform_indices = @transform_1, window_bounds = array<i64: 1, 1, 16, 4>}, {transform_indices = @transform_2, window_bounds = array<i64: 1, 1, 16, 4>}, {pipeline_mode = #tpu.pipeline_mode<synchronous>, transform_indices = @transform_3, window_bounds = array<i64: 27, 4, 128>}, {pipeline_mode = #tpu.pipeline_mode<synchronous>, transform_indices = @transform_4, window_bounds = array<i64: 1, 128>}, {pipeline_mode = #tpu.pipeline_mode<synchronous>, transform_indices = @transform_5, window_bounds = array<i64: 9, 16, 1>}, {transform_indices = @transform_6, window_bounds = array<i64: 1, 1, 16, 128>}, {transform_indices = @transform_7, window_bounds = array<i64: 1, 1, 2, 128>}]} {
    %c0 = arith.constant 0 : index
    %c0_0 = arith.constant 0 : index
    %c0_1 = arith.constant 0 : index
    %0 = vector.load %arg7[%c0, %c0_0, %c0_1] : memref<9x16x1xf32, #tpu.memory_space<vmem>>, vector<1x16x1xf32>
    %1 = vector.shape_cast %0 : vector<1x16x1xf32> to vector<16x1xf32>
    %c1 = arith.constant 1 : index
    %c0_2 = arith.constant 0 : index
    %c0_3 = arith.constant 0 : index
    %2 = vector.load %arg7[%c1, %c0_2, %c0_3] : memref<9x16x1xf32, #tpu.memory_space<vmem>>, vector<1x16x1xf32>
    %3 = vector.shape_cast %2 : vector<1x16x1xf32> to vector<16x1xf32>
    %c2 = arith.constant 2 : index
    %c0_4 = arith.constant 0 : index
    %c0_5 = arith.constant 0 : index
    %4 = vector.load %arg7[%c2, %c0_4, %c0_5] : memref<9x16x1xf32, #tpu.memory_space<vmem>>, vector<1x16x1xf32>
    %5 = vector.shape_cast %4 : vector<1x16x1xf32> to vector<16x1xf32>
    %c3 = arith.constant 3 : index
    %c0_6 = arith.constant 0 : index
    %c0_7 = arith.constant 0 : index
    %6 = vector.load %arg7[%c3, %c0_6, %c0_7] : memref<9x16x1xf32, #tpu.memory_space<vmem>>, vector<1x16x1xf32>
    %7 = vector.shape_cast %6 : vector<1x16x1xf32> to vector<16x1xf32>
    %c5 = arith.constant 5 : index
    %c0_8 = arith.constant 0 : index
    %c0_9 = arith.constant 0 : index
    %8 = vector.load %arg7[%c5, %c0_8, %c0_9] : memref<9x16x1xf32, #tpu.memory_space<vmem>>, vector<1x16x1xf32>
    %9 = vector.shape_cast %8 : vector<1x16x1xf32> to vector<16x1xf32>
    %c6 = arith.constant 6 : index
    %c0_10 = arith.constant 0 : index
    %c0_11 = arith.constant 0 : index
    %10 = vector.load %arg7[%c6, %c0_10, %c0_11] : memref<9x16x1xf32, #tpu.memory_space<vmem>>, vector<1x16x1xf32>
    %11 = vector.shape_cast %10 : vector<1x16x1xf32> to vector<16x1xf32>
    %c7 = arith.constant 7 : index
    %c0_12 = arith.constant 0 : index
    %c0_13 = arith.constant 0 : index
    %12 = vector.load %arg7[%c7, %c0_12, %c0_13] : memref<9x16x1xf32, #tpu.memory_space<vmem>>, vector<1x16x1xf32>
    %13 = vector.shape_cast %12 : vector<1x16x1xf32> to vector<16x1xf32>
    %c8 = arith.constant 8 : index
    %c0_14 = arith.constant 0 : index
    %c0_15 = arith.constant 0 : index
    %14 = vector.load %arg7[%c8, %c0_14, %c0_15] : memref<9x16x1xf32, #tpu.memory_space<vmem>>, vector<1x16x1xf32>
    %15 = vector.shape_cast %14 : vector<1x16x1xf32> to vector<16x1xf32>
    %cst = arith.constant 0.000000e+00 : f32
    %16 = vector.broadcast %cst : f32 to vector<16x128xf32>
    %c0_16 = arith.constant 0 : index
    %c0_17 = arith.constant 0 : index
    %c0_18 = arith.constant 0 : index
    %c0_19 = arith.constant 0 : index
    %17 = vector.load %arg2[%c0_16, %c0_17, %c0_18, %c0_19] : memref<1x1x16x4xbf16, #tpu.memory_space<vmem>>, vector<1x1x16x4xbf16>
    %18 = vector.shape_cast %17 : vector<1x1x16x4xbf16> to vector<16x4xbf16>
    %19 = arith.extf %18 : vector<16x4xbf16> to vector<16x4xf32>
    %c1_i32 = arith.constant 1 : i32
    %20 = arith.subi %arg1, %c1_i32 : i32
    %c0_i32 = arith.constant 0 : i32
    %21 = arith.addi %20, %c0_i32 : i32
    %c0_i32_20 = arith.constant 0 : i32
    %22 = arith.cmpi sge, %21, %c0_i32_20 : i32
    %c3_i32 = arith.constant 3 : i32
    %23 = arith.cmpi sle, %21, %c3_i32 : i32
    %24 = arith.andi %22, %23 : i1
    %25 = arith.extui %24 : i1 to i32
    %26 = arith.sitofp %25 : i32 to f32
    %27 = vector.broadcast %26 : f32 to vector<16x4xf32>
    %28 = arith.mulf %19, %27 : vector<16x4xf32>
    %c5_i32 = arith.constant 5 : i32
    %29 = tpu.dynamic_rotate %28 by %c5_i32 dim 0 : vector<16x4xf32>, i32 -> vector<16x4xf32>
    %30 = vector.broadcast %1 : vector<16x1xf32> to vector<16x4xf32>
    %31 = arith.mulf %29, %30 : vector<16x4xf32>
    %32 = arith.truncf %31 : vector<16x4xf32> to vector<16x4xbf16>
    %c0_21 = arith.constant 0 : index
    %c0_22 = arith.constant 0 : index
    %c0_23 = arith.constant 0 : index
    %33 = vector.load %arg5[%c0_21, %c0_22, %c0_23] : memref<27x4x128xbf16, #tpu.memory_space<vmem>>, vector<1x4x128xbf16>
    %34 = vector.shape_cast %33 : vector<1x4x128xbf16> to vector<4x128xbf16>
    %cst_24 = arith.constant dense<0.000000e+00> : vector<16x128xf32>
    %35 = tpu.matmul %32, %34, %cst_24 {dimension_numbers = #tpu.dot_dimension_numbers<[1], [0], [0], [1], [0, 0, 1, 1], [], []>} : vector<16x4xbf16>, vector<4x128xbf16>, vector<16x128xf32> -> vector<16x128xf32>
    %36 = arith.addf %16, %35 : vector<16x128xf32>
    %c4_i32 = arith.constant 4 : i32
    %37 = tpu.dynamic_rotate %28 by %c4_i32 dim 0 : vector<16x4xf32>, i32 -> vector<16x4xf32>
    %38 = vector.broadcast %3 : vector<16x1xf32> to vector<16x4xf32>
    %39 = arith.mulf %37, %38 : vector<16x4xf32>
    %40 = arith.truncf %39 : vector<16x4xf32> to vector<16x4xbf16>
    %c1_25 = arith.constant 1 : index
    %c0_26 = arith.constant 0 : index
    %c0_27 = arith.constant 0 : index
    %41 = vector.load %arg5[%c1_25, %c0_26, %c0_27] : memref<27x4x128xbf16, #tpu.memory_space<vmem>>, vector<1x4x128xbf16>
    %42 = vector.shape_cast %41 : vector<1x4x128xbf16> to vector<4x128xbf16>
    %cst_28 = arith.constant dense<0.000000e+00> : vector<16x128xf32>
    %43 = tpu.matmul %40, %42, %cst_28 {dimension_numbers = #tpu.dot_dimension_numbers<[1], [0], [0], [1], [0, 0, 1, 1], [], []>} : vector<16x4xbf16>, vector<4x128xbf16>, vector<16x128xf32> -> vector<16x128xf32>
    %44 = arith.addf %36, %43 : vector<16x128xf32>
    %c3_i32_29 = arith.constant 3 : i32
    %45 = tpu.dynamic_rotate %28 by %c3_i32_29 dim 0 : vector<16x4xf32>, i32 -> vector<16x4xf32>
    %46 = vector.broadcast %5 : vector<16x1xf32> to vector<16x4xf32>
    %47 = arith.mulf %45, %46 : vector<16x4xf32>
    %48 = arith.truncf %47 : vector<16x4xf32> to vector<16x4xbf16>
    %c2_30 = arith.constant 2 : index
    %c0_31 = arith.constant 0 : index
    %c0_32 = arith.constant 0 : index
    %49 = vector.load %arg5[%c2_30, %c0_31, %c0_32] : memref<27x4x128xbf16, #tpu.memory_space<vmem>>, vector<1x4x128xbf16>
    %50 = vector.shape_cast %49 : vector<1x4x128xbf16> to vector<4x128xbf16>
    %cst_33 = arith.constant dense<0.000000e+00> : vector<16x128xf32>
    %51 = tpu.matmul %48, %50, %cst_33 {dimension_numbers = #tpu.dot_dimension_numbers<[1], [0], [0], [1], [0, 0, 1, 1], [], []>} : vector<16x4xbf16>, vector<4x128xbf16>, vector<16x128xf32> -> vector<16x128xf32>
    %52 = arith.addf %44, %51 : vector<16x128xf32>
    %c1_i32_34 = arith.constant 1 : i32
    %53 = tpu.dynamic_rotate %28 by %c1_i32_34 dim 0 : vector<16x4xf32>, i32 -> vector<16x4xf32>
    %54 = vector.broadcast %7 : vector<16x1xf32> to vector<16x4xf32>
    %55 = arith.mulf %53, %54 : vector<16x4xf32>
    %56 = arith.truncf %55 : vector<16x4xf32> to vector<16x4xbf16>
    %c3_35 = arith.constant 3 : index
    %c0_36 = arith.constant 0 : index
    %c0_37 = arith.constant 0 : index
    %57 = vector.load %arg5[%c3_35, %c0_36, %c0_37] : memref<27x4x128xbf16, #tpu.memory_space<vmem>>, vector<1x4x128xbf16>
    %58 = vector.shape_cast %57 : vector<1x4x128xbf16> to vector<4x128xbf16>
    %cst_38 = arith.constant dense<0.000000e+00> : vector<16x128xf32>
    %59 = tpu.matmul %56, %58, %cst_38 {dimension_numbers = #tpu.dot_dimension_numbers<[1], [0], [0], [1], [0, 0, 1, 1], [], []>} : vector<16x4xbf16>, vector<4x128xbf16>, vector<16x128xf32> -> vector<16x128xf32>
    %60 = arith.addf %52, %59 : vector<16x128xf32>
    %61 = arith.truncf %28 : vector<16x4xf32> to vector<16x4xbf16>
    %c4 = arith.constant 4 : index
    %c0_39 = arith.constant 0 : index
    %c0_40 = arith.constant 0 : index
    %62 = vector.load %arg5[%c4, %c0_39, %c0_40] : memref<27x4x128xbf16, #tpu.memory_space<vmem>>, vector<1x4x128xbf16>
    %63 = vector.shape_cast %62 : vector<1x4x128xbf16> to vector<4x128xbf16>
    %cst_41 = arith.constant dense<0.000000e+00> : vector<16x128xf32>
    %64 = tpu.matmul %61, %63, %cst_41 {dimension_numbers = #tpu.dot_dimension_numbers<[1], [0], [0], [1], [0, 0, 1, 1], [], []>} : vector<16x4xbf16>, vector<4x128xbf16>, vector<16x128xf32> -> vector<16x128xf32>
    %65 = arith.addf %60, %64 : vector<16x128xf32>
    %c15_i32 = arith.constant 15 : i32
    %66 = tpu.dynamic_rotate %28 by %c15_i32 dim 0 : vector<16x4xf32>, i32 -> vector<16x4xf32>
    %67 = vector.broadcast %9 : vector<16x1xf32> to vector<16x4xf32>
    %68 = arith.mulf %66, %67 : vector<16x4xf32>
    %69 = arith.truncf %68 : vector<16x4xf32> to vector<16x4xbf16>
    %c5_42 = arith.constant 5 : index
    %c0_43 = arith.constant 0 : index
    %c0_44 = arith.constant 0 : index
    %70 = vector.load %arg5[%c5_42, %c0_43, %c0_44] : memref<27x4x128xbf16, #tpu.memory_space<vmem>>, vector<1x4x128xbf16>
    %71 = vector.shape_cast %70 : vector<1x4x128xbf16> to vector<4x128xbf16>
    %cst_45 = arith.constant dense<0.000000e+00> : vector<16x128xf32>
    %72 = tpu.matmul %69, %71, %cst_45 {dimension_numbers = #tpu.dot_dimension_numbers<[1], [0], [0], [1], [0, 0, 1, 1], [], []>} : vector<16x4xbf16>, vector<4x128xbf16>, vector<16x128xf32> -> vector<16x128xf32>
    %73 = arith.addf %65, %72 : vector<16x128xf32>
    %c13_i32 = arith.constant 13 : i32
    %74 = tpu.dynamic_rotate %28 by %c13_i32 dim 0 : vector<16x4xf32>, i32 -> vector<16x4xf32>
    %75 = vector.broadcast %11 : vector<16x1xf32> to vector<16x4xf32>
    %76 = arith.mulf %74, %75 : vector<16x4xf32>
    %77 = arith.truncf %76 : vector<16x4xf32> to vector<16x4xbf16>
    %c6_46 = arith.constant 6 : index
    %c0_47 = arith.constant 0 : index
    %c0_48 = arith.constant 0 : index
    %78 = vector.load %arg5[%c6_46, %c0_47, %c0_48] : memref<27x4x128xbf16, #tpu.memory_space<vmem>>, vector<1x4x128xbf16>
    %79 = vector.shape_cast %78 : vector<1x4x128xbf16> to vector<4x128xbf16>
    %cst_49 = arith.constant dense<0.000000e+00> : vector<16x128xf32>
    %80 = tpu.matmul %77, %79, %cst_49 {dimension_numbers = #tpu.dot_dimension_numbers<[1], [0], [0], [1], [0, 0, 1, 1], [], []>} : vector<16x4xbf16>, vector<4x128xbf16>, vector<16x128xf32> -> vector<16x128xf32>
    %81 = arith.addf %73, %80 : vector<16x128xf32>
    %c12_i32 = arith.constant 12 : i32
    %82 = tpu.dynamic_rotate %28 by %c12_i32 dim 0 : vector<16x4xf32>, i32 -> vector<16x4xf32>
    %83 = vector.broadcast %13 : vector<16x1xf32> to vector<16x4xf32>
    %84 = arith.mulf %82, %83 : vector<16x4xf32>
    %85 = arith.truncf %84 : vector<16x4xf32> to vector<16x4xbf16>
    %c7_50 = arith.constant 7 : index
    %c0_51 = arith.constant 0 : index
    %c0_52 = arith.constant 0 : index
    %86 = vector.load %arg5[%c7_50, %c0_51, %c0_52] : memref<27x4x128xbf16, #tpu.memory_space<vmem>>, vector<1x4x128xbf16>
    %87 = vector.shape_cast %86 : vector<1x4x128xbf16> to vector<4x128xbf16>
    %cst_53 = arith.constant dense<0.000000e+00> : vector<16x128xf32>
    %88 = tpu.matmul %85, %87, %cst_53 {dimension_numbers = #tpu.dot_dimension_numbers<[1], [0], [0], [1], [0, 0, 1, 1], [], []>} : vector<16x4xbf16>, vector<4x128xbf16>, vector<16x128xf32> -> vector<16x128xf32>
    %89 = arith.addf %81, %88 : vector<16x128xf32>
    %c11_i32 = arith.constant 11 : i32
    %90 = tpu.dynamic_rotate %28 by %c11_i32 dim 0 : vector<16x4xf32>, i32 -> vector<16x4xf32>
    %91 = vector.broadcast %15 : vector<16x1xf32> to vector<16x4xf32>
    %92 = arith.mulf %90, %91 : vector<16x4xf32>
    %93 = arith.truncf %92 : vector<16x4xf32> to vector<16x4xbf16>
    %c8_54 = arith.constant 8 : index
    %c0_55 = arith.constant 0 : index
    %c0_56 = arith.constant 0 : index
    %94 = vector.load %arg5[%c8_54, %c0_55, %c0_56] : memref<27x4x128xbf16, #tpu.memory_space<vmem>>, vector<1x4x128xbf16>
    %95 = vector.shape_cast %94 : vector<1x4x128xbf16> to vector<4x128xbf16>
    %cst_57 = arith.constant dense<0.000000e+00> : vector<16x128xf32>
    %96 = tpu.matmul %93, %95, %cst_57 {dimension_numbers = #tpu.dot_dimension_numbers<[1], [0], [0], [1], [0, 0, 1, 1], [], []>} : vector<16x4xbf16>, vector<4x128xbf16>, vector<16x128xf32> -> vector<16x128xf32>
    %97 = arith.addf %89, %96 : vector<16x128xf32>
    %c0_58 = arith.constant 0 : index
    %c0_59 = arith.constant 0 : index
    %c0_60 = arith.constant 0 : index
    %c0_61 = arith.constant 0 : index
    %98 = vector.load %arg3[%c0_58, %c0_59, %c0_60, %c0_61] : memref<1x1x16x4xbf16, #tpu.memory_space<vmem>>, vector<1x1x16x4xbf16>
    %99 = vector.shape_cast %98 : vector<1x1x16x4xbf16> to vector<16x4xbf16>
    %100 = arith.extf %99 : vector<16x4xbf16> to vector<16x4xf32>
    %c5_i32_62 = arith.constant 5 : i32
    %101 = tpu.dynamic_rotate %100 by %c5_i32_62 dim 0 : vector<16x4xf32>, i32 -> vector<16x4xf32>
    %102 = vector.broadcast %1 : vector<16x1xf32> to vector<16x4xf32>
    %103 = arith.mulf %101, %102 : vector<16x4xf32>
    %104 = arith.truncf %103 : vector<16x4xf32> to vector<16x4xbf16>
    %c9 = arith.constant 9 : index
    %c0_63 = arith.constant 0 : index
    %c0_64 = arith.constant 0 : index
    %105 = vector.load %arg5[%c9, %c0_63, %c0_64] : memref<27x4x128xbf16, #tpu.memory_space<vmem>>, vector<1x4x128xbf16>
    %106 = vector.shape_cast %105 : vector<1x4x128xbf16> to vector<4x128xbf16>
    %cst_65 = arith.constant dense<0.000000e+00> : vector<16x128xf32>
    %107 = tpu.matmul %104, %106, %cst_65 {dimension_numbers = #tpu.dot_dimension_numbers<[1], [0], [0], [1], [0, 0, 1, 1], [], []>} : vector<16x4xbf16>, vector<4x128xbf16>, vector<16x128xf32> -> vector<16x128xf32>
    %108 = arith.addf %97, %107 : vector<16x128xf32>
    %c4_i32_66 = arith.constant 4 : i32
    %109 = tpu.dynamic_rotate %100 by %c4_i32_66 dim 0 : vector<16x4xf32>, i32 -> vector<16x4xf32>
    %110 = vector.broadcast %3 : vector<16x1xf32> to vector<16x4xf32>
    %111 = arith.mulf %109, %110 : vector<16x4xf32>
    %112 = arith.truncf %111 : vector<16x4xf32> to vector<16x4xbf16>
    %c10 = arith.constant 10 : index
    %c0_67 = arith.constant 0 : index
    %c0_68 = arith.constant 0 : index
    %113 = vector.load %arg5[%c10, %c0_67, %c0_68] : memref<27x4x128xbf16, #tpu.memory_space<vmem>>, vector<1x4x128xbf16>
    %114 = vector.shape_cast %113 : vector<1x4x128xbf16> to vector<4x128xbf16>
    %cst_69 = arith.constant dense<0.000000e+00> : vector<16x128xf32>
    %115 = tpu.matmul %112, %114, %cst_69 {dimension_numbers = #tpu.dot_dimension_numbers<[1], [0], [0], [1], [0, 0, 1, 1], [], []>} : vector<16x4xbf16>, vector<4x128xbf16>, vector<16x128xf32> -> vector<16x128xf32>
    %116 = arith.addf %108, %115 : vector<16x128xf32>
    %c3_i32_70 = arith.constant 3 : i32
    %117 = tpu.dynamic_rotate %100 by %c3_i32_70 dim 0 : vector<16x4xf32>, i32 -> vector<16x4xf32>
    %118 = vector.broadcast %5 : vector<16x1xf32> to vector<16x4xf32>
    %119 = arith.mulf %117, %118 : vector<16x4xf32>
    %120 = arith.truncf %119 : vector<16x4xf32> to vector<16x4xbf16>
    %c11 = arith.constant 11 : index
    %c0_71 = arith.constant 0 : index
    %c0_72 = arith.constant 0 : index
    %121 = vector.load %arg5[%c11, %c0_71, %c0_72] : memref<27x4x128xbf16, #tpu.memory_space<vmem>>, vector<1x4x128xbf16>
    %122 = vector.shape_cast %121 : vector<1x4x128xbf16> to vector<4x128xbf16>
    %cst_73 = arith.constant dense<0.000000e+00> : vector<16x128xf32>
    %123 = tpu.matmul %120, %122, %cst_73 {dimension_numbers = #tpu.dot_dimension_numbers<[1], [0], [0], [1], [0, 0, 1, 1], [], []>} : vector<16x4xbf16>, vector<4x128xbf16>, vector<16x128xf32> -> vector<16x128xf32>
    %124 = arith.addf %116, %123 : vector<16x128xf32>
    %c1_i32_74 = arith.constant 1 : i32
    %125 = tpu.dynamic_rotate %100 by %c1_i32_74 dim 0 : vector<16x4xf32>, i32 -> vector<16x4xf32>
    %126 = vector.broadcast %7 : vector<16x1xf32> to vector<16x4xf32>
    %127 = arith.mulf %125, %126 : vector<16x4xf32>
    %128 = arith.truncf %127 : vector<16x4xf32> to vector<16x4xbf16>
    %c12 = arith.constant 12 : index
    %c0_75 = arith.constant 0 : index
    %c0_76 = arith.constant 0 : index
    %129 = vector.load %arg5[%c12, %c0_75, %c0_76] : memref<27x4x128xbf16, #tpu.memory_space<vmem>>, vector<1x4x128xbf16>
    %130 = vector.shape_cast %129 : vector<1x4x128xbf16> to vector<4x128xbf16>
    %cst_77 = arith.constant dense<0.000000e+00> : vector<16x128xf32>
    %131 = tpu.matmul %128, %130, %cst_77 {dimension_numbers = #tpu.dot_dimension_numbers<[1], [0], [0], [1], [0, 0, 1, 1], [], []>} : vector<16x4xbf16>, vector<4x128xbf16>, vector<16x128xf32> -> vector<16x128xf32>
    %132 = arith.addf %124, %131 : vector<16x128xf32>
    %133 = arith.truncf %100 : vector<16x4xf32> to vector<16x4xbf16>
    %c13 = arith.constant 13 : index
    %c0_78 = arith.constant 0 : index
    %c0_79 = arith.constant 0 : index
    %134 = vector.load %arg5[%c13, %c0_78, %c0_79] : memref<27x4x128xbf16, #tpu.memory_space<vmem>>, vector<1x4x128xbf16>
    %135 = vector.shape_cast %134 : vector<1x4x128xbf16> to vector<4x128xbf16>
    %cst_80 = arith.constant dense<0.000000e+00> : vector<16x128xf32>
    %136 = tpu.matmul %133, %135, %cst_80 {dimension_numbers = #tpu.dot_dimension_numbers<[1], [0], [0], [1], [0, 0, 1, 1], [], []>} : vector<16x4xbf16>, vector<4x128xbf16>, vector<16x128xf32> -> vector<16x128xf32>
    %137 = arith.addf %132, %136 : vector<16x128xf32>
    %c15_i32_81 = arith.constant 15 : i32
    %138 = tpu.dynamic_rotate %100 by %c15_i32_81 dim 0 : vector<16x4xf32>, i32 -> vector<16x4xf32>
    %139 = vector.broadcast %9 : vector<16x1xf32> to vector<16x4xf32>
    %140 = arith.mulf %138, %139 : vector<16x4xf32>
    %141 = arith.truncf %140 : vector<16x4xf32> to vector<16x4xbf16>
    %c14 = arith.constant 14 : index
    %c0_82 = arith.constant 0 : index
    %c0_83 = arith.constant 0 : index
    %142 = vector.load %arg5[%c14, %c0_82, %c0_83] : memref<27x4x128xbf16, #tpu.memory_space<vmem>>, vector<1x4x128xbf16>
    %143 = vector.shape_cast %142 : vector<1x4x128xbf16> to vector<4x128xbf16>
    %cst_84 = arith.constant dense<0.000000e+00> : vector<16x128xf32>
    %144 = tpu.matmul %141, %143, %cst_84 {dimension_numbers = #tpu.dot_dimension_numbers<[1], [0], [0], [1], [0, 0, 1, 1], [], []>} : vector<16x4xbf16>, vector<4x128xbf16>, vector<16x128xf32> -> vector<16x128xf32>
    %145 = arith.addf %137, %144 : vector<16x128xf32>
    %c13_i32_85 = arith.constant 13 : i32
    %146 = tpu.dynamic_rotate %100 by %c13_i32_85 dim 0 : vector<16x4xf32>, i32 -> vector<16x4xf32>
    %147 = vector.broadcast %11 : vector<16x1xf32> to vector<16x4xf32>
    %148 = arith.mulf %146, %147 : vector<16x4xf32>
    %149 = arith.truncf %148 : vector<16x4xf32> to vector<16x4xbf16>
    %c15 = arith.constant 15 : index
    %c0_86 = arith.constant 0 : index
    %c0_87 = arith.constant 0 : index
    %150 = vector.load %arg5[%c15, %c0_86, %c0_87] : memref<27x4x128xbf16, #tpu.memory_space<vmem>>, vector<1x4x128xbf16>
    %151 = vector.shape_cast %150 : vector<1x4x128xbf16> to vector<4x128xbf16>
    %cst_88 = arith.constant dense<0.000000e+00> : vector<16x128xf32>
    %152 = tpu.matmul %149, %151, %cst_88 {dimension_numbers = #tpu.dot_dimension_numbers<[1], [0], [0], [1], [0, 0, 1, 1], [], []>} : vector<16x4xbf16>, vector<4x128xbf16>, vector<16x128xf32> -> vector<16x128xf32>
    %153 = arith.addf %145, %152 : vector<16x128xf32>
    %c12_i32_89 = arith.constant 12 : i32
    %154 = tpu.dynamic_rotate %100 by %c12_i32_89 dim 0 : vector<16x4xf32>, i32 -> vector<16x4xf32>
    %155 = vector.broadcast %13 : vector<16x1xf32> to vector<16x4xf32>
    %156 = arith.mulf %154, %155 : vector<16x4xf32>
    %157 = arith.truncf %156 : vector<16x4xf32> to vector<16x4xbf16>
    %c16 = arith.constant 16 : index
    %c0_90 = arith.constant 0 : index
    %c0_91 = arith.constant 0 : index
    %158 = vector.load %arg5[%c16, %c0_90, %c0_91] : memref<27x4x128xbf16, #tpu.memory_space<vmem>>, vector<1x4x128xbf16>
    %159 = vector.shape_cast %158 : vector<1x4x128xbf16> to vector<4x128xbf16>
    %cst_92 = arith.constant dense<0.000000e+00> : vector<16x128xf32>
    %160 = tpu.matmul %157, %159, %cst_92 {dimension_numbers = #tpu.dot_dimension_numbers<[1], [0], [0], [1], [0, 0, 1, 1], [], []>} : vector<16x4xbf16>, vector<4x128xbf16>, vector<16x128xf32> -> vector<16x128xf32>
    %161 = arith.addf %153, %160 : vector<16x128xf32>
    %c11_i32_93 = arith.constant 11 : i32
    %162 = tpu.dynamic_rotate %100 by %c11_i32_93 dim 0 : vector<16x4xf32>, i32 -> vector<16x4xf32>
    %163 = vector.broadcast %15 : vector<16x1xf32> to vector<16x4xf32>
    %164 = arith.mulf %162, %163 : vector<16x4xf32>
    %165 = arith.truncf %164 : vector<16x4xf32> to vector<16x4xbf16>
    %c17 = arith.constant 17 : index
    %c0_94 = arith.constant 0 : index
    %c0_95 = arith.constant 0 : index
    %166 = vector.load %arg5[%c17, %c0_94, %c0_95] : memref<27x4x128xbf16, #tpu.memory_space<vmem>>, vector<1x4x128xbf16>
    %167 = vector.shape_cast %166 : vector<1x4x128xbf16> to vector<4x128xbf16>
    %cst_96 = arith.constant dense<0.000000e+00> : vector<16x128xf32>
    %168 = tpu.matmul %165, %167, %cst_96 {dimension_numbers = #tpu.dot_dimension_numbers<[1], [0], [0], [1], [0, 0, 1, 1], [], []>} : vector<16x4xbf16>, vector<4x128xbf16>, vector<16x128xf32> -> vector<16x128xf32>
    %169 = arith.addf %161, %168 : vector<16x128xf32>
    %c0_97 = arith.constant 0 : index
    %c0_98 = arith.constant 0 : index
    %c0_99 = arith.constant 0 : index
    %c0_100 = arith.constant 0 : index
    %170 = vector.load %arg4[%c0_97, %c0_98, %c0_99, %c0_100] : memref<1x1x16x4xbf16, #tpu.memory_space<vmem>>, vector<1x1x16x4xbf16>
    %171 = vector.shape_cast %170 : vector<1x1x16x4xbf16> to vector<16x4xbf16>
    %172 = arith.extf %171 : vector<16x4xbf16> to vector<16x4xf32>
    %c1_i32_101 = arith.constant 1 : i32
    %173 = arith.subi %arg1, %c1_i32_101 : i32
    %c2_i32 = arith.constant 2 : i32
    %174 = arith.addi %173, %c2_i32 : i32
    %c0_i32_102 = arith.constant 0 : i32
    %175 = arith.cmpi sge, %174, %c0_i32_102 : i32
    %c3_i32_103 = arith.constant 3 : i32
    %176 = arith.cmpi sle, %174, %c3_i32_103 : i32
    %177 = arith.andi %175, %176 : i1
    %178 = arith.extui %177 : i1 to i32
    %179 = arith.sitofp %178 : i32 to f32
    %180 = vector.broadcast %179 : f32 to vector<16x4xf32>
    %181 = arith.mulf %172, %180 : vector<16x4xf32>
    %c5_i32_104 = arith.constant 5 : i32
    %182 = tpu.dynamic_rotate %181 by %c5_i32_104 dim 0 : vector<16x4xf32>, i32 -> vector<16x4xf32>
    %183 = vector.broadcast %1 : vector<16x1xf32> to vector<16x4xf32>
    %184 = arith.mulf %182, %183 : vector<16x4xf32>
    %185 = arith.truncf %184 : vector<16x4xf32> to vector<16x4xbf16>
    %c18 = arith.constant 18 : index
    %c0_105 = arith.constant 0 : index
    %c0_106 = arith.constant 0 : index
    %186 = vector.load %arg5[%c18, %c0_105, %c0_106] : memref<27x4x128xbf16, #tpu.memory_space<vmem>>, vector<1x4x128xbf16>
    %187 = vector.shape_cast %186 : vector<1x4x128xbf16> to vector<4x128xbf16>
    %cst_107 = arith.constant dense<0.000000e+00> : vector<16x128xf32>
    %188 = tpu.matmul %185, %187, %cst_107 {dimension_numbers = #tpu.dot_dimension_numbers<[1], [0], [0], [1], [0, 0, 1, 1], [], []>} : vector<16x4xbf16>, vector<4x128xbf16>, vector<16x128xf32> -> vector<16x128xf32>
    %189 = arith.addf %169, %188 : vector<16x128xf32>
    %c4_i32_108 = arith.constant 4 : i32
    %190 = tpu.dynamic_rotate %181 by %c4_i32_108 dim 0 : vector<16x4xf32>, i32 -> vector<16x4xf32>
    %191 = vector.broadcast %3 : vector<16x1xf32> to vector<16x4xf32>
    %192 = arith.mulf %190, %191 : vector<16x4xf32>
    %193 = arith.truncf %192 : vector<16x4xf32> to vector<16x4xbf16>
    %c19 = arith.constant 19 : index
    %c0_109 = arith.constant 0 : index
    %c0_110 = arith.constant 0 : index
    %194 = vector.load %arg5[%c19, %c0_109, %c0_110] : memref<27x4x128xbf16, #tpu.memory_space<vmem>>, vector<1x4x128xbf16>
    %195 = vector.shape_cast %194 : vector<1x4x128xbf16> to vector<4x128xbf16>
    %cst_111 = arith.constant dense<0.000000e+00> : vector<16x128xf32>
    %196 = tpu.matmul %193, %195, %cst_111 {dimension_numbers = #tpu.dot_dimension_numbers<[1], [0], [0], [1], [0, 0, 1, 1], [], []>} : vector<16x4xbf16>, vector<4x128xbf16>, vector<16x128xf32> -> vector<16x128xf32>
    %197 = arith.addf %189, %196 : vector<16x128xf32>
    %c3_i32_112 = arith.constant 3 : i32
    %198 = tpu.dynamic_rotate %181 by %c3_i32_112 dim 0 : vector<16x4xf32>, i32 -> vector<16x4xf32>
    %199 = vector.broadcast %5 : vector<16x1xf32> to vector<16x4xf32>
    %200 = arith.mulf %198, %199 : vector<16x4xf32>
    %201 = arith.truncf %200 : vector<16x4xf32> to vector<16x4xbf16>
    %c20 = arith.constant 20 : index
    %c0_113 = arith.constant 0 : index
    %c0_114 = arith.constant 0 : index
    %202 = vector.load %arg5[%c20, %c0_113, %c0_114] : memref<27x4x128xbf16, #tpu.memory_space<vmem>>, vector<1x4x128xbf16>
    %203 = vector.shape_cast %202 : vector<1x4x128xbf16> to vector<4x128xbf16>
    %cst_115 = arith.constant dense<0.000000e+00> : vector<16x128xf32>
    %204 = tpu.matmul %201, %203, %cst_115 {dimension_numbers = #tpu.dot_dimension_numbers<[1], [0], [0], [1], [0, 0, 1, 1], [], []>} : vector<16x4xbf16>, vector<4x128xbf16>, vector<16x128xf32> -> vector<16x128xf32>
    %205 = arith.addf %197, %204 : vector<16x128xf32>
    %c1_i32_116 = arith.constant 1 : i32
    %206 = tpu.dynamic_rotate %181 by %c1_i32_116 dim 0 : vector<16x4xf32>, i32 -> vector<16x4xf32>
    %207 = vector.broadcast %7 : vector<16x1xf32> to vector<16x4xf32>
    %208 = arith.mulf %206, %207 : vector<16x4xf32>
    %209 = arith.truncf %208 : vector<16x4xf32> to vector<16x4xbf16>
    %c21 = arith.constant 21 : index
    %c0_117 = arith.constant 0 : index
    %c0_118 = arith.constant 0 : index
    %210 = vector.load %arg5[%c21, %c0_117, %c0_118] : memref<27x4x128xbf16, #tpu.memory_space<vmem>>, vector<1x4x128xbf16>
    %211 = vector.shape_cast %210 : vector<1x4x128xbf16> to vector<4x128xbf16>
    %cst_119 = arith.constant dense<0.000000e+00> : vector<16x128xf32>
    %212 = tpu.matmul %209, %211, %cst_119 {dimension_numbers = #tpu.dot_dimension_numbers<[1], [0], [0], [1], [0, 0, 1, 1], [], []>} : vector<16x4xbf16>, vector<4x128xbf16>, vector<16x128xf32> -> vector<16x128xf32>
    %213 = arith.addf %205, %212 : vector<16x128xf32>
    %214 = arith.truncf %181 : vector<16x4xf32> to vector<16x4xbf16>
    %c22 = arith.constant 22 : index
    %c0_120 = arith.constant 0 : index
    %c0_121 = arith.constant 0 : index
    %215 = vector.load %arg5[%c22, %c0_120, %c0_121] : memref<27x4x128xbf16, #tpu.memory_space<vmem>>, vector<1x4x128xbf16>
    %216 = vector.shape_cast %215 : vector<1x4x128xbf16> to vector<4x128xbf16>
    %cst_122 = arith.constant dense<0.000000e+00> : vector<16x128xf32>
    %217 = tpu.matmul %214, %216, %cst_122 {dimension_numbers = #tpu.dot_dimension_numbers<[1], [0], [0], [1], [0, 0, 1, 1], [], []>} : vector<16x4xbf16>, vector<4x128xbf16>, vector<16x128xf32> -> vector<16x128xf32>
    %218 = arith.addf %213, %217 : vector<16x128xf32>
    %c15_i32_123 = arith.constant 15 : i32
    %219 = tpu.dynamic_rotate %181 by %c15_i32_123 dim 0 : vector<16x4xf32>, i32 -> vector<16x4xf32>
    %220 = vector.broadcast %9 : vector<16x1xf32> to vector<16x4xf32>
    %221 = arith.mulf %219, %220 : vector<16x4xf32>
    %222 = arith.truncf %221 : vector<16x4xf32> to vector<16x4xbf16>
    %c23 = arith.constant 23 : index
    %c0_124 = arith.constant 0 : index
    %c0_125 = arith.constant 0 : index
    %223 = vector.load %arg5[%c23, %c0_124, %c0_125] : memref<27x4x128xbf16, #tpu.memory_space<vmem>>, vector<1x4x128xbf16>
    %224 = vector.shape_cast %223 : vector<1x4x128xbf16> to vector<4x128xbf16>
    %cst_126 = arith.constant dense<0.000000e+00> : vector<16x128xf32>
    %225 = tpu.matmul %222, %224, %cst_126 {dimension_numbers = #tpu.dot_dimension_numbers<[1], [0], [0], [1], [0, 0, 1, 1], [], []>} : vector<16x4xbf16>, vector<4x128xbf16>, vector<16x128xf32> -> vector<16x128xf32>
    %226 = arith.addf %218, %225 : vector<16x128xf32>
    %c13_i32_127 = arith.constant 13 : i32
    %227 = tpu.dynamic_rotate %181 by %c13_i32_127 dim 0 : vector<16x4xf32>, i32 -> vector<16x4xf32>
    %228 = vector.broadcast %11 : vector<16x1xf32> to vector<16x4xf32>
    %229 = arith.mulf %227, %228 : vector<16x4xf32>
    %230 = arith.truncf %229 : vector<16x4xf32> to vector<16x4xbf16>
    %c24 = arith.constant 24 : index
    %c0_128 = arith.constant 0 : index
    %c0_129 = arith.constant 0 : index
    %231 = vector.load %arg5[%c24, %c0_128, %c0_129] : memref<27x4x128xbf16, #tpu.memory_space<vmem>>, vector<1x4x128xbf16>
    %232 = vector.shape_cast %231 : vector<1x4x128xbf16> to vector<4x128xbf16>
    %cst_130 = arith.constant dense<0.000000e+00> : vector<16x128xf32>
    %233 = tpu.matmul %230, %232, %cst_130 {dimension_numbers = #tpu.dot_dimension_numbers<[1], [0], [0], [1], [0, 0, 1, 1], [], []>} : vector<16x4xbf16>, vector<4x128xbf16>, vector<16x128xf32> -> vector<16x128xf32>
    %234 = arith.addf %226, %233 : vector<16x128xf32>
    %c12_i32_131 = arith.constant 12 : i32
    %235 = tpu.dynamic_rotate %181 by %c12_i32_131 dim 0 : vector<16x4xf32>, i32 -> vector<16x4xf32>
    %236 = vector.broadcast %13 : vector<16x1xf32> to vector<16x4xf32>
    %237 = arith.mulf %235, %236 : vector<16x4xf32>
    %238 = arith.truncf %237 : vector<16x4xf32> to vector<16x4xbf16>
    %c25 = arith.constant 25 : index
    %c0_132 = arith.constant 0 : index
    %c0_133 = arith.constant 0 : index
    %239 = vector.load %arg5[%c25, %c0_132, %c0_133] : memref<27x4x128xbf16, #tpu.memory_space<vmem>>, vector<1x4x128xbf16>
    %240 = vector.shape_cast %239 : vector<1x4x128xbf16> to vector<4x128xbf16>
    %cst_134 = arith.constant dense<0.000000e+00> : vector<16x128xf32>
    %241 = tpu.matmul %238, %240, %cst_134 {dimension_numbers = #tpu.dot_dimension_numbers<[1], [0], [0], [1], [0, 0, 1, 1], [], []>} : vector<16x4xbf16>, vector<4x128xbf16>, vector<16x128xf32> -> vector<16x128xf32>
    %242 = arith.addf %234, %241 : vector<16x128xf32>
    %c11_i32_135 = arith.constant 11 : i32
    %243 = tpu.dynamic_rotate %181 by %c11_i32_135 dim 0 : vector<16x4xf32>, i32 -> vector<16x4xf32>
    %244 = vector.broadcast %15 : vector<16x1xf32> to vector<16x4xf32>
    %245 = arith.mulf %243, %244 : vector<16x4xf32>
    %246 = arith.truncf %245 : vector<16x4xf32> to vector<16x4xbf16>
    %c26 = arith.constant 26 : index
    %c0_136 = arith.constant 0 : index
    %c0_137 = arith.constant 0 : index
    %247 = vector.load %arg5[%c26, %c0_136, %c0_137] : memref<27x4x128xbf16, #tpu.memory_space<vmem>>, vector<1x4x128xbf16>
    %248 = vector.shape_cast %247 : vector<1x4x128xbf16> to vector<4x128xbf16>
    %cst_138 = arith.constant dense<0.000000e+00> : vector<16x128xf32>
    %249 = tpu.matmul %246, %248, %cst_138 {dimension_numbers = #tpu.dot_dimension_numbers<[1], [0], [0], [1], [0, 0, 1, 1], [], []>} : vector<16x4xbf16>, vector<4x128xbf16>, vector<16x128xf32> -> vector<16x128xf32>
    %250 = arith.addf %242, %249 : vector<16x128xf32>
    %c0_139 = arith.constant 0 : index
    %c0_140 = arith.constant 0 : index
    %251 = vector.load %arg6[%c0_139, %c0_140] : memref<1x128xf32, #tpu.memory_space<vmem>>, vector<1x128xf32>
    %252 = vector.broadcast %251 : vector<1x128xf32> to vector<16x128xf32>
    %253 = arith.addf %250, %252 : vector<16x128xf32>
    %c0_141 = arith.constant 0 : index
    %c0_142 = arith.constant 0 : index
    %c0_143 = arith.constant 0 : index
    %c0_144 = arith.constant 0 : index
    %254 = vector.load %arg8[%c0_141, %c0_142, %c0_143, %c0_144] : memref<1x1x16x128xf32, #tpu.memory_space<vmem>>, vector<1x1x16x128xf32>
    %255 = vector.shape_cast %254 : vector<1x1x16x128xf32> to vector<16x128xf32>
    %256 = vector.shape_cast %253 : vector<16x128xf32> to vector<1x1x16x128xf32>
    tpu.vector_store %arg8[%c0_141, %c0_142, %c0_143, %c0_144], %256 {strides = array<i32>} : memref<1x1x16x128xf32, #tpu.memory_space<vmem>>, vector<1x1x16x128xf32>,
    %cst_145 = arith.constant dense<0.000000e+00> : vector<128xf32>
    %257 = vector.multi_reduction <add>, %253, %cst_145 [0] : vector<16x128xf32> to vector<128xf32>
    %258 = vector.shape_cast %257 : vector<128xf32> to vector<1x128xf32>
    %c0_146 = arith.constant 0 : index
    %c0_147 = arith.constant 0 : index
    %c0_148 = arith.constant 0 : index
    %c0_149 = arith.constant 0 : index
    %259 = vector.load %arg9[%c0_146, %c0_147, %c0_148, %c0_149] : memref<1x1x2x128xf32, #tpu.memory_space<vmem>>, vector<1x1x1x128xf32>
    %260 = vector.shape_cast %259 : vector<1x1x1x128xf32> to vector<1x128xf32>
    %261 = vector.shape_cast %258 : vector<1x128xf32> to vector<1x1x1x128xf32>
    tpu.vector_store %arg9[%c0_146, %c0_147, %c0_148, %c0_149], %261 {strides = array<i32>} : memref<1x1x2x128xf32, #tpu.memory_space<vmem>>, vector<1x1x1x128xf32>,
    %262 = arith.mulf %253, %253 : vector<16x128xf32>
    %cst_150 = arith.constant dense<0.000000e+00> : vector<128xf32>
    %263 = vector.multi_reduction <add>, %262, %cst_150 [0] : vector<16x128xf32> to vector<128xf32>
    %264 = vector.shape_cast %263 : vector<128xf32> to vector<1x128xf32>
    %c0_151 = arith.constant 0 : index
    %c0_152 = arith.constant 0 : index
    %c1_153 = arith.constant 1 : index
    %c0_154 = arith.constant 0 : index
    %265 = vector.load %arg9[%c0_151, %c0_152, %c1_153, %c0_154] : memref<1x1x2x128xf32, #tpu.memory_space<vmem>>, vector<1x1x1x128xf32>
    %266 = vector.shape_cast %265 : vector<1x1x1x128xf32> to vector<1x128xf32>
    %267 = vector.shape_cast %264 : vector<1x128xf32> to vector<1x1x1x128xf32>
    tpu.vector_store %arg9[%c0_151, %c0_152, %c1_153, %c0_154], %267 {strides = array<i32>} : memref<1x1x2x128xf32, #tpu.memory_space<vmem>>, vector<1x1x1x128xf32>,
    return
  }
  func.func @transform_0(%arg0: i32, %arg1: i32) -> (i32, i32, i32, i32) {
    %c1_i32 = arith.constant 1 : i32
    %0 = arith.subi %arg1, %c1_i32 : i32
    %c0_i32 = arith.constant 0 : i32
    %1 = arith.addi %0, %c0_i32 : i32
    %c0_i32_0 = arith.constant 0 : i32
    %2 = arith.maxsi %1, %c0_i32_0 : i32
    %c3_i32 = arith.constant 3 : i32
    %3 = arith.minsi %2, %c3_i32 : i32
    %c0_i32_1 = arith.constant 0 : i32
    %c0_i32_2 = arith.constant 0 : i32
    %c0_i32_3 = arith.constant 0 : i32
    return %arg0, %3, %c0_i32_1, %c0_i32_2 : i32, i32, i32, i32
  }
  func.func @transform_1(%arg0: i32, %arg1: i32) -> (i32, i32, i32, i32) {
    %c1_i32 = arith.constant 1 : i32
    %0 = arith.subi %arg1, %c1_i32 : i32
    %c1_i32_0 = arith.constant 1 : i32
    %1 = arith.addi %0, %c1_i32_0 : i32
    %c0_i32 = arith.constant 0 : i32
    %2 = arith.maxsi %1, %c0_i32 : i32
    %c3_i32 = arith.constant 3 : i32
    %3 = arith.minsi %2, %c3_i32 : i32
    %c0_i32_1 = arith.constant 0 : i32
    %c0_i32_2 = arith.constant 0 : i32
    %c0_i32_3 = arith.constant 0 : i32
    return %arg0, %3, %c0_i32_1, %c0_i32_2 : i32, i32, i32, i32
  }
  func.func @transform_2(%arg0: i32, %arg1: i32) -> (i32, i32, i32, i32) {
    %c1_i32 = arith.constant 1 : i32
    %0 = arith.subi %arg1, %c1_i32 : i32
    %c2_i32 = arith.constant 2 : i32
    %1 = arith.addi %0, %c2_i32 : i32
    %c0_i32 = arith.constant 0 : i32
    %2 = arith.maxsi %1, %c0_i32 : i32
    %c3_i32 = arith.constant 3 : i32
    %3 = arith.minsi %2, %c3_i32 : i32
    %c0_i32_0 = arith.constant 0 : i32
    %c0_i32_1 = arith.constant 0 : i32
    %c0_i32_2 = arith.constant 0 : i32
    return %arg0, %3, %c0_i32_0, %c0_i32_1 : i32, i32, i32, i32
  }
  func.func @transform_3(%arg0: i32, %arg1: i32) -> (i32, i32, i32) {
    %c0_i32 = arith.constant 0 : i32
    %c0_i32_0 = arith.constant 0 : i32
    %c0_i32_1 = arith.constant 0 : i32
    %c0_i32_2 = arith.constant 0 : i32
    return %c0_i32, %c0_i32_0, %c0_i32_1 : i32, i32, i32
  }
  func.func @transform_4(%arg0: i32, %arg1: i32) -> (i32, i32) {
    %c0_i32 = arith.constant 0 : i32
    %c0_i32_0 = arith.constant 0 : i32
    %c0_i32_1 = arith.constant 0 : i32
    return %c0_i32, %c0_i32_0 : i32, i32
  }
  func.func @transform_5(%arg0: i32, %arg1: i32) -> (i32, i32, i32) {
    %c0_i32 = arith.constant 0 : i32
    %c0_i32_0 = arith.constant 0 : i32
    %c0_i32_1 = arith.constant 0 : i32
    %c0_i32_2 = arith.constant 0 : i32
    return %c0_i32, %c0_i32_0, %c0_i32_1 : i32, i32, i32
  }
  func.func @transform_6(%arg0: i32, %arg1: i32) -> (i32, i32, i32, i32) {
    %c0_i32 = arith.constant 0 : i32
    %c0_i32_0 = arith.constant 0 : i32
    %c0_i32_1 = arith.constant 0 : i32
    return %arg0, %arg1, %c0_i32, %c0_i32_0 : i32, i32, i32, i32
  }
  func.func @transform_7(%arg0: i32, %arg1: i32) -> (i32, i32, i32, i32) {
    %c0_i32 = arith.constant 0 : i32
    %c0_i32_0 = arith.constant 0 : i32
    %c0_i32_1 = arith.constant 0 : i32
    return %arg0, %arg1, %c0_i32, %c0_i32_0 : i32, i32, i32, i32
  }
}

module attributes {stable_mosaic.version = 11 : i64} {
  func.func @kernel(%arg0: i32, %arg1: i32, %arg2: memref<1x1x16x128xf32, #tpu.memory_space<vmem>>, %arg3: memref<1x1x16x128xf32, #tpu.memory_space<vmem>>, %arg4: memref<1x1x16x128xf32, #tpu.memory_space<vmem>>, %arg5: memref<27x128x128xbf16, #tpu.memory_space<vmem>>, %arg6: memref<1x128xf32, #tpu.memory_space<vmem>>, %arg7: memref<9x16x1xf32, #tpu.memory_space<vmem>>, %arg8: memref<1x128xf32, #tpu.memory_space<vmem>>, %arg9: memref<1x128xf32, #tpu.memory_space<vmem>>, %arg10: memref<1x1x16x128xf32, #tpu.memory_space<vmem>>, %arg11: memref<1x1x2x128xf32, #tpu.memory_space<vmem>>) attributes {dimension_semantics = [#tpu.dimension_semantics<parallel>, #tpu.dimension_semantics<parallel>], iteration_bounds = array<i64: 2, 4>, scalar_prefetch = 0 : i64, scratch_operands = 0 : i64, tpu.core_type = #tpu.core_type<tc>, window_params = [{transform_indices = @transform_0, window_bounds = array<i64: 1, 1, 16, 128>}, {transform_indices = @transform_1, window_bounds = array<i64: 1, 1, 16, 128>}, {transform_indices = @transform_2, window_bounds = array<i64: 1, 1, 16, 128>}, {pipeline_mode = #tpu.pipeline_mode<synchronous>, transform_indices = @transform_3, window_bounds = array<i64: 27, 128, 128>}, {pipeline_mode = #tpu.pipeline_mode<synchronous>, transform_indices = @transform_4, window_bounds = array<i64: 1, 128>}, {pipeline_mode = #tpu.pipeline_mode<synchronous>, transform_indices = @transform_5, window_bounds = array<i64: 9, 16, 1>}, {pipeline_mode = #tpu.pipeline_mode<synchronous>, transform_indices = @transform_6, window_bounds = array<i64: 1, 128>}, {pipeline_mode = #tpu.pipeline_mode<synchronous>, transform_indices = @transform_7, window_bounds = array<i64: 1, 128>}, {transform_indices = @transform_8, window_bounds = array<i64: 1, 1, 16, 128>}, {transform_indices = @transform_9, window_bounds = array<i64: 1, 1, 2, 128>}]} {
    %c0 = arith.constant 0 : index
    %c0_0 = arith.constant 0 : index
    %c0_1 = arith.constant 0 : index
    %0 = vector.load %arg7[%c0, %c0_0, %c0_1] : memref<9x16x1xf32, #tpu.memory_space<vmem>>, vector<1x16x1xf32>
    %1 = vector.shape_cast %0 : vector<1x16x1xf32> to vector<16x1xf32>
    %c1 = arith.constant 1 : index
    %c0_2 = arith.constant 0 : index
    %c0_3 = arith.constant 0 : index
    %2 = vector.load %arg7[%c1, %c0_2, %c0_3] : memref<9x16x1xf32, #tpu.memory_space<vmem>>, vector<1x16x1xf32>
    %3 = vector.shape_cast %2 : vector<1x16x1xf32> to vector<16x1xf32>
    %c2 = arith.constant 2 : index
    %c0_4 = arith.constant 0 : index
    %c0_5 = arith.constant 0 : index
    %4 = vector.load %arg7[%c2, %c0_4, %c0_5] : memref<9x16x1xf32, #tpu.memory_space<vmem>>, vector<1x16x1xf32>
    %5 = vector.shape_cast %4 : vector<1x16x1xf32> to vector<16x1xf32>
    %c3 = arith.constant 3 : index
    %c0_6 = arith.constant 0 : index
    %c0_7 = arith.constant 0 : index
    %6 = vector.load %arg7[%c3, %c0_6, %c0_7] : memref<9x16x1xf32, #tpu.memory_space<vmem>>, vector<1x16x1xf32>
    %7 = vector.shape_cast %6 : vector<1x16x1xf32> to vector<16x1xf32>
    %c5 = arith.constant 5 : index
    %c0_8 = arith.constant 0 : index
    %c0_9 = arith.constant 0 : index
    %8 = vector.load %arg7[%c5, %c0_8, %c0_9] : memref<9x16x1xf32, #tpu.memory_space<vmem>>, vector<1x16x1xf32>
    %9 = vector.shape_cast %8 : vector<1x16x1xf32> to vector<16x1xf32>
    %c6 = arith.constant 6 : index
    %c0_10 = arith.constant 0 : index
    %c0_11 = arith.constant 0 : index
    %10 = vector.load %arg7[%c6, %c0_10, %c0_11] : memref<9x16x1xf32, #tpu.memory_space<vmem>>, vector<1x16x1xf32>
    %11 = vector.shape_cast %10 : vector<1x16x1xf32> to vector<16x1xf32>
    %c7 = arith.constant 7 : index
    %c0_12 = arith.constant 0 : index
    %c0_13 = arith.constant 0 : index
    %12 = vector.load %arg7[%c7, %c0_12, %c0_13] : memref<9x16x1xf32, #tpu.memory_space<vmem>>, vector<1x16x1xf32>
    %13 = vector.shape_cast %12 : vector<1x16x1xf32> to vector<16x1xf32>
    %c8 = arith.constant 8 : index
    %c0_14 = arith.constant 0 : index
    %c0_15 = arith.constant 0 : index
    %14 = vector.load %arg7[%c8, %c0_14, %c0_15] : memref<9x16x1xf32, #tpu.memory_space<vmem>>, vector<1x16x1xf32>
    %15 = vector.shape_cast %14 : vector<1x16x1xf32> to vector<16x1xf32>
    %c0_16 = arith.constant 0 : index
    %c0_17 = arith.constant 0 : index
    %16 = vector.load %arg8[%c0_16, %c0_17] : memref<1x128xf32, #tpu.memory_space<vmem>>, vector<1x128xf32>
    %c0_18 = arith.constant 0 : index
    %c0_19 = arith.constant 0 : index
    %17 = vector.load %arg9[%c0_18, %c0_19] : memref<1x128xf32, #tpu.memory_space<vmem>>, vector<1x128xf32>
    %cst = arith.constant 0.000000e+00 : f32
    %18 = vector.broadcast %cst : f32 to vector<16x128xf32>
    %c0_20 = arith.constant 0 : index
    %c0_21 = arith.constant 0 : index
    %c0_22 = arith.constant 0 : index
    %c0_23 = arith.constant 0 : index
    %19 = vector.load %arg2[%c0_20, %c0_21, %c0_22, %c0_23] : memref<1x1x16x128xf32, #tpu.memory_space<vmem>>, vector<1x1x16x128xf32>
    %20 = vector.shape_cast %19 : vector<1x1x16x128xf32> to vector<16x128xf32>
    %21 = vector.broadcast %16 : vector<1x128xf32> to vector<16x128xf32>
    %22 = arith.mulf %20, %21 : vector<16x128xf32>
    %23 = vector.broadcast %17 : vector<1x128xf32> to vector<16x128xf32>
    %24 = arith.addf %22, %23 : vector<16x128xf32>
    %cst_24 = arith.constant 0.000000e+00 : f32
    %25 = vector.broadcast %cst_24 : f32 to vector<16x128xf32>
    %26 = arith.maximumf %24, %25 : vector<16x128xf32>
    %c1_i32 = arith.constant 1 : i32
    %27 = arith.subi %arg1, %c1_i32 : i32
    %c0_i32 = arith.constant 0 : i32
    %28 = arith.addi %27, %c0_i32 : i32
    %c0_i32_25 = arith.constant 0 : i32
    %29 = arith.cmpi sge, %28, %c0_i32_25 : i32
    %c3_i32 = arith.constant 3 : i32
    %30 = arith.cmpi sle, %28, %c3_i32 : i32
    %31 = arith.andi %29, %30 : i1
    %32 = arith.extui %31 : i1 to i32
    %33 = arith.sitofp %32 : i32 to f32
    %34 = vector.broadcast %33 : f32 to vector<16x128xf32>
    %35 = arith.mulf %26, %34 : vector<16x128xf32>
    %c5_i32 = arith.constant 5 : i32
    %36 = tpu.dynamic_rotate %35 by %c5_i32 dim 0 : vector<16x128xf32>, i32 -> vector<16x128xf32>
    %37 = vector.broadcast %1 : vector<16x1xf32> to vector<16x128xf32>
    %38 = arith.mulf %36, %37 : vector<16x128xf32>
    %39 = arith.truncf %38 : vector<16x128xf32> to vector<16x128xbf16>
    %c0_26 = arith.constant 0 : index
    %c0_27 = arith.constant 0 : index
    %c0_28 = arith.constant 0 : index
    %40 = vector.load %arg5[%c0_26, %c0_27, %c0_28] : memref<27x128x128xbf16, #tpu.memory_space<vmem>>, vector<1x128x128xbf16>
    %41 = vector.shape_cast %40 : vector<1x128x128xbf16> to vector<128x128xbf16>
    %cst_29 = arith.constant dense<0.000000e+00> : vector<16x128xf32>
    %42 = tpu.matmul %39, %41, %cst_29 {dimension_numbers = #tpu.dot_dimension_numbers<[1], [0], [0], [1], [0, 0, 1, 1], [], []>} : vector<16x128xbf16>, vector<128x128xbf16>, vector<16x128xf32> -> vector<16x128xf32>
    %43 = arith.addf %18, %42 : vector<16x128xf32>
    %c4_i32 = arith.constant 4 : i32
    %44 = tpu.dynamic_rotate %35 by %c4_i32 dim 0 : vector<16x128xf32>, i32 -> vector<16x128xf32>
    %45 = vector.broadcast %3 : vector<16x1xf32> to vector<16x128xf32>
    %46 = arith.mulf %44, %45 : vector<16x128xf32>
    %47 = arith.truncf %46 : vector<16x128xf32> to vector<16x128xbf16>
    %c1_30 = arith.constant 1 : index
    %c0_31 = arith.constant 0 : index
    %c0_32 = arith.constant 0 : index
    %48 = vector.load %arg5[%c1_30, %c0_31, %c0_32] : memref<27x128x128xbf16, #tpu.memory_space<vmem>>, vector<1x128x128xbf16>
    %49 = vector.shape_cast %48 : vector<1x128x128xbf16> to vector<128x128xbf16>
    %cst_33 = arith.constant dense<0.000000e+00> : vector<16x128xf32>
    %50 = tpu.matmul %47, %49, %cst_33 {dimension_numbers = #tpu.dot_dimension_numbers<[1], [0], [0], [1], [0, 0, 1, 1], [], []>} : vector<16x128xbf16>, vector<128x128xbf16>, vector<16x128xf32> -> vector<16x128xf32>
    %51 = arith.addf %43, %50 : vector<16x128xf32>
    %c3_i32_34 = arith.constant 3 : i32
    %52 = tpu.dynamic_rotate %35 by %c3_i32_34 dim 0 : vector<16x128xf32>, i32 -> vector<16x128xf32>
    %53 = vector.broadcast %5 : vector<16x1xf32> to vector<16x128xf32>
    %54 = arith.mulf %52, %53 : vector<16x128xf32>
    %55 = arith.truncf %54 : vector<16x128xf32> to vector<16x128xbf16>
    %c2_35 = arith.constant 2 : index
    %c0_36 = arith.constant 0 : index
    %c0_37 = arith.constant 0 : index
    %56 = vector.load %arg5[%c2_35, %c0_36, %c0_37] : memref<27x128x128xbf16, #tpu.memory_space<vmem>>, vector<1x128x128xbf16>
    %57 = vector.shape_cast %56 : vector<1x128x128xbf16> to vector<128x128xbf16>
    %cst_38 = arith.constant dense<0.000000e+00> : vector<16x128xf32>
    %58 = tpu.matmul %55, %57, %cst_38 {dimension_numbers = #tpu.dot_dimension_numbers<[1], [0], [0], [1], [0, 0, 1, 1], [], []>} : vector<16x128xbf16>, vector<128x128xbf16>, vector<16x128xf32> -> vector<16x128xf32>
    %59 = arith.addf %51, %58 : vector<16x128xf32>
    %c1_i32_39 = arith.constant 1 : i32
    %60 = tpu.dynamic_rotate %35 by %c1_i32_39 dim 0 : vector<16x128xf32>, i32 -> vector<16x128xf32>
    %61 = vector.broadcast %7 : vector<16x1xf32> to vector<16x128xf32>
    %62 = arith.mulf %60, %61 : vector<16x128xf32>
    %63 = arith.truncf %62 : vector<16x128xf32> to vector<16x128xbf16>
    %c3_40 = arith.constant 3 : index
    %c0_41 = arith.constant 0 : index
    %c0_42 = arith.constant 0 : index
    %64 = vector.load %arg5[%c3_40, %c0_41, %c0_42] : memref<27x128x128xbf16, #tpu.memory_space<vmem>>, vector<1x128x128xbf16>
    %65 = vector.shape_cast %64 : vector<1x128x128xbf16> to vector<128x128xbf16>
    %cst_43 = arith.constant dense<0.000000e+00> : vector<16x128xf32>
    %66 = tpu.matmul %63, %65, %cst_43 {dimension_numbers = #tpu.dot_dimension_numbers<[1], [0], [0], [1], [0, 0, 1, 1], [], []>} : vector<16x128xbf16>, vector<128x128xbf16>, vector<16x128xf32> -> vector<16x128xf32>
    %67 = arith.addf %59, %66 : vector<16x128xf32>
    %68 = arith.truncf %35 : vector<16x128xf32> to vector<16x128xbf16>
    %c4 = arith.constant 4 : index
    %c0_44 = arith.constant 0 : index
    %c0_45 = arith.constant 0 : index
    %69 = vector.load %arg5[%c4, %c0_44, %c0_45] : memref<27x128x128xbf16, #tpu.memory_space<vmem>>, vector<1x128x128xbf16>
    %70 = vector.shape_cast %69 : vector<1x128x128xbf16> to vector<128x128xbf16>
    %cst_46 = arith.constant dense<0.000000e+00> : vector<16x128xf32>
    %71 = tpu.matmul %68, %70, %cst_46 {dimension_numbers = #tpu.dot_dimension_numbers<[1], [0], [0], [1], [0, 0, 1, 1], [], []>} : vector<16x128xbf16>, vector<128x128xbf16>, vector<16x128xf32> -> vector<16x128xf32>
    %72 = arith.addf %67, %71 : vector<16x128xf32>
    %c15_i32 = arith.constant 15 : i32
    %73 = tpu.dynamic_rotate %35 by %c15_i32 dim 0 : vector<16x128xf32>, i32 -> vector<16x128xf32>
    %74 = vector.broadcast %9 : vector<16x1xf32> to vector<16x128xf32>
    %75 = arith.mulf %73, %74 : vector<16x128xf32>
    %76 = arith.truncf %75 : vector<16x128xf32> to vector<16x128xbf16>
    %c5_47 = arith.constant 5 : index
    %c0_48 = arith.constant 0 : index
    %c0_49 = arith.constant 0 : index
    %77 = vector.load %arg5[%c5_47, %c0_48, %c0_49] : memref<27x128x128xbf16, #tpu.memory_space<vmem>>, vector<1x128x128xbf16>
    %78 = vector.shape_cast %77 : vector<1x128x128xbf16> to vector<128x128xbf16>
    %cst_50 = arith.constant dense<0.000000e+00> : vector<16x128xf32>
    %79 = tpu.matmul %76, %78, %cst_50 {dimension_numbers = #tpu.dot_dimension_numbers<[1], [0], [0], [1], [0, 0, 1, 1], [], []>} : vector<16x128xbf16>, vector<128x128xbf16>, vector<16x128xf32> -> vector<16x128xf32>
    %80 = arith.addf %72, %79 : vector<16x128xf32>
    %c13_i32 = arith.constant 13 : i32
    %81 = tpu.dynamic_rotate %35 by %c13_i32 dim 0 : vector<16x128xf32>, i32 -> vector<16x128xf32>
    %82 = vector.broadcast %11 : vector<16x1xf32> to vector<16x128xf32>
    %83 = arith.mulf %81, %82 : vector<16x128xf32>
    %84 = arith.truncf %83 : vector<16x128xf32> to vector<16x128xbf16>
    %c6_51 = arith.constant 6 : index
    %c0_52 = arith.constant 0 : index
    %c0_53 = arith.constant 0 : index
    %85 = vector.load %arg5[%c6_51, %c0_52, %c0_53] : memref<27x128x128xbf16, #tpu.memory_space<vmem>>, vector<1x128x128xbf16>
    %86 = vector.shape_cast %85 : vector<1x128x128xbf16> to vector<128x128xbf16>
    %cst_54 = arith.constant dense<0.000000e+00> : vector<16x128xf32>
    %87 = tpu.matmul %84, %86, %cst_54 {dimension_numbers = #tpu.dot_dimension_numbers<[1], [0], [0], [1], [0, 0, 1, 1], [], []>} : vector<16x128xbf16>, vector<128x128xbf16>, vector<16x128xf32> -> vector<16x128xf32>
    %88 = arith.addf %80, %87 : vector<16x128xf32>
    %c12_i32 = arith.constant 12 : i32
    %89 = tpu.dynamic_rotate %35 by %c12_i32 dim 0 : vector<16x128xf32>, i32 -> vector<16x128xf32>
    %90 = vector.broadcast %13 : vector<16x1xf32> to vector<16x128xf32>
    %91 = arith.mulf %89, %90 : vector<16x128xf32>
    %92 = arith.truncf %91 : vector<16x128xf32> to vector<16x128xbf16>
    %c7_55 = arith.constant 7 : index
    %c0_56 = arith.constant 0 : index
    %c0_57 = arith.constant 0 : index
    %93 = vector.load %arg5[%c7_55, %c0_56, %c0_57] : memref<27x128x128xbf16, #tpu.memory_space<vmem>>, vector<1x128x128xbf16>
    %94 = vector.shape_cast %93 : vector<1x128x128xbf16> to vector<128x128xbf16>
    %cst_58 = arith.constant dense<0.000000e+00> : vector<16x128xf32>
    %95 = tpu.matmul %92, %94, %cst_58 {dimension_numbers = #tpu.dot_dimension_numbers<[1], [0], [0], [1], [0, 0, 1, 1], [], []>} : vector<16x128xbf16>, vector<128x128xbf16>, vector<16x128xf32> -> vector<16x128xf32>
    %96 = arith.addf %88, %95 : vector<16x128xf32>
    %c11_i32 = arith.constant 11 : i32
    %97 = tpu.dynamic_rotate %35 by %c11_i32 dim 0 : vector<16x128xf32>, i32 -> vector<16x128xf32>
    %98 = vector.broadcast %15 : vector<16x1xf32> to vector<16x128xf32>
    %99 = arith.mulf %97, %98 : vector<16x128xf32>
    %100 = arith.truncf %99 : vector<16x128xf32> to vector<16x128xbf16>
    %c8_59 = arith.constant 8 : index
    %c0_60 = arith.constant 0 : index
    %c0_61 = arith.constant 0 : index
    %101 = vector.load %arg5[%c8_59, %c0_60, %c0_61] : memref<27x128x128xbf16, #tpu.memory_space<vmem>>, vector<1x128x128xbf16>
    %102 = vector.shape_cast %101 : vector<1x128x128xbf16> to vector<128x128xbf16>
    %cst_62 = arith.constant dense<0.000000e+00> : vector<16x128xf32>
    %103 = tpu.matmul %100, %102, %cst_62 {dimension_numbers = #tpu.dot_dimension_numbers<[1], [0], [0], [1], [0, 0, 1, 1], [], []>} : vector<16x128xbf16>, vector<128x128xbf16>, vector<16x128xf32> -> vector<16x128xf32>
    %104 = arith.addf %96, %103 : vector<16x128xf32>
    %c0_63 = arith.constant 0 : index
    %c0_64 = arith.constant 0 : index
    %c0_65 = arith.constant 0 : index
    %c0_66 = arith.constant 0 : index
    %105 = vector.load %arg3[%c0_63, %c0_64, %c0_65, %c0_66] : memref<1x1x16x128xf32, #tpu.memory_space<vmem>>, vector<1x1x16x128xf32>
    %106 = vector.shape_cast %105 : vector<1x1x16x128xf32> to vector<16x128xf32>
    %107 = vector.broadcast %16 : vector<1x128xf32> to vector<16x128xf32>
    %108 = arith.mulf %106, %107 : vector<16x128xf32>
    %109 = vector.broadcast %17 : vector<1x128xf32> to vector<16x128xf32>
    %110 = arith.addf %108, %109 : vector<16x128xf32>
    %cst_67 = arith.constant 0.000000e+00 : f32
    %111 = vector.broadcast %cst_67 : f32 to vector<16x128xf32>
    %112 = arith.maximumf %110, %111 : vector<16x128xf32>
    %c5_i32_68 = arith.constant 5 : i32
    %113 = tpu.dynamic_rotate %112 by %c5_i32_68 dim 0 : vector<16x128xf32>, i32 -> vector<16x128xf32>
    %114 = vector.broadcast %1 : vector<16x1xf32> to vector<16x128xf32>
    %115 = arith.mulf %113, %114 : vector<16x128xf32>
    %116 = arith.truncf %115 : vector<16x128xf32> to vector<16x128xbf16>
    %c9 = arith.constant 9 : index
    %c0_69 = arith.constant 0 : index
    %c0_70 = arith.constant 0 : index
    %117 = vector.load %arg5[%c9, %c0_69, %c0_70] : memref<27x128x128xbf16, #tpu.memory_space<vmem>>, vector<1x128x128xbf16>
    %118 = vector.shape_cast %117 : vector<1x128x128xbf16> to vector<128x128xbf16>
    %cst_71 = arith.constant dense<0.000000e+00> : vector<16x128xf32>
    %119 = tpu.matmul %116, %118, %cst_71 {dimension_numbers = #tpu.dot_dimension_numbers<[1], [0], [0], [1], [0, 0, 1, 1], [], []>} : vector<16x128xbf16>, vector<128x128xbf16>, vector<16x128xf32> -> vector<16x128xf32>
    %120 = arith.addf %104, %119 : vector<16x128xf32>
    %c4_i32_72 = arith.constant 4 : i32
    %121 = tpu.dynamic_rotate %112 by %c4_i32_72 dim 0 : vector<16x128xf32>, i32 -> vector<16x128xf32>
    %122 = vector.broadcast %3 : vector<16x1xf32> to vector<16x128xf32>
    %123 = arith.mulf %121, %122 : vector<16x128xf32>
    %124 = arith.truncf %123 : vector<16x128xf32> to vector<16x128xbf16>
    %c10 = arith.constant 10 : index
    %c0_73 = arith.constant 0 : index
    %c0_74 = arith.constant 0 : index
    %125 = vector.load %arg5[%c10, %c0_73, %c0_74] : memref<27x128x128xbf16, #tpu.memory_space<vmem>>, vector<1x128x128xbf16>
    %126 = vector.shape_cast %125 : vector<1x128x128xbf16> to vector<128x128xbf16>
    %cst_75 = arith.constant dense<0.000000e+00> : vector<16x128xf32>
    %127 = tpu.matmul %124, %126, %cst_75 {dimension_numbers = #tpu.dot_dimension_numbers<[1], [0], [0], [1], [0, 0, 1, 1], [], []>} : vector<16x128xbf16>, vector<128x128xbf16>, vector<16x128xf32> -> vector<16x128xf32>
    %128 = arith.addf %120, %127 : vector<16x128xf32>
    %c3_i32_76 = arith.constant 3 : i32
    %129 = tpu.dynamic_rotate %112 by %c3_i32_76 dim 0 : vector<16x128xf32>, i32 -> vector<16x128xf32>
    %130 = vector.broadcast %5 : vector<16x1xf32> to vector<16x128xf32>
    %131 = arith.mulf %129, %130 : vector<16x128xf32>
    %132 = arith.truncf %131 : vector<16x128xf32> to vector<16x128xbf16>
    %c11 = arith.constant 11 : index
    %c0_77 = arith.constant 0 : index
    %c0_78 = arith.constant 0 : index
    %133 = vector.load %arg5[%c11, %c0_77, %c0_78] : memref<27x128x128xbf16, #tpu.memory_space<vmem>>, vector<1x128x128xbf16>
    %134 = vector.shape_cast %133 : vector<1x128x128xbf16> to vector<128x128xbf16>
    %cst_79 = arith.constant dense<0.000000e+00> : vector<16x128xf32>
    %135 = tpu.matmul %132, %134, %cst_79 {dimension_numbers = #tpu.dot_dimension_numbers<[1], [0], [0], [1], [0, 0, 1, 1], [], []>} : vector<16x128xbf16>, vector<128x128xbf16>, vector<16x128xf32> -> vector<16x128xf32>
    %136 = arith.addf %128, %135 : vector<16x128xf32>
    %c1_i32_80 = arith.constant 1 : i32
    %137 = tpu.dynamic_rotate %112 by %c1_i32_80 dim 0 : vector<16x128xf32>, i32 -> vector<16x128xf32>
    %138 = vector.broadcast %7 : vector<16x1xf32> to vector<16x128xf32>
    %139 = arith.mulf %137, %138 : vector<16x128xf32>
    %140 = arith.truncf %139 : vector<16x128xf32> to vector<16x128xbf16>
    %c12 = arith.constant 12 : index
    %c0_81 = arith.constant 0 : index
    %c0_82 = arith.constant 0 : index
    %141 = vector.load %arg5[%c12, %c0_81, %c0_82] : memref<27x128x128xbf16, #tpu.memory_space<vmem>>, vector<1x128x128xbf16>
    %142 = vector.shape_cast %141 : vector<1x128x128xbf16> to vector<128x128xbf16>
    %cst_83 = arith.constant dense<0.000000e+00> : vector<16x128xf32>
    %143 = tpu.matmul %140, %142, %cst_83 {dimension_numbers = #tpu.dot_dimension_numbers<[1], [0], [0], [1], [0, 0, 1, 1], [], []>} : vector<16x128xbf16>, vector<128x128xbf16>, vector<16x128xf32> -> vector<16x128xf32>
    %144 = arith.addf %136, %143 : vector<16x128xf32>
    %145 = arith.truncf %112 : vector<16x128xf32> to vector<16x128xbf16>
    %c13 = arith.constant 13 : index
    %c0_84 = arith.constant 0 : index
    %c0_85 = arith.constant 0 : index
    %146 = vector.load %arg5[%c13, %c0_84, %c0_85] : memref<27x128x128xbf16, #tpu.memory_space<vmem>>, vector<1x128x128xbf16>
    %147 = vector.shape_cast %146 : vector<1x128x128xbf16> to vector<128x128xbf16>
    %cst_86 = arith.constant dense<0.000000e+00> : vector<16x128xf32>
    %148 = tpu.matmul %145, %147, %cst_86 {dimension_numbers = #tpu.dot_dimension_numbers<[1], [0], [0], [1], [0, 0, 1, 1], [], []>} : vector<16x128xbf16>, vector<128x128xbf16>, vector<16x128xf32> -> vector<16x128xf32>
    %149 = arith.addf %144, %148 : vector<16x128xf32>
    %c15_i32_87 = arith.constant 15 : i32
    %150 = tpu.dynamic_rotate %112 by %c15_i32_87 dim 0 : vector<16x128xf32>, i32 -> vector<16x128xf32>
    %151 = vector.broadcast %9 : vector<16x1xf32> to vector<16x128xf32>
    %152 = arith.mulf %150, %151 : vector<16x128xf32>
    %153 = arith.truncf %152 : vector<16x128xf32> to vector<16x128xbf16>
    %c14 = arith.constant 14 : index
    %c0_88 = arith.constant 0 : index
    %c0_89 = arith.constant 0 : index
    %154 = vector.load %arg5[%c14, %c0_88, %c0_89] : memref<27x128x128xbf16, #tpu.memory_space<vmem>>, vector<1x128x128xbf16>
    %155 = vector.shape_cast %154 : vector<1x128x128xbf16> to vector<128x128xbf16>
    %cst_90 = arith.constant dense<0.000000e+00> : vector<16x128xf32>
    %156 = tpu.matmul %153, %155, %cst_90 {dimension_numbers = #tpu.dot_dimension_numbers<[1], [0], [0], [1], [0, 0, 1, 1], [], []>} : vector<16x128xbf16>, vector<128x128xbf16>, vector<16x128xf32> -> vector<16x128xf32>
    %157 = arith.addf %149, %156 : vector<16x128xf32>
    %c13_i32_91 = arith.constant 13 : i32
    %158 = tpu.dynamic_rotate %112 by %c13_i32_91 dim 0 : vector<16x128xf32>, i32 -> vector<16x128xf32>
    %159 = vector.broadcast %11 : vector<16x1xf32> to vector<16x128xf32>
    %160 = arith.mulf %158, %159 : vector<16x128xf32>
    %161 = arith.truncf %160 : vector<16x128xf32> to vector<16x128xbf16>
    %c15 = arith.constant 15 : index
    %c0_92 = arith.constant 0 : index
    %c0_93 = arith.constant 0 : index
    %162 = vector.load %arg5[%c15, %c0_92, %c0_93] : memref<27x128x128xbf16, #tpu.memory_space<vmem>>, vector<1x128x128xbf16>
    %163 = vector.shape_cast %162 : vector<1x128x128xbf16> to vector<128x128xbf16>
    %cst_94 = arith.constant dense<0.000000e+00> : vector<16x128xf32>
    %164 = tpu.matmul %161, %163, %cst_94 {dimension_numbers = #tpu.dot_dimension_numbers<[1], [0], [0], [1], [0, 0, 1, 1], [], []>} : vector<16x128xbf16>, vector<128x128xbf16>, vector<16x128xf32> -> vector<16x128xf32>
    %165 = arith.addf %157, %164 : vector<16x128xf32>
    %c12_i32_95 = arith.constant 12 : i32
    %166 = tpu.dynamic_rotate %112 by %c12_i32_95 dim 0 : vector<16x128xf32>, i32 -> vector<16x128xf32>
    %167 = vector.broadcast %13 : vector<16x1xf32> to vector<16x128xf32>
    %168 = arith.mulf %166, %167 : vector<16x128xf32>
    %169 = arith.truncf %168 : vector<16x128xf32> to vector<16x128xbf16>
    %c16 = arith.constant 16 : index
    %c0_96 = arith.constant 0 : index
    %c0_97 = arith.constant 0 : index
    %170 = vector.load %arg5[%c16, %c0_96, %c0_97] : memref<27x128x128xbf16, #tpu.memory_space<vmem>>, vector<1x128x128xbf16>
    %171 = vector.shape_cast %170 : vector<1x128x128xbf16> to vector<128x128xbf16>
    %cst_98 = arith.constant dense<0.000000e+00> : vector<16x128xf32>
    %172 = tpu.matmul %169, %171, %cst_98 {dimension_numbers = #tpu.dot_dimension_numbers<[1], [0], [0], [1], [0, 0, 1, 1], [], []>} : vector<16x128xbf16>, vector<128x128xbf16>, vector<16x128xf32> -> vector<16x128xf32>
    %173 = arith.addf %165, %172 : vector<16x128xf32>
    %c11_i32_99 = arith.constant 11 : i32
    %174 = tpu.dynamic_rotate %112 by %c11_i32_99 dim 0 : vector<16x128xf32>, i32 -> vector<16x128xf32>
    %175 = vector.broadcast %15 : vector<16x1xf32> to vector<16x128xf32>
    %176 = arith.mulf %174, %175 : vector<16x128xf32>
    %177 = arith.truncf %176 : vector<16x128xf32> to vector<16x128xbf16>
    %c17 = arith.constant 17 : index
    %c0_100 = arith.constant 0 : index
    %c0_101 = arith.constant 0 : index
    %178 = vector.load %arg5[%c17, %c0_100, %c0_101] : memref<27x128x128xbf16, #tpu.memory_space<vmem>>, vector<1x128x128xbf16>
    %179 = vector.shape_cast %178 : vector<1x128x128xbf16> to vector<128x128xbf16>
    %cst_102 = arith.constant dense<0.000000e+00> : vector<16x128xf32>
    %180 = tpu.matmul %177, %179, %cst_102 {dimension_numbers = #tpu.dot_dimension_numbers<[1], [0], [0], [1], [0, 0, 1, 1], [], []>} : vector<16x128xbf16>, vector<128x128xbf16>, vector<16x128xf32> -> vector<16x128xf32>
    %181 = arith.addf %173, %180 : vector<16x128xf32>
    %c0_103 = arith.constant 0 : index
    %c0_104 = arith.constant 0 : index
    %c0_105 = arith.constant 0 : index
    %c0_106 = arith.constant 0 : index
    %182 = vector.load %arg4[%c0_103, %c0_104, %c0_105, %c0_106] : memref<1x1x16x128xf32, #tpu.memory_space<vmem>>, vector<1x1x16x128xf32>
    %183 = vector.shape_cast %182 : vector<1x1x16x128xf32> to vector<16x128xf32>
    %184 = vector.broadcast %16 : vector<1x128xf32> to vector<16x128xf32>
    %185 = arith.mulf %183, %184 : vector<16x128xf32>
    %186 = vector.broadcast %17 : vector<1x128xf32> to vector<16x128xf32>
    %187 = arith.addf %185, %186 : vector<16x128xf32>
    %cst_107 = arith.constant 0.000000e+00 : f32
    %188 = vector.broadcast %cst_107 : f32 to vector<16x128xf32>
    %189 = arith.maximumf %187, %188 : vector<16x128xf32>
    %c1_i32_108 = arith.constant 1 : i32
    %190 = arith.subi %arg1, %c1_i32_108 : i32
    %c2_i32 = arith.constant 2 : i32
    %191 = arith.addi %190, %c2_i32 : i32
    %c0_i32_109 = arith.constant 0 : i32
    %192 = arith.cmpi sge, %191, %c0_i32_109 : i32
    %c3_i32_110 = arith.constant 3 : i32
    %193 = arith.cmpi sle, %191, %c3_i32_110 : i32
    %194 = arith.andi %192, %193 : i1
    %195 = arith.extui %194 : i1 to i32
    %196 = arith.sitofp %195 : i32 to f32
    %197 = vector.broadcast %196 : f32 to vector<16x128xf32>
    %198 = arith.mulf %189, %197 : vector<16x128xf32>
    %c5_i32_111 = arith.constant 5 : i32
    %199 = tpu.dynamic_rotate %198 by %c5_i32_111 dim 0 : vector<16x128xf32>, i32 -> vector<16x128xf32>
    %200 = vector.broadcast %1 : vector<16x1xf32> to vector<16x128xf32>
    %201 = arith.mulf %199, %200 : vector<16x128xf32>
    %202 = arith.truncf %201 : vector<16x128xf32> to vector<16x128xbf16>
    %c18 = arith.constant 18 : index
    %c0_112 = arith.constant 0 : index
    %c0_113 = arith.constant 0 : index
    %203 = vector.load %arg5[%c18, %c0_112, %c0_113] : memref<27x128x128xbf16, #tpu.memory_space<vmem>>, vector<1x128x128xbf16>
    %204 = vector.shape_cast %203 : vector<1x128x128xbf16> to vector<128x128xbf16>
    %cst_114 = arith.constant dense<0.000000e+00> : vector<16x128xf32>
    %205 = tpu.matmul %202, %204, %cst_114 {dimension_numbers = #tpu.dot_dimension_numbers<[1], [0], [0], [1], [0, 0, 1, 1], [], []>} : vector<16x128xbf16>, vector<128x128xbf16>, vector<16x128xf32> -> vector<16x128xf32>
    %206 = arith.addf %181, %205 : vector<16x128xf32>
    %c4_i32_115 = arith.constant 4 : i32
    %207 = tpu.dynamic_rotate %198 by %c4_i32_115 dim 0 : vector<16x128xf32>, i32 -> vector<16x128xf32>
    %208 = vector.broadcast %3 : vector<16x1xf32> to vector<16x128xf32>
    %209 = arith.mulf %207, %208 : vector<16x128xf32>
    %210 = arith.truncf %209 : vector<16x128xf32> to vector<16x128xbf16>
    %c19 = arith.constant 19 : index
    %c0_116 = arith.constant 0 : index
    %c0_117 = arith.constant 0 : index
    %211 = vector.load %arg5[%c19, %c0_116, %c0_117] : memref<27x128x128xbf16, #tpu.memory_space<vmem>>, vector<1x128x128xbf16>
    %212 = vector.shape_cast %211 : vector<1x128x128xbf16> to vector<128x128xbf16>
    %cst_118 = arith.constant dense<0.000000e+00> : vector<16x128xf32>
    %213 = tpu.matmul %210, %212, %cst_118 {dimension_numbers = #tpu.dot_dimension_numbers<[1], [0], [0], [1], [0, 0, 1, 1], [], []>} : vector<16x128xbf16>, vector<128x128xbf16>, vector<16x128xf32> -> vector<16x128xf32>
    %214 = arith.addf %206, %213 : vector<16x128xf32>
    %c3_i32_119 = arith.constant 3 : i32
    %215 = tpu.dynamic_rotate %198 by %c3_i32_119 dim 0 : vector<16x128xf32>, i32 -> vector<16x128xf32>
    %216 = vector.broadcast %5 : vector<16x1xf32> to vector<16x128xf32>
    %217 = arith.mulf %215, %216 : vector<16x128xf32>
    %218 = arith.truncf %217 : vector<16x128xf32> to vector<16x128xbf16>
    %c20 = arith.constant 20 : index
    %c0_120 = arith.constant 0 : index
    %c0_121 = arith.constant 0 : index
    %219 = vector.load %arg5[%c20, %c0_120, %c0_121] : memref<27x128x128xbf16, #tpu.memory_space<vmem>>, vector<1x128x128xbf16>
    %220 = vector.shape_cast %219 : vector<1x128x128xbf16> to vector<128x128xbf16>
    %cst_122 = arith.constant dense<0.000000e+00> : vector<16x128xf32>
    %221 = tpu.matmul %218, %220, %cst_122 {dimension_numbers = #tpu.dot_dimension_numbers<[1], [0], [0], [1], [0, 0, 1, 1], [], []>} : vector<16x128xbf16>, vector<128x128xbf16>, vector<16x128xf32> -> vector<16x128xf32>
    %222 = arith.addf %214, %221 : vector<16x128xf32>
    %c1_i32_123 = arith.constant 1 : i32
    %223 = tpu.dynamic_rotate %198 by %c1_i32_123 dim 0 : vector<16x128xf32>, i32 -> vector<16x128xf32>
    %224 = vector.broadcast %7 : vector<16x1xf32> to vector<16x128xf32>
    %225 = arith.mulf %223, %224 : vector<16x128xf32>
    %226 = arith.truncf %225 : vector<16x128xf32> to vector<16x128xbf16>
    %c21 = arith.constant 21 : index
    %c0_124 = arith.constant 0 : index
    %c0_125 = arith.constant 0 : index
    %227 = vector.load %arg5[%c21, %c0_124, %c0_125] : memref<27x128x128xbf16, #tpu.memory_space<vmem>>, vector<1x128x128xbf16>
    %228 = vector.shape_cast %227 : vector<1x128x128xbf16> to vector<128x128xbf16>
    %cst_126 = arith.constant dense<0.000000e+00> : vector<16x128xf32>
    %229 = tpu.matmul %226, %228, %cst_126 {dimension_numbers = #tpu.dot_dimension_numbers<[1], [0], [0], [1], [0, 0, 1, 1], [], []>} : vector<16x128xbf16>, vector<128x128xbf16>, vector<16x128xf32> -> vector<16x128xf32>
    %230 = arith.addf %222, %229 : vector<16x128xf32>
    %231 = arith.truncf %198 : vector<16x128xf32> to vector<16x128xbf16>
    %c22 = arith.constant 22 : index
    %c0_127 = arith.constant 0 : index
    %c0_128 = arith.constant 0 : index
    %232 = vector.load %arg5[%c22, %c0_127, %c0_128] : memref<27x128x128xbf16, #tpu.memory_space<vmem>>, vector<1x128x128xbf16>
    %233 = vector.shape_cast %232 : vector<1x128x128xbf16> to vector<128x128xbf16>
    %cst_129 = arith.constant dense<0.000000e+00> : vector<16x128xf32>
    %234 = tpu.matmul %231, %233, %cst_129 {dimension_numbers = #tpu.dot_dimension_numbers<[1], [0], [0], [1], [0, 0, 1, 1], [], []>} : vector<16x128xbf16>, vector<128x128xbf16>, vector<16x128xf32> -> vector<16x128xf32>
    %235 = arith.addf %230, %234 : vector<16x128xf32>
    %c15_i32_130 = arith.constant 15 : i32
    %236 = tpu.dynamic_rotate %198 by %c15_i32_130 dim 0 : vector<16x128xf32>, i32 -> vector<16x128xf32>
    %237 = vector.broadcast %9 : vector<16x1xf32> to vector<16x128xf32>
    %238 = arith.mulf %236, %237 : vector<16x128xf32>
    %239 = arith.truncf %238 : vector<16x128xf32> to vector<16x128xbf16>
    %c23 = arith.constant 23 : index
    %c0_131 = arith.constant 0 : index
    %c0_132 = arith.constant 0 : index
    %240 = vector.load %arg5[%c23, %c0_131, %c0_132] : memref<27x128x128xbf16, #tpu.memory_space<vmem>>, vector<1x128x128xbf16>
    %241 = vector.shape_cast %240 : vector<1x128x128xbf16> to vector<128x128xbf16>
    %cst_133 = arith.constant dense<0.000000e+00> : vector<16x128xf32>
    %242 = tpu.matmul %239, %241, %cst_133 {dimension_numbers = #tpu.dot_dimension_numbers<[1], [0], [0], [1], [0, 0, 1, 1], [], []>} : vector<16x128xbf16>, vector<128x128xbf16>, vector<16x128xf32> -> vector<16x128xf32>
    %243 = arith.addf %235, %242 : vector<16x128xf32>
    %c13_i32_134 = arith.constant 13 : i32
    %244 = tpu.dynamic_rotate %198 by %c13_i32_134 dim 0 : vector<16x128xf32>, i32 -> vector<16x128xf32>
    %245 = vector.broadcast %11 : vector<16x1xf32> to vector<16x128xf32>
    %246 = arith.mulf %244, %245 : vector<16x128xf32>
    %247 = arith.truncf %246 : vector<16x128xf32> to vector<16x128xbf16>
    %c24 = arith.constant 24 : index
    %c0_135 = arith.constant 0 : index
    %c0_136 = arith.constant 0 : index
    %248 = vector.load %arg5[%c24, %c0_135, %c0_136] : memref<27x128x128xbf16, #tpu.memory_space<vmem>>, vector<1x128x128xbf16>
    %249 = vector.shape_cast %248 : vector<1x128x128xbf16> to vector<128x128xbf16>
    %cst_137 = arith.constant dense<0.000000e+00> : vector<16x128xf32>
    %250 = tpu.matmul %247, %249, %cst_137 {dimension_numbers = #tpu.dot_dimension_numbers<[1], [0], [0], [1], [0, 0, 1, 1], [], []>} : vector<16x128xbf16>, vector<128x128xbf16>, vector<16x128xf32> -> vector<16x128xf32>
    %251 = arith.addf %243, %250 : vector<16x128xf32>
    %c12_i32_138 = arith.constant 12 : i32
    %252 = tpu.dynamic_rotate %198 by %c12_i32_138 dim 0 : vector<16x128xf32>, i32 -> vector<16x128xf32>
    %253 = vector.broadcast %13 : vector<16x1xf32> to vector<16x128xf32>
    %254 = arith.mulf %252, %253 : vector<16x128xf32>
    %255 = arith.truncf %254 : vector<16x128xf32> to vector<16x128xbf16>
    %c25 = arith.constant 25 : index
    %c0_139 = arith.constant 0 : index
    %c0_140 = arith.constant 0 : index
    %256 = vector.load %arg5[%c25, %c0_139, %c0_140] : memref<27x128x128xbf16, #tpu.memory_space<vmem>>, vector<1x128x128xbf16>
    %257 = vector.shape_cast %256 : vector<1x128x128xbf16> to vector<128x128xbf16>
    %cst_141 = arith.constant dense<0.000000e+00> : vector<16x128xf32>
    %258 = tpu.matmul %255, %257, %cst_141 {dimension_numbers = #tpu.dot_dimension_numbers<[1], [0], [0], [1], [0, 0, 1, 1], [], []>} : vector<16x128xbf16>, vector<128x128xbf16>, vector<16x128xf32> -> vector<16x128xf32>
    %259 = arith.addf %251, %258 : vector<16x128xf32>
    %c11_i32_142 = arith.constant 11 : i32
    %260 = tpu.dynamic_rotate %198 by %c11_i32_142 dim 0 : vector<16x128xf32>, i32 -> vector<16x128xf32>
    %261 = vector.broadcast %15 : vector<16x1xf32> to vector<16x128xf32>
    %262 = arith.mulf %260, %261 : vector<16x128xf32>
    %263 = arith.truncf %262 : vector<16x128xf32> to vector<16x128xbf16>
    %c26 = arith.constant 26 : index
    %c0_143 = arith.constant 0 : index
    %c0_144 = arith.constant 0 : index
    %264 = vector.load %arg5[%c26, %c0_143, %c0_144] : memref<27x128x128xbf16, #tpu.memory_space<vmem>>, vector<1x128x128xbf16>
    %265 = vector.shape_cast %264 : vector<1x128x128xbf16> to vector<128x128xbf16>
    %cst_145 = arith.constant dense<0.000000e+00> : vector<16x128xf32>
    %266 = tpu.matmul %263, %265, %cst_145 {dimension_numbers = #tpu.dot_dimension_numbers<[1], [0], [0], [1], [0, 0, 1, 1], [], []>} : vector<16x128xbf16>, vector<128x128xbf16>, vector<16x128xf32> -> vector<16x128xf32>
    %267 = arith.addf %259, %266 : vector<16x128xf32>
    %c0_146 = arith.constant 0 : index
    %c0_147 = arith.constant 0 : index
    %268 = vector.load %arg6[%c0_146, %c0_147] : memref<1x128xf32, #tpu.memory_space<vmem>>, vector<1x128xf32>
    %269 = vector.broadcast %268 : vector<1x128xf32> to vector<16x128xf32>
    %270 = arith.addf %267, %269 : vector<16x128xf32>
    %c0_148 = arith.constant 0 : index
    %c0_149 = arith.constant 0 : index
    %c0_150 = arith.constant 0 : index
    %c0_151 = arith.constant 0 : index
    %271 = vector.load %arg10[%c0_148, %c0_149, %c0_150, %c0_151] : memref<1x1x16x128xf32, #tpu.memory_space<vmem>>, vector<1x1x16x128xf32>
    %272 = vector.shape_cast %271 : vector<1x1x16x128xf32> to vector<16x128xf32>
    %273 = vector.shape_cast %270 : vector<16x128xf32> to vector<1x1x16x128xf32>
    tpu.vector_store %arg10[%c0_148, %c0_149, %c0_150, %c0_151], %273 {strides = array<i32>} : memref<1x1x16x128xf32, #tpu.memory_space<vmem>>, vector<1x1x16x128xf32>,
    %cst_152 = arith.constant dense<0.000000e+00> : vector<128xf32>
    %274 = vector.multi_reduction <add>, %270, %cst_152 [0] : vector<16x128xf32> to vector<128xf32>
    %275 = vector.shape_cast %274 : vector<128xf32> to vector<1x128xf32>
    %c0_153 = arith.constant 0 : index
    %c0_154 = arith.constant 0 : index
    %c0_155 = arith.constant 0 : index
    %c0_156 = arith.constant 0 : index
    %276 = vector.load %arg11[%c0_153, %c0_154, %c0_155, %c0_156] : memref<1x1x2x128xf32, #tpu.memory_space<vmem>>, vector<1x1x1x128xf32>
    %277 = vector.shape_cast %276 : vector<1x1x1x128xf32> to vector<1x128xf32>
    %278 = vector.shape_cast %275 : vector<1x128xf32> to vector<1x1x1x128xf32>
    tpu.vector_store %arg11[%c0_153, %c0_154, %c0_155, %c0_156], %278 {strides = array<i32>} : memref<1x1x2x128xf32, #tpu.memory_space<vmem>>, vector<1x1x1x128xf32>,
    %279 = arith.mulf %270, %270 : vector<16x128xf32>
    %cst_157 = arith.constant dense<0.000000e+00> : vector<128xf32>
    %280 = vector.multi_reduction <add>, %279, %cst_157 [0] : vector<16x128xf32> to vector<128xf32>
    %281 = vector.shape_cast %280 : vector<128xf32> to vector<1x128xf32>
    %c0_158 = arith.constant 0 : index
    %c0_159 = arith.constant 0 : index
    %c1_160 = arith.constant 1 : index
    %c0_161 = arith.constant 0 : index
    %282 = vector.load %arg11[%c0_158, %c0_159, %c1_160, %c0_161] : memref<1x1x2x128xf32, #tpu.memory_space<vmem>>, vector<1x1x1x128xf32>
    %283 = vector.shape_cast %282 : vector<1x1x1x128xf32> to vector<1x128xf32>
    %284 = vector.shape_cast %281 : vector<1x128xf32> to vector<1x1x1x128xf32>
    tpu.vector_store %arg11[%c0_158, %c0_159, %c1_160, %c0_161], %284 {strides = array<i32>} : memref<1x1x2x128xf32, #tpu.memory_space<vmem>>, vector<1x1x1x128xf32>,
    return
  }
  func.func @transform_0(%arg0: i32, %arg1: i32) -> (i32, i32, i32, i32) {
    %c1_i32 = arith.constant 1 : i32
    %0 = arith.subi %arg1, %c1_i32 : i32
    %c0_i32 = arith.constant 0 : i32
    %1 = arith.addi %0, %c0_i32 : i32
    %c0_i32_0 = arith.constant 0 : i32
    %2 = arith.maxsi %1, %c0_i32_0 : i32
    %c3_i32 = arith.constant 3 : i32
    %3 = arith.minsi %2, %c3_i32 : i32
    %c0_i32_1 = arith.constant 0 : i32
    %c0_i32_2 = arith.constant 0 : i32
    %c0_i32_3 = arith.constant 0 : i32
    return %arg0, %3, %c0_i32_1, %c0_i32_2 : i32, i32, i32, i32
  }
  func.func @transform_1(%arg0: i32, %arg1: i32) -> (i32, i32, i32, i32) {
    %c1_i32 = arith.constant 1 : i32
    %0 = arith.subi %arg1, %c1_i32 : i32
    %c1_i32_0 = arith.constant 1 : i32
    %1 = arith.addi %0, %c1_i32_0 : i32
    %c0_i32 = arith.constant 0 : i32
    %2 = arith.maxsi %1, %c0_i32 : i32
    %c3_i32 = arith.constant 3 : i32
    %3 = arith.minsi %2, %c3_i32 : i32
    %c0_i32_1 = arith.constant 0 : i32
    %c0_i32_2 = arith.constant 0 : i32
    %c0_i32_3 = arith.constant 0 : i32
    return %arg0, %3, %c0_i32_1, %c0_i32_2 : i32, i32, i32, i32
  }
  func.func @transform_2(%arg0: i32, %arg1: i32) -> (i32, i32, i32, i32) {
    %c1_i32 = arith.constant 1 : i32
    %0 = arith.subi %arg1, %c1_i32 : i32
    %c2_i32 = arith.constant 2 : i32
    %1 = arith.addi %0, %c2_i32 : i32
    %c0_i32 = arith.constant 0 : i32
    %2 = arith.maxsi %1, %c0_i32 : i32
    %c3_i32 = arith.constant 3 : i32
    %3 = arith.minsi %2, %c3_i32 : i32
    %c0_i32_0 = arith.constant 0 : i32
    %c0_i32_1 = arith.constant 0 : i32
    %c0_i32_2 = arith.constant 0 : i32
    return %arg0, %3, %c0_i32_0, %c0_i32_1 : i32, i32, i32, i32
  }
  func.func @transform_3(%arg0: i32, %arg1: i32) -> (i32, i32, i32) {
    %c0_i32 = arith.constant 0 : i32
    %c0_i32_0 = arith.constant 0 : i32
    %c0_i32_1 = arith.constant 0 : i32
    %c0_i32_2 = arith.constant 0 : i32
    return %c0_i32, %c0_i32_0, %c0_i32_1 : i32, i32, i32
  }
  func.func @transform_4(%arg0: i32, %arg1: i32) -> (i32, i32) {
    %c0_i32 = arith.constant 0 : i32
    %c0_i32_0 = arith.constant 0 : i32
    %c0_i32_1 = arith.constant 0 : i32
    return %c0_i32, %c0_i32_0 : i32, i32
  }
  func.func @transform_5(%arg0: i32, %arg1: i32) -> (i32, i32, i32) {
    %c0_i32 = arith.constant 0 : i32
    %c0_i32_0 = arith.constant 0 : i32
    %c0_i32_1 = arith.constant 0 : i32
    %c0_i32_2 = arith.constant 0 : i32
    return %c0_i32, %c0_i32_0, %c0_i32_1 : i32, i32, i32
  }
  func.func @transform_6(%arg0: i32, %arg1: i32) -> (i32, i32) {
    %c0_i32 = arith.constant 0 : i32
    %c0_i32_0 = arith.constant 0 : i32
    %c0_i32_1 = arith.constant 0 : i32
    return %c0_i32, %c0_i32_0 : i32, i32
  }
  func.func @transform_7(%arg0: i32, %arg1: i32) -> (i32, i32) {
    %c0_i32 = arith.constant 0 : i32
    %c0_i32_0 = arith.constant 0 : i32
    %c0_i32_1 = arith.constant 0 : i32
    return %c0_i32, %c0_i32_0 : i32, i32
  }
  func.func @transform_8(%arg0: i32, %arg1: i32) -> (i32, i32, i32, i32) {
    %c0_i32 = arith.constant 0 : i32
    %c0_i32_0 = arith.constant 0 : i32
    %c0_i32_1 = arith.constant 0 : i32
    return %arg0, %arg1, %c0_i32, %c0_i32_0 : i32, i32, i32, i32
  }
  func.func @transform_9(%arg0: i32, %arg1: i32) -> (i32, i32, i32, i32) {
    %c0_i32 = arith.constant 0 : i32
    %c0_i32_0 = arith.constant 0 : i32
    %c0_i32_1 = arith.constant 0 : i32
    return %arg0, %arg1, %c0_i32, %c0_i32_0 : i32, i32, i32, i32
  }
}

module attributes {stable_mosaic.version = 11 : i64} {
  func.func @_bn_relu_kernel(%arg0: i32, %arg1: i32, %arg2: memref<1x1x16x128xf32, #tpu.memory_space<vmem>>, %arg3: memref<1x128xf32, #tpu.memory_space<vmem>>, %arg4: memref<1x128xf32, #tpu.memory_space<vmem>>, %arg5: memref<1x1x16x128xf32, #tpu.memory_space<vmem>>) attributes {dimension_semantics = [#tpu.dimension_semantics<parallel>, #tpu.dimension_semantics<parallel>], iteration_bounds = array<i64: 2, 4>, scalar_prefetch = 0 : i64, scratch_operands = 0 : i64, tpu.core_type = #tpu.core_type<tc>, window_params = [{transform_indices = @transform_0, window_bounds = array<i64: 1, 1, 16, 128>}, {pipeline_mode = #tpu.pipeline_mode<synchronous>, transform_indices = @transform_1, window_bounds = array<i64: 1, 128>}, {pipeline_mode = #tpu.pipeline_mode<synchronous>, transform_indices = @transform_2, window_bounds = array<i64: 1, 128>}, {transform_indices = @transform_3, window_bounds = array<i64: 1, 1, 16, 128>}]} {
    %c0 = arith.constant 0 : index
    %c0_0 = arith.constant 0 : index
    %c0_1 = arith.constant 0 : index
    %c0_2 = arith.constant 0 : index
    %0 = vector.load %arg2[%c0, %c0_0, %c0_1, %c0_2] : memref<1x1x16x128xf32, #tpu.memory_space<vmem>>, vector<1x1x16x128xf32>
    %1 = vector.shape_cast %0 : vector<1x1x16x128xf32> to vector<16x128xf32>
    %c0_3 = arith.constant 0 : index
    %c0_4 = arith.constant 0 : index
    %2 = vector.load %arg3[%c0_3, %c0_4] : memref<1x128xf32, #tpu.memory_space<vmem>>, vector<1x128xf32>
    %3 = vector.broadcast %2 : vector<1x128xf32> to vector<16x128xf32>
    %4 = arith.mulf %1, %3 : vector<16x128xf32>
    %c0_5 = arith.constant 0 : index
    %c0_6 = arith.constant 0 : index
    %5 = vector.load %arg4[%c0_5, %c0_6] : memref<1x128xf32, #tpu.memory_space<vmem>>, vector<1x128xf32>
    %6 = vector.broadcast %5 : vector<1x128xf32> to vector<16x128xf32>
    %7 = arith.addf %4, %6 : vector<16x128xf32>
    %cst = arith.constant 0.000000e+00 : f32
    %8 = vector.broadcast %cst : f32 to vector<16x128xf32>
    %9 = arith.maximumf %7, %8 : vector<16x128xf32>
    %c0_7 = arith.constant 0 : index
    %c0_8 = arith.constant 0 : index
    %c0_9 = arith.constant 0 : index
    %c0_10 = arith.constant 0 : index
    %10 = vector.load %arg5[%c0_7, %c0_8, %c0_9, %c0_10] : memref<1x1x16x128xf32, #tpu.memory_space<vmem>>, vector<1x1x16x128xf32>
    %11 = vector.shape_cast %10 : vector<1x1x16x128xf32> to vector<16x128xf32>
    %12 = vector.shape_cast %9 : vector<16x128xf32> to vector<1x1x16x128xf32>
    tpu.vector_store %arg5[%c0_7, %c0_8, %c0_9, %c0_10], %12 {strides = array<i32>} : memref<1x1x16x128xf32, #tpu.memory_space<vmem>>, vector<1x1x16x128xf32>,
    return
  }
  func.func @transform_0(%arg0: i32, %arg1: i32) -> (i32, i32, i32, i32) {
    %c0_i32 = arith.constant 0 : i32
    %c0_i32_0 = arith.constant 0 : i32
    %c0_i32_1 = arith.constant 0 : i32
    return %arg0, %arg1, %c0_i32, %c0_i32_0 : i32, i32, i32, i32
  }
  func.func @transform_1(%arg0: i32, %arg1: i32) -> (i32, i32) {
    %c0_i32 = arith.constant 0 : i32
    %c0_i32_0 = arith.constant 0 : i32
    %c0_i32_1 = arith.constant 0 : i32
    return %c0_i32, %c0_i32_0 : i32, i32
  }
  func.func @transform_2(%arg0: i32, %arg1: i32) -> (i32, i32) {
    %c0_i32 = arith.constant 0 : i32
    %c0_i32_0 = arith.constant 0 : i32
    %c0_i32_1 = arith.constant 0 : i32
    return %c0_i32, %c0_i32_0 : i32, i32
  }
  func.func @transform_3(%arg0: i32, %arg1: i32) -> (i32, i32, i32, i32) {
    %c0_i32 = arith.constant 0 : i32
    %c0_i32_0 = arith.constant 0 : i32
    %c0_i32_1 = arith.constant 0 : i32
    return %arg0, %arg1, %c0_i32, %c0_i32_0 : i32, i32, i32, i32
  }
}

</mosaic_0001>

<bundles_post_ra>
// kernel: down_forward.4
= control target key start
LH: loop header
LB: loop body
LE: loop exit
PB: predicated region body
PF: predicated region fallthrough
CT: control target
= control target key end

     0   :  { %s456_s6 = smov 0   ;;  %s458_s7 = smov 0   ;;  %s520_s0 = inlined_call_operand.vmem [shape: f32[2,8,8,4,8], index: 0, kind: input, shape index: {}]   ;;  %s521_s1 = inlined_call_operand.vmem [shape: bf16[2,4,4,4,4], index: 1, kind: output, shape index: {}]  }
   0x1   :  { %s460_s8 = smov 0   ;;  %s462_s9 = smov 0  }
   0x2   :  { %s464_s10 = smov 0  }
   0x3 LB: > { %s20_s11 = sadd.s32 1, %s435_s8  ;;  %s23_s12 = sadd.s32 1, %s439_s9  ;;  %s443_s10 = sphi %s464_s10, %s11_s10   ;;  %s439_s9 = sphi %s462_s9, %s525_s9   ;;  %s435_s8 = sphi %s460_s8, %s524_s8   ;;  %s431_s7 = sphi %s458_s7, %s523_s7   ;;  %s427_s6 = sphi %s456_s6, %s522_s6  }
   0x4   : > { %p21_p0 = scmp.ge.s32.totalorder %s20_s11, 4  ;;  %p334_p1 = scmp.ge.s32.totalorder %s443_s10, 1 }
   0x5   : > { %p109_p2 = scmp.lt.s32.totalorder %s443_s10, 9 }
   0x6   : > { %s527_s11 = smov (%p21_p0, %s20_s11), 0  ;;  %s529_s12 = smov (!%p21_p0, %s23_s12), %s439_s9 }
   0x7   : > { %p110_p3 = pnand %p334_p1, %p109_p2  ;;  %p25_p4 = scmp.ge.s32.totalorder %s529_s12, 2 }
   0x8   : > { %s335_s13 = sshll.u32 (!%p110_p3), %s427_s6, 1  ;;  %p139_p5 = scmp.lt.s32.totalorder (!%p110_p3), %s431_s7, 1  ;;  %vm230_vm0 = vcmask (!%p110_p3), 25600  }
   0x9   : > { %s531_s12 = smov (%p25_p4, %s529_s12), 0  ;;  %113 = sbr.rel (%p110_p3) target bundleno = 156 (0x9c), region = 24 }
   0xa   : > { %p141_p6 = scmp.lt.s32.totalorder (!%p110_p3), %s335_s13, 7  ;;  %s445_s21 = smov (!%p110_p3), 124  }
   0xb   : > { %p151_p7 = scmp.lt.s32.totalorder (!%p110_p3), %s427_s6, 3 }
  0x10   : > { %s533_s7 = smov (!%p139_p5, %s431_s7), 1  ;;  %s535_s13 = smov (!%p141_p6, %s335_s13), 7 }
  0x11   : > { %s337_s14 = sshll.u32 %s533_s7, 6  ;;  %s336_s15 = sshll.u32 %s535_s13, 3 }
  0x12   : > { %s145_s16 = sadd.s32 %s337_s14, %s336_s15  ;;  %s537_s6 = smov (!%p151_p7, %s427_s6), 3 }
  0x13   : > { %s338_s17 = sshll.u32 %s145_s16, 2  ;;  %s339_s22 = sshll.u32 %s537_s6, 2 }
  0x14   : > { %s147_s20 = scalar_lea.vmem %s520_s0, %s338_s17  ;;  %s340_s23 = sshll.u32 %s533_s7, 4 }
  0x15   : > { %v162_v0 = vld [vmem:[%s147_s20 + $0x10] sm:$0xf]  ;;  %v163_v1 = vld [vmem:[%s147_s20 + $0x14] sm:$0xf]  ;;  %v158_v5 = vld [vmem:[%s147_s20] sm:$0xf]  ;;  %s155_s24 = sadd.s32 %s340_s23, %s339_s22 }
  0x16   : > { %v170_v2 = vld [vmem:[%s147_s20 + $0x30] sm:$0xf]  ;;  %v171_v3 = vld [vmem:[%s147_s20 + $0x34] sm:$0xf]  ;;  %v159_v6 = vld [vmem:[%s147_s20 + $0x4] sm:$0xf] }
  0x17   : > { %v178_v4 = vmax.f32 %v162_v0, %v170_v2  ;;  %v179_v7 = vmax.f32 %v163_v1, %v171_v3  ;;  %v166_v8 = vld [vmem:[%s147_s20 + $0x20] sm:$0xf]  ;;  %v167_v9 = vld [vmem:[%s147_s20 + $0x24] sm:$0xf]  ;;  %v164_v10 = vld [vmem:[%s147_s20 + $0x18] sm:$0xf] }
  0x18   : > { %v174_v11 = vmax.f32 %v158_v5, %v166_v8  ;;  %v175_v12 = vmax.f32 %v159_v6, %v167_v9  ;;  %v165_v13 = vld [vmem:[%s147_s20 + $0x1c] sm:$0xf]  ;;  %v172_v14 = vld [vmem:[%s147_s20 + $0x38] sm:$0xf]  ;;  %v160_v19 = vld [vmem:[%s147_s20 + $0x8] sm:$0xf] }
  0x19   : > { %v173_v15 = vld [vmem:[%s147_s20 + $0x3c] sm:$0xf]  ;;  %v395_v16 = vpack.i.bf16 %v179_v7, %v178_v4  ;;  %v180_v17 = vmax.f32 %v164_v10, %v172_v14  ;;  %v161_v20 = vld [vmem:[%s147_s20 + $0xc] sm:$0xf]  ;;  %v168_v21 = vld [vmem:[%s147_s20 + $0x28] sm:$0xf] }
  0x1a   : > { %v181_v18 = vmax.f32 %v165_v13, %v173_v15  ;;  %v385_v22 = vpack.i.bf16 %v175_v12, %v174_v11  ;;  %v169_v23 = vld [vmem:[%s147_s20 + $0x2c] sm:$0xf]  ;;  %v176_v24 = vmax.f32 %v160_v19, %v168_v21  ;;  %s341_s25 = sshll.u32 %s155_s24, 1 }
  0x1b   : > { %396 = vrot.lane.b32.xlu1 %v395_v16, %s445_s21  ;;  %v177_v26 = vmax.f32 %v161_v20, %v169_v23  ;;  %s157_s28 = scalar_lea.vmem %s521_s1, %s341_s25 }
  0x1c   : > { %v400_v25 = vpack.i.bf16 %v181_v18, %v180_v17  ;;  %386 = vrot.lane.b32.xlu0 %v385_v22, %s445_s21 }
  0x1d   : > { %v390_v27 = vpack.i.bf16 %v177_v26, %v176_v24 }
  0x1f   : > { %401 = vrot.lane.b32.xlu1 %v400_v25, %s445_s21 }
  0x20   : > { %391 = vrot.lane.b32.xlu0 %v390_v27, %s445_s21 }
  0x8d   : > { %v397_v28 = vpop.permute.xlu1 %396 }
  0x8e   : > { %v399_v29 = vunpack.i.h.bf16 %v397_v28  ;;  %v398_v30 = vunpack.i.l.bf16 %v397_v28  ;;  %v387_v31 = vpop.permute.xlu0 %386 }
  0x8f   : > { %v389_v32 = vunpack.i.h.bf16 %v387_v31  ;;  %v388_v33 = vunpack.i.l.bf16 %v387_v31 }
  0x90   : > { %v219_v34 = vmax.f32 %v179_v7, %v399_v29  ;;  %v218_v35 = vmax.f32 %v178_v4, %v398_v30 }
  0x91   : > { %v215_v36 = vmax.f32 %v175_v12, %v389_v32  ;;  %v214_v37 = vmax.f32 %v174_v11, %v388_v33  ;;  %v402_v38 = vpop.permute.xlu1 %401 }
  0x92   : > { %v224_v39 = vmax.f32 %v218_v35, %v219_v34  ;;  %v404_v40 = vunpack.i.h.bf16 %v402_v38  ;;  %v403_v41 = vunpack.i.l.bf16 %v402_v38  ;;  %v392_v42 = vpop.permute.xlu0 %391 }
  0x93   : > { %v222_v43 = vmax.f32 %v214_v37, %v215_v36  ;;  %v394_v44 = vunpack.i.h.bf16 %v392_v42  ;;  %v393_v45 = vunpack.i.l.bf16 %v392_v42 }
  0x94   : > { %v228_v46 = vpack.c.bf16 %v224_v39, %v224_v39  ;;  %v221_v47 = vmax.f32 %v181_v18, %v404_v40  ;;  %v220_v48 = vmax.f32 %v180_v17, %v403_v41 }
  0x95   : > { %v226_v49 = vpack.c.bf16 %v222_v43, %v222_v43  ;;  %v217_v50 = vmax.f32 %v177_v26, %v394_v44  ;;  %v216_v51 = vmax.f32 %v176_v24, %v393_v45 }
  0x96   : > { %233 = vst.msk [vmem:[%s157_s28 + $0x4] sm:$0x3] %vm230_vm0, %v228_v46  ;;  %v225_v52 = vmax.f32 %v220_v48, %v221_v47 }
  0x97   : > { %231 = vst.msk [vmem:[%s157_s28] sm:$0x3] %vm230_vm0, %v226_v49  ;;  %v223_v53 = vmax.f32 %v216_v51, %v217_v50 }
  0x98   : > { %v229_v54 = vpack.c.bf16 %v225_v52, %v225_v52 }
  0x99   : > { %v227_v55 = vpack.c.bf16 %v223_v53, %v223_v53 }
  0x9a   : > { %234 = vst.msk [vmem:[%s157_s28 + $0x6] sm:$0x3] %vm230_vm0, %v229_v54 }
  0x9b   : > { %232 = vst.msk [vmem:[%s157_s28 + $0x2] sm:$0x3] %vm230_vm0, %v227_v55 }
  0x9c PF: > { %s11_s10 = sadd.s32 1, %s443_s10   ;;  %s522_s6 = smov %s435_s8 }
  0x9d   : > { %p8_p8 = scmp.ge.s32.totalorder %s11_s10, 10   ;;  %s523_s7 = smov %s439_s9 }
  0x9e   : > { %s524_s8 = smov %s527_s11  ;;  %s525_s9 = smov %s531_s12 }
  0x9f   :  { %10 = sbr.rel (!%p8_p8) target bundleno = 3 (0x3), region = 54 }

// kernel: down_forward.7
= control target key start
LH: loop header
LB: loop body
LE: loop exit
PB: predicated region body
PF: predicated region fallthrough
CT: control target
= control target key end

     0   :  { %s441_s12 = smov 0   ;;  %s443_s13 = smov 0   ;;  %s498_s0 = inlined_call_operand.vmem [shape: f32[2,4,16,128], index: 0, kind: input, shape index: {}]   ;;  %s499_s1 = inlined_call_operand.vmem [shape: f32[1,128], index: 1, kind: input, shape index: {}]   ;;  %s500_s2 = inlined_call_operand.vmem [shape: f32[1,128], index: 2, kind: input, shape index: {}]   ;;  %s501_s3 = inlined_call_operand.vmem [shape: f32[2,4,16,128], index: 3, kind: output, shape index: {}]  }
   0x1   :  { %s445_s14 = smov 0   ;;  %s447_s15 = smov 0  }
   0x2   :  { %s449_s16 = smov 0  }
   0x3 LB: > { %s22_s17 = sadd.s32 1, %s411_s14  ;;  %s25_s18 = sadd.s32 1, %s415_s15  ;;  %s419_s16 = sphi %s449_s16, %s13_s16   ;;  %s415_s15 = sphi %s447_s15, %s505_s15   ;;  %s411_s14 = sphi %s445_s14, %s504_s14   ;;  %s407_s13 = sphi %s443_s13, %s503_s13   ;;  %s403_s12 = sphi %s441_s12, %s502_s12  }
   0x4   : > { %p23_p0 = scmp.ge.s32.totalorder %s22_s17, 4  ;;  %p330_p1 = scmp.ge.s32.totalorder %s419_s16, 1 }
   0x5   : > { %p157_p2 = scmp.lt.s32.totalorder %s419_s16, 9 }
   0x6   : > { %s507_s17 = smov (%p23_p0, %s22_s17), 0  ;;  %s509_s18 = smov (!%p23_p0, %s25_s18), %s415_s15 }
   0x7   : > { %p158_p3 = pnand %p330_p1, %p157_p2  ;;  %p27_p4 = scmp.ge.s32.totalorder %s509_s18, 2 }
   0x8   : > { %p189_p5 = scmp.lt.s32.totalorder (!%p158_p3), %s407_s13, 1  ;;  %p191_p6 = scmp.lt.s32.totalorder (!%p158_p3), %s403_s12, 3  ;;  %v337_v0 = vld [vmem:[%s499_s1] ss:$0 sm:$0xff] (!%p158_p3) }
   0x9   : > { %s511_s18 = smov (%p27_p4, %s509_s18), 0  ;;  %161 = sbr.rel (%p158_p3) target bundleno = 29 (0x1d), region = 32 }
   0xa   : > { %v338_v3 = vld [vmem:[%s500_s2] ss:$0 sm:$0xff] (!%p158_p3) }
  0x10   : > { %s513_s13 = smov (!%p189_p5, %s407_s13), 1  ;;  %s515_s12 = smov (!%p191_p6, %s403_s12), 3 }
  0x11   : > { %s332_s19 = sshll.u32 %s513_s13, 3  ;;  %s331_s20 = sshll.u32 %s515_s12, 1 }
  0x12   : > { %s195_s21 = sadd.s32 %s332_s19, %s331_s20 }
  0x13   : > { %s333_s22 = sshll.u32 %s195_s21, 3 }
  0x14   : > { %s197_s27 = scalar_lea.vmem %s498_s0, %s333_s22  ;;  %s206_s5 = scalar_lea.vmem %s501_s3, %s333_s22 }
  0x15   : > { %v207_v1 = vld [vmem:[%s197_s27] sm:$0xff]  ;;  %v208_v2 = vld [vmem:[%s197_s27 + $0x8] sm:$0xff] }
  0x16   : > { %v216_v4 = vmul.f32 %v337_v0, %v207_v1  ;;  %v217_v5 = vmul.f32 %v337_v0, %v208_v2 }
  0x18   : > { %v225_v6 = vadd.f32 %v338_v3, %v216_v4  ;;  %v226_v7 = vadd.f32 %v338_v3, %v217_v5 }
  0x1a   : > { %v227_v8 = vmax.f32 %v225_v6, 0.0  ;;  %v228_v9 = vmax.f32 %v226_v7, 0.0 }
  0x1c   : > { %229 = vst [vmem:[%s206_s5] sm:$0xff] %v227_v8  ;;  %230 = vst [vmem:[%s206_s5 + $0x8] sm:$0xff] %v228_v9 }
  0x1d PF: > { %s13_s16 = sadd.s32 1, %s419_s16   ;;  %s502_s12 = smov %s411_s14 }
  0x1e   : > { %p10_p7 = scmp.ge.s32.totalorder %s13_s16, 10   ;;  %s503_s13 = smov %s415_s15 }
  0x1f   : > { %s504_s14 = smov %s507_s17  ;;  %s505_s15 = smov %s511_s18 }
  0x20   :  { %12 = sbr.rel (!%p10_p7) target bundleno = 3 (0x3), region = 62 }

// kernel: down_forward.5
= control target key start
LH: loop header
LB: loop body
LE: loop exit
PB: predicated region body
PF: predicated region fallthrough
CT: control target
= control target key end

     0   :  { %s2884_s24 = smov 0   ;;  %s2886_s25 = smov 0   ;;  %s3592_s0 = inlined_call_operand.vmem [shape: bf16[2,4,16,4], index: 0, kind: input, shape index: {}, may-alias: {0,1,2}]   ;;  %s3593_s1 = inlined_call_operand.vmem [shape: bf16[2,4,16,4], index: 1, kind: input, shape index: {}, may-alias: {0,1,2}]   ;;  %s3594_s2 = inlined_call_operand.vmem [shape: bf16[2,4,16,4], index: 2, kind: input, shape index: {}, may-alias: {0,1,2}]   ;;  %s3595_s3 = inlined_call_operand.vmem [shape: bf16[27,4,128], index: 3, kind: input, shape index: {}]   ;;  %s3596_s4 = inlined_call_operand.vmem [shape: f32[1,128], index: 4, kind: input, shape index: {}]   ;;  %s3597_s5 = inlined_call_operand.vmem [shape: f32[9,16,1], index: 5, kind: input, shape index: {}]   ;;  %s3598_s6 = inlined_call_operand.vmem [shape: f32[2,4,16,128], index: 6, kind: output, shape index: {0}]   ;;  %s3599_s7 = inlined_call_operand.vmem [shape: f32[2,4,2,128], index: 7, kind: output, shape index: {1}]  }
   0x1   :  { %3600 = sst [smem:[#allocation3_spill]] %s3597_s5  ;;  %s2888_s26 = smov 0  }
   0x2   :  { %s2890_s27 = smov 0   ;;  %s2892_s28 = smov 0  }
   0x3 LB: > { %s27_s29 = sadd.s32 1, %s2831_s26  ;;  %s30_s30 = sadd.s32 1, %s2835_s27  ;;  %s2839_s28 = sphi %s2892_s28, %s18_s28   ;;  %s2835_s27 = sphi %s2890_s27, %s3607_s27   ;;  %s2831_s26 = sphi %s2888_s26, %s3606_s26   ;;  %s2827_s25 = sphi %s2886_s25, %s3605_s25   ;;  %s2823_s24 = sphi %s2884_s24, %s3604_s24  }
   0x4   : > { %p28_p0 = scmp.ge.s32.totalorder %s27_s29, 4  ;;  %p2407_p1 = scmp.ge.s32.totalorder %s2839_s28, 1 }
   0x5   : > { %p350_p2 = scmp.lt.s32.totalorder %s2839_s28, 9 }
   0x6   : > { %s3609_s29 = smov (%p28_p0, %s27_s29), 0  ;;  %s3611_s30 = smov (!%p28_p0, %s30_s30), %s2835_s27 }
   0x7   : > { %p351_p3 = pnand %p2407_p1, %p350_p2  ;;  %p32_p4 = scmp.ge.s32.totalorder %s3611_s30, 2 }
   0x8   : > { %s3602_s5 = sld [smem:[#allocation3_spill]] (!%p351_p3)  ;;  %v2841_v2 = vmov (!%p351_p3), 0   ;;  %v2842_v5 = vmov (!%p351_p3), 0.0   ;;  %v2454_v6 = vld [vmem:[%s3595_s3 + $0x2] sm:$0x3] (!%p351_p3)  ;;  %vm585_vm0 = vcmask (!%p351_p3), 1041408   ;;  %v542_v26 = vlaneseq (!%p351_p3) }
   0x9   : > { %s3613_s30 = smov (%p32_p4, %s3611_s30), 0  ;;  %354 = sbr.rel (%p351_p3) target bundleno = 490 (0x1ea), region = 44 }
   0xa   : > { %3601 = sst [smem:[#allocation2_spill]] %s3613_s30  ;;  %2798 = vset.pattern.permute.xlu1 (!%p351_p3), %v2841_v2  ;;  %2797 = vset.pattern.permute.xlu0 (!%p351_p3), %v2841_v2  ;;  %v560_v7 = vld [vmem:[%s3595_s3] sm:$0x3] (!%p351_p3)  ;;  %v587_v10 = vsel (!%p351_p3), %vm585_vm0, %v2454_v6, 0  ;;  %vm2843_vm1 = vmmov (!%p351_p3), 0   ;;  %s466_s12 = sadd.s32 (!%p351_p3), 1, %s2823_s24 }
   0xb   : > { %2592 = vmatprep.subr.bf16.mxu0 (!%p351_p3), %v2842_v5  ;;  %2598 = vmatprep.subr.bf16.mxu1 (!%p351_p3), %v2842_v5  ;;  %v634_v11 = vsel (!%p351_p3), %vm585_vm0, %v560_v7, 0  ;;  %s2408_s13 = sadd.s32 (!%p351_p3), 4294967295, %s2823_s24  ;;  %p467_p5 = scmp.gt.s32.totalorder (!%p351_p3), %s466_s12, 0  ;;  %v3004_v33 = vshrl.u32 (!%p351_p3), %v542_v26, 7  ;;  %vm581_vm5 = vcmask (!%p351_p3), 31744  }
   0xc   : > { %2593 = vmatpush3.bf16.msra.mxu0 (!%p351_p3), %v587_v10  ;;  %2599 = vmatpush3.bf16.msra.mxu1 (!%p351_p3), %v634_v11  ;;  %p431_p6 = scmp.gt.s32.totalorder (!%p351_p3), %s2408_s13, 0  ;;  %p2425_p7 = scmp.lt.s32.totalorder (!%p351_p3), %s466_s12, 3  ;;  %v2457_v49 = vld [vmem:[%s3595_s3 + $0x4] sm:$0x3] (!%p351_p3)  ;;  %v2459_v50 = vld [vmem:[%s3595_s3 + $0x6] sm:$0x3] (!%p351_p3) }
   0xd   : > { %2604 = vmatprep.subr.bf16.mxu0 (!%p351_p3), %v2842_v5  ;;  %2610 = vmatprep.subr.bf16.mxu1 (!%p351_p3), %v2842_v5  ;;  %p2409_p8 = scmp.lt.s32.totalorder (!%p351_p3), %s2408_s13, 3  ;;  %p435_p9 = scmp.lt.s32.totalorder (!%p351_p3), %s2827_s25, 1  ;;  %vm563_vm2 = vcmp.lt.s32.totalorder (!%p351_p3), %v3004_v33, 4  ;;  %vm544_vm3 = vcmp.lt.s32.totalorder (!%p351_p3), %v3004_v33, 5  ;;  %vm679_vm4 = vcmp.lt.s32.totalorder (!%p351_p3), %v3004_v33, 3  ;;  %vm748_vm6 = vcmp.lt.s32.totalorder (!%p351_p3), %v3004_v33, 1 }
   0xe   : > { %v2438_v0 = vld [vmem:[%s3602_s5 + $0x10] sm:$0xff] (!%p351_p3)  ;;  %v503_v1 = vld [vmem:[%s3602_s5] sm:$0xff] (!%p351_p3)  ;;  %v2439_v3 = vld [vmem:[%s3602_s5 + $0x18] sm:$0xff] (!%p351_p3)  ;;  %2594 = vmatprep.mubr.msk.bf16.mxu0 (!%p351_p3), %vm2843_vm1, %v2842_v5  ;;  %2600 = vmatprep.mubr.msk.bf16.mxu1 (!%p351_p3), %vm2843_vm1, %v2842_v5  ;;  %p1645_p12 = scmp.ge.s32.totalorder (!%p351_p3), %s466_s12, 0  ;;  %p1646_p13 = scmp.le.s32.totalorder (!%p351_p3), %s466_s12, 3  ;;  %v701_v61 = vsel (!%p351_p3), %vm585_vm0, %v2457_v49, 0 }
   0xf   : > { %568 = vperm.xlu0 (!%p351_p3), %2797, %v2438_v0   ;;  %549 = vperm.xlu1 (!%p351_p3), %2798, %v503_v1   ;;  %v504_v4 = vld [vmem:[%s3602_s5 + $0x8] sm:$0xff] (!%p351_p3)  ;;  %v2440_v8 = vld [vmem:[%s3602_s5 + $0x20] sm:$0xff] (!%p351_p3)  ;;  %v2442_v12 = vld [vmem:[%s3602_s5 + $0x30] sm:$0xff] (!%p351_p3)  ;;  %p531_p0 = scmp.ge.s32.totalorder (!%p351_p3), %s2408_s13, 0  ;;  %p532_p1 = scmp.le.s32.totalorder (!%p351_p3), %s2408_s13, 3  ;;  %v770_v62 = vsel (!%p351_p3), %vm585_vm0, %v2459_v50, 0 }
  0x10   : > { %v2441_v9 = vld [vmem:[%s3602_s5 + $0x28] sm:$0xff]  ;;  %v2443_v13 = vld [vmem:[%s3602_s5 + $0x38] sm:$0xff]  ;;  %v2444_v14 = vld [vmem:[%s3602_s5 + $0x50] sm:$0xff]  ;;  %s468_s14 = scalar_select %p467_p5, %s466_s12, 0  ;;  %vm869_vm7 = vcmp.lt.s32.totalorder %v3004_v33, 7 }
  0x11   : > { %v2445_v15 = vld [vmem:[%s3602_s5 + $0x58] sm:$0xff]  ;;  %v2446_v16 = vld [vmem:[%s3602_s5 + $0x60] sm:$0xff]  ;;  %v2447_v17 = vld [vmem:[%s3602_s5 + $0x68] sm:$0xff]  ;;  %s432_s15 = scalar_select %p431_p6, %s2408_s13, 0 }
  0x12   : > { %v2448_v18 = vld [vmem:[%s3602_s5 + $0x70] sm:$0xff]  ;;  %v2449_v19 = vld [vmem:[%s3602_s5 + $0x78] sm:$0xff]  ;;  %v2450_v20 = vld [vmem:[%s3602_s5 + $0x80] sm:$0xff]  ;;  %s3615_s14 = smov (!%p2425_p7, %s468_s14), 3  ;;  %s3619_s25 = smov (!%p435_p9, %s2827_s25), 1 }
  0x13   : > { %573 = vperm.xlu0 %2797, %v2439_v3   ;;  %554 = vperm.xlu1 %2798, %v504_v4   ;;  %v2451_v21 = vld [vmem:[%s3602_s5 + $0x88] sm:$0xff]  ;;  %s3617_s15 = smov (!%p2409_p8, %s432_s15), 3  ;;  %p473_p10 = scmp.lt.s32.totalorder %s3615_s14, 3 }
  0x14   : > { %p437_p11 = scmp.lt.s32.totalorder %s3617_s15, 3  ;;  %s2989_s16 = sshll.u32 %s3619_s25, 3 }
  0x15   : > { %s3621_s14 = smov (!%p473_p10, %s3615_s14), 3  ;;  %p1647_p2 = pnand %p1646_p13, %p1645_p12 }
  0x16   : > { %s3623_s15 = smov (!%p437_p11, %s3617_s15), 3  ;;  %s2430_s17 = sshll.u32 %s3621_s14, 1 }
  0x17   : > { %684 = vperm.xlu0 %2797, %v2440_v8   ;;  %689 = vperm.xlu1 %2798, %v2441_v9   ;;  %s2414_s18 = sshll.u32 %s3623_s15, 1  ;;  %s477_s19 = sadd.s32 %s2430_s17, %s2989_s16 }
  0x18   : > { %s441_s20 = sadd.s32 %s2989_s16, %s2414_s18  ;;  %s2432_s21 = sshll.u32 %s477_s19, 2 }
  0x19   : > { %p533_p3 = pnand %p532_p1, %p531_p0  ;;  %s2416_s23 = sshll.u32 %s441_s20, 2 }
  0x1a   : > { %s2490_s22 = scalar_select %p1647_p2, 0, 1 }
  0x1b   : > { %753 = vperm.xlu0 %2797, %v2442_v12   ;;  %758 = vperm.xlu1 %2798, %v2443_v13   ;;  %s479_s10 = scalar_lea.vmem %s3594_s2, %s2432_s21  ;;  %s443_s12 = scalar_lea.vmem %s3592_s0, %s2416_s23 }
  0x1c   : > { %s2453_s11 = scalar_select %p533_p3, 0, 1  ;;  %v2535_v22 = vld [vmem:[%s479_s10] sm:$0xff]  }
  0x1d   : > { %s1650_s14 = scvt.s32.f32 %s2490_s22  ;;  %v2531_v23 = vld [vmem:[%s443_s12] sm:$0xff]   ;;  %v2536_v24 = vunpack.c.l.bf16 %v2535_v22  ;;  %v2537_v25 = vunpack.c.h.bf16 %v2535_v22  ;;  %p449_p4 = scmp.gt.s32.totalorder %s2823_s24, 0 }
  0x1e   : > { %s536_s13 = scvt.s32.f32 %s2453_s11  ;;  %v2532_v28 = vunpack.c.l.bf16 %v2531_v23  ;;  %v2533_v29 = vunpack.c.h.bf16 %v2531_v23  ;;  %p2417_p5 = scmp.lt.s32.totalorder %s2823_s24, 3 }
  0x1f   : > { %874 = vperm.xlu0 %2797, %v2444_v14   ;;  %879 = vperm.xlu1 %2798, %v2445_v15   ;;  %v1651_v27 = vstv %s1650_s14  ;;  %s450_s5 = scalar_select %p449_p4, %s2823_s24, 0 }
  0x20   : > { %v537_v30 = vstv %s536_s13  ;;  %v3000_v31 = vmul.f32 %v2536_v24, %v1651_v27  ;;  %v3002_v32 = vmul.f32 %v2537_v25, %v1651_v27  ;;  %s3629_s24 = smov (!%p2417_p5, %s2823_s24), 3 }
  0x21   : > { %v3006_v34 = vmul.f32 %v2532_v28, %v537_v30  ;;  %v3008_v35 = vmul.f32 %v2533_v29, %v537_v30  ;;  %s3625_s5 = smov (!%p2417_p5, %s450_s5), 3  ;;  %s2433_s20 = sshll.u32 %s3629_s24, 1 }
  0x22   : > { %v1712_v36 = vrot.slane %v3000_v31, 4  ;;  %v1713_v37 = vrot.slane %v3002_v32, 4  ;;  %v1654_v38 = vrot.slane %v3000_v31, 3  ;;  %v1655_v39 = vrot.slane %v3002_v32, 3  ;;  %p455_p6 = scmp.lt.s32.totalorder %s3625_s5, 3  ;;  %s491_s21 = sadd.s32 %s2433_s20, %s2989_s16 }
  0x23   : > { %938 = vperm.xlu0 %2797, %v2446_v16   ;;  %943 = vperm.xlu1 %2798, %v2447_v17   ;;  %v540_v40 = vrot.slane %v3006_v34, 3  ;;  %v541_v41 = vrot.slane %v3008_v35, 3  ;;  %v561_v42 = vrot.slane %v3006_v34, 4  ;;  %v562_v43 = vrot.slane %v3008_v35, 4  ;;  %s2435_s22 = sshll.u32 %s491_s21, 3 }
  0x24   : > { %v3024_v44 = vsel %vm563_vm2, %v1713_v37, %v1712_v36  ;;  %v3032_v45 = vsel %vm544_vm3, %v1655_v39, %v1654_v38  ;;  %v3072_v56 = vsel %vm563_vm2, %v1712_v36, %v1713_v37  ;;  %v1770_v57 = vrot.slane %v3000_v31, 5  ;;  %s3627_s5 = smov (!%p455_p6, %s3625_s5), 3  ;;  %s493_s11 = scalar_lea.vmem %s3598_s6, %s2435_s22 }
  0x25   : > { %v3041_v48 = vsel %vm544_vm3, %v541_v41, %v540_v40  ;;  %v3052_v51 = vsel %vm563_vm2, %v562_v43, %v561_v42  ;;  %v3060_v53 = vsel %vm563_vm2, %v561_v42, %v562_v43  ;;  %v3064_v54 = vsel %vm544_vm3, %v540_v40, %v541_v41  ;;  %s2422_s19 = sshll.u32 %s3627_s5, 1  ;;  %v2461_v41 = vld [vmem:[%s3595_s3 + $0x8] sm:$0x3] }
  0x26   : > { %v1771_v58 = vrot.slane %v3002_v32, 5  ;;  %v3080_v60 = vsel %vm544_vm3, %v1654_v38, %v1655_v39  ;;  %v677_v1 = vrot.slane %v3006_v34, 5  ;;  %v678_v2 = vrot.slane %v3008_v35, 5  ;;  %s459_s8 = sadd.s32 %s2422_s19, %s2989_s16  ;;  %s2436_s16 = sshll.u32 %s3619_s25, 2 }
  0x27   : > { %1002 = vperm.xlu0 %2797, %v2448_v18   ;;  %1007 = vperm.xlu1 %2798, %v2449_v19   ;;  %v746_v3 = vrot.slane %v3006_v34, 7  ;;  %v747_v4 = vrot.slane %v3008_v35, 7  ;;  %v1828_v11 = vrot.slane %v3000_v31, 7  ;;  %v1829_v12 = vrot.slane %v3002_v32, 7  ;;  %s2424_s9 = sshll.u32 %s459_s8, 2  ;;  %s499_s12 = sadd.s32 %s2436_s16, %s3629_s24 }
  0x28   : > { %v3111_v13 = vsel %vm679_vm4, %v1770_v57, %v1771_v58  ;;  %v3117_v17 = vsel %vm679_vm4, %v1771_v58, %v1770_v57  ;;  %v3136_v22 = vsel %vm679_vm4, %v677_v1, %v678_v2  ;;  %v1938_v25 = vrot.slane %v3000_v31, 1  ;;  %v2463_v58 = vld [vmem:[%s3595_s3 + $0xa] sm:$0x3]  ;;  %s461_s13 = scalar_lea.vmem %s3593_s1, %s2424_s9  ;;  %s2437_s14 = sshll.u32 %s499_s12, 1 }
  0x29   : > { %v750_v23 = vsel %vm748_vm6, %v747_v4, %v746_v3  ;;  %v749_v24 = vsel %vm748_vm6, %v746_v3, %v747_v4  ;;  %v1831_v26 = vsel %vm748_vm6, %v1829_v12, %v1828_v11  ;;  %v1939_v27 = vrot.slane %v3002_v32, 1  ;;  %s501_s30 = scalar_lea.vmem %s3599_s7, %s2437_s14 }
  0x2a   : > { %v1830_v37 = vsel %vm748_vm6, %v1828_v11, %v1829_v12  ;;  %v867_v40 = vrot.slane %v3006_v34, 1  ;;  %v868_v57 = vrot.slane %v3008_v35, 1  ;;  %v822_v3 = vsel %vm585_vm0, %v2461_v41, 0 }
  0x2b   : > { %1066 = vperm.xlu0 %2797, %v2450_v20   ;;  %1071 = vperm.xlu1 %2798, %v2451_v21   ;;  %v3130_v20 = vsel %vm679_vm4, %v678_v2, %v677_v1  ;;  %v1941_v2 = vsel %vm869_vm7, %v1939_v27, %v1938_v25 }
  0x2c   : > { %v870_v11 = vsel %vm869_vm7, %v867_v40, %v868_v57 }
  0x8e   : > { %v3035_v46 = vpop.permute.xlu0 %568  ;;  %v3037_v47 = vpop.permute.xlu1 %549 }
  0x8f   : > { %v3056_v52 = vmul.f32 %v3024_v44, %v3035_v46  ;;  %v3068_v55 = vmul.f32 %v3032_v45, %v3037_v47  ;;  %v557_v59 = vmul.f32 %v3037_v47, %v3041_v48  ;;  %v576_v6 = vmul.f32 %v3035_v46, %v3052_v51 }
  0x92   : > { %v3085_v63 = vpop.permute.xlu0 %573  ;;  %v3087_v0 = vpop.permute.xlu1 %554 }
  0x93   : > { %v577_v7 = vmul.f32 %v3085_v63, %v3060_v53  ;;  %v3099_v8 = vmul.f32 %v3072_v56, %v3085_v63  ;;  %v558_v9 = vmul.f32 %v3087_v0, %v3064_v54  ;;  %v3105_v10 = vmul.f32 %v3080_v60, %v3087_v0 }
  0x95   : > { %v578_v14 = vpack.c.bf16 %v577_v7, %v576_v6  ;;  %v1718_v15 = vpack.c.bf16 %v3099_v8, %v3056_v52  ;;  %v559_v16 = vpack.c.bf16 %v558_v9, %v557_v59  ;;  %v1660_v18 = vpack.c.bf16 %v3105_v10, %v3068_v55  ;;  %v2499_v55 = vld [vmem:[%s3595_s3 + $0x2c] sm:$0x3]  ;;  %v2501_v52 = vld [vmem:[%s3595_s3 + $0x2e] sm:$0x3] }
  0x96   : > { %v3126_v19 = vpop.permute.xlu0 %684  ;;  %v3132_v21 = vpop.permute.xlu1 %689  ;;  %v891_v9 = vsel %vm585_vm0, %v2463_v58, 0  ;;  %v1893_v8 = vsel %vm585_vm0, %v2499_v55, 0  ;;  %v1951_v10 = vsel %vm585_vm0, %v2501_v52, 0 }
  0x97   : > { %2595 = vmatmul.mubr.msk.bf16.vlgmr.msra.gmra.mrb[0].mxu0 %vm581_vm5, %v578_v14  ;;  %2601 = vmatmul.mubr.msk.bf16.vlgmr.msra.gmra.mrb[0].mxu1 %vm581_vm5, %v559_v16  ;;  %v3150_v28 = vmul.f32 %v3111_v13, %v3132_v21  ;;  %v3154_v29 = vmul.f32 %v3117_v17, %v3126_v19  ;;  %v692_v30 = vmul.f32 %v3126_v19, %v3130_v20 }
  0x98   : > { %2605 = vmatpush3.bf16.msra.mxu0 %v701_v61  ;;  %2611 = vmatpush3.bf16.msra.mxu1 %v770_v62  ;;  %v693_v36 = vmul.f32 %v3132_v21, %v3136_v22  ;;  %v1940_v61 = vsel %vm869_vm7, %v1938_v25, %v1939_v27  ;;  %v871_v14 = vsel %vm869_vm7, %v868_v57, %v867_v40  ;;  %v2467_v40 = vld [vmem:[%s3595_s3 + $0xe] sm:$0x3] }
  0x99   : > { %2606 = vmatprep.mubr.msk.bf16.mxu0 %vm2843_vm1, %v2842_v5  ;;  %2612 = vmatprep.mubr.msk.bf16.mxu1 %vm2843_vm1, %v2842_v5  ;;  %v1776_v42 = vpack.c.bf16 %v3150_v28, %v3154_v29  ;;  %v2505_v28 = vld [vmem:[%s3595_s3 + $0x32] sm:$0x3] }
  0x9a   : > { %v3168_v38 = vpop.permute.xlu0 %753  ;;  %v3170_v39 = vpop.permute.xlu1 %758  ;;  %2616 = vmatprep.subr.bf16.mxu0 %v2842_v5  ;;  %2622 = vmatprep.subr.bf16.mxu1 %v2842_v5  ;;  %v694_v62 = vpack.c.bf16 %v693_v36, %v692_v30  ;;  %v2465_v30 = vld [vmem:[%s3595_s3 + $0xc] sm:$0x3] }
  0x9b   : > { %v761_v43 = vmul.f32 %v3168_v38, %v750_v23  ;;  %v3182_v49 = vmul.f32 %v1831_v26, %v3168_v38  ;;  %v762_v50 = vmul.f32 %v3170_v39, %v749_v24  ;;  %v3190_v59 = vmul.f32 %v1830_v37, %v3170_v39 }
  0x9c   : > { %v815_v37 = vpack.c.bf16 %v3008_v35, %v3006_v34  ;;  %v1019_v35 = vsel %vm585_vm0, %v2467_v40, 0 }
  0x9d   : > { %v763_v1 = vpack.c.bf16 %v762_v50, %v761_v43  ;;  %v1834_v4 = vpack.c.bf16 %v3190_v59, %v3182_v49  ;;  %v955_v43 = vsel %vm585_vm0, %v2465_v30, 0  ;;  %v3251_v50 = vld [vmem:[%s461_s13] sm:$0xff]  }
  0x9e   : > { %v3200_v6 = vpop.permute.xlu0 %874  ;;  %v3202_v7 = vpop.permute.xlu1 %879 }
  0x9f   : > { %v3208_v12 = vmul.f32 %v1940_v61, %v3200_v6  ;;  %2607 = vmatmul.mubr.msk.bf16.vlgmr.msra.gmra.mrb[4].mxu0 %vm581_vm5, %v694_v62  ;;  %v3214_v16 = vmul.f32 %v1941_v2, %v3202_v7  ;;  %2613 = vmatmul.mubr.msk.bf16.vlgmr.msra.gmra.mrb[4].mxu1 %vm581_vm5, %v763_v1  ;;  %v882_v23 = vmul.f32 %v3200_v6, %v870_v11  ;;  %v3271_v62 = vunpack.c.l.bf16 %v3251_v50 }
  0xa0   : > { %2617 = vmatpush3.bf16.msra.mxu0 %v822_v3  ;;  %2623 = vmatpush3.bf16.msra.mxu1 %v891_v9  ;;  %v883_v24 = vmul.f32 %v3202_v7, %v871_v14  ;;  %v3274_v1 = vunpack.c.h.bf16 %v3251_v50 }
  0xa1   : > { %2618 = vmatprep.mubr.msk.bf16.mxu0 %vm2843_vm1, %v2842_v5  ;;  %v1944_v25 = vpack.c.bf16 %v3214_v16, %v3208_v12  ;;  %2624 = vmatprep.mubr.msk.bf16.mxu1 %vm2843_vm1, %v2842_v5 }
  0xa2   : > { %v3223_v26 = vpop.permute.xlu0 %938  ;;  %v3225_v27 = vpop.permute.xlu1 %943  ;;  %2628 = vmatprep.subr.bf16.mxu0 %v2842_v5  ;;  %2634 = vmatprep.subr.bf16.mxu1 %v2842_v5  ;;  %v884_v57 = vpack.c.bf16 %v883_v24, %v882_v23  ;;  %v2471_v23 = vld [vmem:[%s3595_s3 + $0x12] sm:$0x3] }
  0xa3   : > { %v3238_v36 = vmul.f32 %v3080_v60, %v3223_v26  ;;  %v3248_v41 = vmul.f32 %v3032_v45, %v3225_v27  ;;  %v946_v2 = vmul.f32 %v3223_v26, %v3064_v54 }
  0xa5   : > { %v1998_v60 = vpack.c.bf16 %v3248_v41, %v3238_v36 }
  0xa6   : > { %v3255_v58 = vpop.permute.xlu0 %1002  ;;  %v3257_v34 = vpop.permute.xlu1 %1007 }
  0xa7   : > { %v3262_v61 = vmul.f32 %v3072_v56, %v3255_v58  ;;  %2619 = vmatmul.mubr.msk.bf16.vlgmr.msra.gmra.mrb[8].mxu0 %vm581_vm5, %v815_v37  ;;  %v3267_v45 = vmul.f32 %v3024_v44, %v3257_v34  ;;  %2625 = vmatmul.mubr.msk.bf16.vlgmr.msra.gmra.mrb[8].mxu1 %vm581_vm5, %v884_v57  ;;  %v947_v56 = vmul.f32 %v3225_v27, %v3041_v48  ;;  %v2469_v48 = vld [vmem:[%s3595_s3 + $0x10] sm:$0x3] }
  0xa8   : > { %2629 = vmatpush3.bf16.msra.mxu0 %v955_v43  ;;  %2635 = vmatpush3.bf16.msra.mxu1 %v1019_v35  ;;  %v1010_v44 = vmul.f32 %v3255_v58, %v3060_v53  ;;  %v1011_v3 = vmul.f32 %v3257_v34, %v3052_v51  ;;  %v1132_v53 = vrot.slane %v3271_v62, 3  ;;  %v1133_v51 = vrot.slane %v3274_v1, 3 }
  0xa9   : > { %2630 = vmatprep.mubr.msk.bf16.mxu0 %vm2843_vm1, %v2842_v5  ;;  %v2052_v9 = vpack.c.bf16 %v3267_v45, %v3262_v61  ;;  %2636 = vmatprep.mubr.msk.bf16.mxu1 %vm2843_vm1, %v2842_v5  ;;  %v948_v30 = vpack.c.bf16 %v947_v56, %v946_v2  ;;  %v1083_v37 = vsel %vm585_vm0, %v2469_v48, 0  ;;  %v1191_v48 = vrot.slane %v3274_v1, 4 }
  0xaa   : > { %v3288_v11 = vpop.permute.xlu0 %1066  ;;  %v3290_v14 = vpop.permute.xlu1 %1071  ;;  %2640 = vmatprep.subr.bf16.mxu0 %v2842_v5  ;;  %2646 = vmatprep.subr.bf16.mxu1 %v2842_v5  ;;  %v1012_v40 = vpack.c.bf16 %v1011_v3, %v1010_v44  ;;  %v3318_v57 = vsel %vm544_vm3, %v1133_v51, %v1132_v53  ;;  %v3322_v35 = vsel %vm544_vm3, %v1132_v53, %v1133_v51  ;;  %v1249_v3 = vrot.slane %v3274_v1, 5 }
  0xab   : > { %v3302_v54 = vmul.f32 %v3111_v13, %v3288_v11  ;;  %v3310_v24 = vmul.f32 %v3117_v17, %v3290_v14  ;;  %v1145_v13 = vsel %vm585_vm0, %v2471_v23, 0  ;;  %v1074_v17 = vmul.f32 %v3288_v11, %v3136_v22  ;;  %v2473_v22 = vld [vmem:[%s3595_s3 + $0x14] sm:$0x3] }
  0xac   : > { %v1075_v2 = vmul.f32 %v3290_v14, %v3130_v20  ;;  %v1136_v56 = vmul.f32 %v3318_v57, %v3037_v47  ;;  %v1137_v44 = vmul.f32 %v3322_v35, %v3087_v0  ;;  %v1248_v20 = vrot.slane %v3271_v62, 5  ;;  %v2475_v47 = vld [vmem:[%s3595_s3 + $0x16] sm:$0x3] }
  0xad   : > { %v2106_v43 = vpack.c.bf16 %v3310_v24, %v3302_v54  ;;  %v1190_v0 = vrot.slane %v3271_v62, 4  ;;  %v1203_v51 = vsel %vm585_vm0, %v2473_v22, 0  ;;  %v1478_v33 = vmul.f32 %v3322_v35, %v3223_v26 }
  0xae   : > { %v1076_v53 = vpack.c.bf16 %v1075_v2, %v1074_v17 }
  0xaf   : > { %2631 = vmatmul.mubr.msk.bf16.vlgmr.msra.gmra.mrb[12].mxu0 %vm581_vm5, %v948_v30  ;;  %2637 = vmatmul.mubr.msk.bf16.vlgmr.msra.gmra.mrb[12].mxu1 %vm581_vm5, %v1012_v40  ;;  %v3353_v23 = vsel %vm563_vm2, %v1190_v0, %v1191_v48  ;;  %v1138_v30 = vpack.c.bf16 %v1137_v44, %v1136_v56  ;;  %v3358_v40 = vsel %vm679_vm4, %v1248_v20, %v1249_v3  ;;  %v1306_v56 = vrot.slane %v3271_v62, 7 }
  0xb0   : > { %2641 = vmatpush3.bf16.msra.mxu0 %v1083_v37  ;;  %2647 = vmatpush3.bf16.msra.mxu1 %v1145_v13  ;;  %v1261_v37 = vsel %vm585_vm0, %v2475_v47, 0  ;;  %v3362_v13 = vsel %vm679_vm4, %v1249_v3, %v1248_v20  ;;  %v3367_v17 = vsel %vm563_vm2, %v1191_v48, %v1190_v0  ;;  %v1195_v2 = vmul.f32 %v3353_v23, %v3085_v63  ;;  %v2477_v63 = vld [vmem:[%s3595_s3 + $0x18] sm:$0x3] }
  0xb1   : > { %2642 = vmatprep.mubr.msk.bf16.mxu0 %vm2843_vm1, %v2842_v5  ;;  %2648 = vmatprep.mubr.msk.bf16.mxu1 %vm2843_vm1, %v2842_v5  ;;  %v1307_v44 = vrot.slane %v3274_v1, 7  ;;  %v1253_v22 = vmul.f32 %v3358_v40, %v3132_v21  ;;  %v1252_v20 = vmul.f32 %v3362_v13, %v3126_v19  ;;  %v1194_v3 = vmul.f32 %v3367_v17, %v3035_v46  ;;  %v2479_v21 = vld [vmem:[%s3595_s3 + $0x1a] sm:$0x3] }
  0xb2   : > { %2652 = vmatprep.subr.bf16.mxu0 %v2842_v5  ;;  %2658 = vmatprep.subr.bf16.mxu1 %v2842_v5  ;;  %v1319_v19 = vsel %vm585_vm0, %v2477_v63, 0 }
  0xb3   : > { %v1196_v47 = vpack.c.bf16 %v1195_v2, %v1194_v3  ;;  %v1309_v0 = vsel %vm748_vm6, %v1307_v44, %v1306_v56  ;;  %v1308_v48 = vsel %vm748_vm6, %v1306_v56, %v1307_v44  ;;  %v1421_v2 = vrot.slane %v3274_v1, 1  ;;  %v2482_v56 = vld [vmem:[%s3595_s3 + $0x1c] sm:$0x3] }
  0xb4   : > { %v1310_v46 = vmul.f32 %v1309_v0, %v3168_v38  ;;  %v2484_v38 = vld [vmem:[%s3595_s3 + $0x1e] sm:$0x3]  ;;  %v1479_v3 = vmul.f32 %v3318_v57, %v3225_v27  ;;  %v1532_v57 = vmul.f32 %v3353_v23, %v3255_v58  ;;  %v2491_v58 = vld [vmem:[%s3595_s3 + $0x24] sm:$0x3] }
  0xb6   : > { %v1480_v35 = vpack.c.bf16 %v1479_v3, %v1478_v33 }
  0xb7   : > { %2643 = vmatmul.mubr.msk.bf16.vlgmr.msra.gmra.mrb[16].mxu0 %vm581_vm5, %v1076_v53  ;;  %2649 = vmatmul.mubr.msk.bf16.vlgmr.msra.gmra.mrb[16].mxu1 %vm581_vm5, %v1138_v30  ;;  %v1254_v53 = vpack.c.bf16 %v1253_v22, %v1252_v20  ;;  %v1311_v30 = vmul.f32 %v1308_v48, %v3170_v39  ;;  %v1487_v22 = vsel %vm585_vm0, %v2484_v38, 0 }
  0xb8   : > { %2653 = vmatpush3.bf16.msra.mxu0 %v1203_v51  ;;  %2659 = vmatpush3.bf16.msra.mxu1 %v1261_v37  ;;  %v1375_v51 = vsel %vm585_vm0, %v2479_v21, 0  ;;  %v1420_v37 = vrot.slane %v3271_v62, 1  ;;  %v1433_v62 = vsel %vm585_vm0, %v2482_v56, 0  ;;  %v1533_v21 = vmul.f32 %v3367_v17, %v3257_v34  ;;  %v2493_v34 = vld [vmem:[%s3595_s3 + $0x26] sm:$0x3] }
  0xb9   : > { %2654 = vmatprep.mubr.msk.bf16.mxu0 %vm2843_vm1, %v2842_v5  ;;  %2660 = vmatprep.mubr.msk.bf16.mxu1 %vm2843_vm1, %v2842_v5  ;;  %v1312_v39 = vpack.c.bf16 %v1311_v30, %v1310_v46  ;;  %v2497_v17 = vld [vmem:[%s3595_s3 + $0x2a] sm:$0x3] }
  0xba   : > { %2664 = vmatprep.subr.bf16.mxu0 %v2842_v5  ;;  %2670 = vmatprep.subr.bf16.mxu1 %v2842_v5  ;;  %v1422_v1 = vsel %vm869_vm7, %v1420_v37, %v1421_v2  ;;  %v1423_v44 = vsel %vm869_vm7, %v1421_v2, %v1420_v37  ;;  %v1534_v23 = vpack.c.bf16 %v1533_v21, %v1532_v57  ;;  %v1841_v48 = vsel %vm585_vm0, %v2497_v17, 0 }
  0xbb   : > { %v1424_v20 = vmul.f32 %v1422_v1, %v3200_v6  ;;  %v1425_v63 = vmul.f32 %v1423_v44, %v3202_v7  ;;  %v2486_v6 = vld [vmem:[%s3595_s3 + $0x20] sm:$0x3]  ;;  %v2488_v7 = vld [vmem:[%s3595_s3 + $0x22] sm:$0x3] }
  0xbc   : > { %v1541_v26 = vsel %vm585_vm0, %v2486_v6, 0  ;;  %v1595_v27 = vsel %vm585_vm0, %v2488_v7, 0 }
  0xbf   : > { %2655 = vmatmul.mubr.msk.bf16.vlgmr.msra.gmra.mrb[20].mxu0 %vm581_vm5, %v1196_v47  ;;  %2661 = vmatmul.mubr.msk.bf16.vlgmr.msra.gmra.mrb[20].mxu1 %vm581_vm5, %v1254_v53  ;;  %v1586_v47 = vmul.f32 %v3358_v40, %v3288_v11  ;;  %v1667_v11 = vsel %vm585_vm0, %v2491_v58, 0 }
  0xc0   : > { %2665 = vmatpush3.bf16.msra.mxu0 %v1319_v19  ;;  %2671 = vmatpush3.bf16.msra.mxu1 %v1375_v51  ;;  %v1587_v19 = vmul.f32 %v3362_v13, %v3290_v14  ;;  %v1725_v14 = vsel %vm585_vm0, %v2493_v34, 0  ;;  %v2495_v13 = vld [vmem:[%s3595_s3 + $0x28] sm:$0x3] }
  0xc1   : > { %2666 = vmatprep.mubr.msk.bf16.mxu0 %vm2843_vm1, %v2842_v5  ;;  %2672 = vmatprep.mubr.msk.bf16.mxu1 %vm2843_vm1, %v2842_v5  ;;  %v1783_v0 = vsel %vm585_vm0, %v2495_v13, 0 }
  0xc2   : > { %2676 = vmatprep.subr.bf16.mxu0 %v2842_v5  ;;  %2682 = vmatprep.subr.bf16.mxu1 %v2842_v5  ;;  %v1588_v40 = vpack.c.bf16 %v1587_v19, %v1586_v47 }
  0xc7   : > { %2667 = vmatmul.mubr.msk.bf16.vlgmr.msra.gmra.mrb[24].mxu0 %vm581_vm5, %v1312_v39  ;;  %2673 = vmatmul.mubr.msk.bf16.vlgmr.msra.gmra.mrb[24].mxu1 %vm581_vm5, %v3251_v50  ;;  %v1426_v50 = vpack.c.bf16 %v1425_v63, %v1424_v20 }
  0xc8   : > { %2677 = vmatpush3.bf16.msra.mxu0 %v1433_v62  ;;  %2683 = vmatpush3.bf16.msra.mxu1 %v1487_v22 }
  0xc9   : > { %2678 = vmatprep.mubr.msk.bf16.mxu0 %vm2843_vm1, %v2842_v5  ;;  %2684 = vmatprep.mubr.msk.bf16.mxu1 %vm2843_vm1, %v2842_v5 }
  0xca   : > { %2688 = vmatprep.subr.bf16.mxu0 %v2842_v5  ;;  %2694 = vmatprep.subr.bf16.mxu1 %v2842_v5 }
  0xcf   : > { %2679 = vmatmul.mubr.msk.bf16.vlgmr.msra.gmra.mrb[28].mxu0 %vm581_vm5, %v1426_v50  ;;  %2685 = vmatmul.mubr.msk.bf16.vlgmr.msra.gmra.mrb[28].mxu1 %vm581_vm5, %v1480_v35 }
  0xd0   : > { %2689 = vmatpush3.bf16.msra.mxu0 %v1541_v26  ;;  %2695 = vmatpush3.bf16.msra.mxu1 %v1595_v27 }
  0xd1   : > { %2690 = vmatprep.mubr.msk.bf16.mxu0 %vm2843_vm1, %v2842_v5  ;;  %2696 = vmatprep.mubr.msk.bf16.mxu1 %vm2843_vm1, %v2842_v5 }
  0xd2   : > { %2700 = vmatprep.subr.bf16.mxu0 %v2842_v5  ;;  %2706 = vmatprep.subr.bf16.mxu1 %v2842_v5 }
  0xd7   : > { %2691 = vmatmul.mubr.msk.bf16.vlgmr.msra.gmra.mrb[32].mxu0 %vm581_vm5, %v1534_v23  ;;  %2697 = vmatmul.mubr.msk.bf16.vlgmr.msra.gmra.mrb[32].mxu1 %vm581_vm5, %v1588_v40 }
  0xd8   : > { %2701 = vmatpush3.bf16.msra.mxu0 %v1667_v11  ;;  %2707 = vmatpush3.bf16.msra.mxu1 %v1725_v14 }
  0xd9   : > { %2702 = vmatprep.mubr.msk.bf16.mxu0 %vm2843_vm1, %v2842_v5  ;;  %2708 = vmatprep.mubr.msk.bf16.mxu1 %vm2843_vm1, %v2842_v5 }
  0xda   : > { %2712 = vmatprep.subr.bf16.mxu0 %v2842_v5  ;;  %2718 = vmatprep.subr.bf16.mxu1 %v2842_v5 }
  0xdf   : > { %2703 = vmatmul.mubr.msk.bf16.vlgmr.msra.gmra.mrb[36].mxu0 %vm581_vm5, %v1660_v18  ;;  %2709 = vmatmul.mubr.msk.bf16.vlgmr.msra.gmra.mrb[36].mxu1 %vm581_vm5, %v1718_v15  ;;  %v2503_v15 = vld [vmem:[%s3595_s3 + $0x30] sm:$0x3]  ;;  %v1886_v18 = vpack.c.bf16 %v3002_v32, %v3000_v31  ;;  %v2507_v31 = vld [vmem:[%s3595_s3 + $0x34] sm:$0x3] }
  0xe0   : > { %2713 = vmatpush3.bf16.msra.mxu0 %v1783_v0  ;;  %2719 = vmatpush3.bf16.msra.mxu1 %v1841_v48  ;;  %v2005_v29 = vsel %vm585_vm0, %v2503_v15, 0  ;;  %v2113_v32 = vsel %vm585_vm0, %v2507_v31, 0 }
  0xe1   : > { %2714 = vmatprep.mubr.msk.bf16.mxu0 %vm2843_vm1, %v2842_v5  ;;  %2720 = vmatprep.mubr.msk.bf16.mxu1 %vm2843_vm1, %v2842_v5 }
  0xe2   : > { %2724 = vmatprep.subr.bf16.mxu0 %v2842_v5  ;;  %2730 = vmatprep.subr.bf16.mxu1 %v2842_v5 }
  0xe7   : > { %2715 = vmatmul.mubr.msk.bf16.vlgmr.msra.gmra.mrb[40].mxu0 %vm581_vm5, %v1776_v42  ;;  %2721 = vmatmul.mubr.msk.bf16.vlgmr.msra.gmra.mrb[40].mxu1 %vm581_vm5, %v1834_v4  ;;  %v2059_v42 = vsel %vm585_vm0, %v2505_v28, 0 }
  0xe8   : > { %2725 = vmatpush3.bf16.msra.mxu0 %v1893_v8  ;;  %2731 = vmatpush3.bf16.msra.mxu1 %v1951_v10 }
  0xe9   : > { %2726 = vmatprep.mubr.msk.bf16.mxu0 %vm2843_vm1, %v2842_v5  ;;  %2732 = vmatprep.mubr.msk.bf16.mxu1 %vm2843_vm1, %v2842_v5 }
  0xea   : > { %2736 = vmatprep.subr.bf16.mxu0 %v2842_v5  ;;  %2742 = vmatprep.subr.bf16.mxu1 %v2842_v5 }
  0xef   : > { %2727 = vmatmul.mubr.msk.bf16.vlgmr.msra.gmra.mrb[44].mxu0 %vm581_vm5, %v1886_v18  ;;  %2733 = vmatmul.mubr.msk.bf16.vlgmr.msra.gmra.mrb[44].mxu1 %vm581_vm5, %v1944_v25 }
  0xf0   : > { %2737 = vmatpush3.bf16.msra.mxu0 %v2005_v29  ;;  %2743 = vmatpush3.bf16.msra.mxu1 %v2059_v42 }
  0xf1   : > { %2738 = vmatprep.mubr.msk.bf16.mxu0 %vm2843_vm1, %v2842_v5  ;;  %2744 = vmatprep.mubr.msk.bf16.mxu1 %vm2843_vm1, %v2842_v5 }
  0xf2   : > { %2748 = vmatprep.subr.bf16.mxu0 %v2842_v5 }
  0xf7   : > { %2739 = vmatmul.mubr.msk.bf16.vlgmr.msra.gmra.mrb[48].mxu0 %vm581_vm5, %v1998_v60  ;;  %2745 = vmatmul.mubr.msk.bf16.vlgmr.msra.gmra.mrb[48].mxu1 %vm581_vm5, %v2052_v9 }
  0xf8   : > { %2749 = vmatpush3.bf16.msra.mxu0 %v2113_v32  ;;  %2750 = vmatprep.mubr.msk.bf16.mxu0 %vm2843_vm1, %v2842_v5 }
  0xff   : > { %2751 = vmatmul.mubr.msk.bf16.vlgmr.msra.gmra.mrb[52].mxu0 %vm581_vm5, %v2106_v43 }
 0x16a   : > { %v623_v49 = vpop.f32.mrb[0].mxu0  ;;  %v670_v59 = vpop.f32.mrb[0].mxu1 }
 0x16b   : > { %v671_v4 = vadd.f32 %v670_v59, %v623_v49  ;;  %v2596_v12 = vpop.f32.mrb[1].mxu0  ;;  %v2602_v16 = vpop.f32.mrb[1].mxu1 }
 0x16c   : > { %v626_v25 = vpop.f32.mrb[2].mxu0  ;;  %v673_v36 = vpop.f32.mrb[2].mxu1 }
 0x16d   : > { %v674_v41 = vadd.f32 %v673_v36, %v626_v25  ;;  %v2597_v60 = vpop.f32.mrb[3].mxu0  ;;  %v2603_v61 = vpop.f32.mrb[3].mxu1 }
 0x172   : > { %v737_v45 = vpop.f32.mrb[4].mxu0  ;;  %v806_v53 = vpop.f32.mrb[4].mxu1 }
 0x173   : > { %v744_v9 = vadd.f32 %v737_v45, %v671_v4  ;;  %v2608_v51 = vpop.f32.mrb[5].mxu0  ;;  %v2614_v5 = vpop.f32.mrb[5].mxu1 }
 0x174   : > { %v740_v46 = vpop.f32.mrb[6].mxu0  ;;  %v809_v24 = vpop.f32.mrb[6].mxu1 }
 0x175   : > { %v813_v30 = vadd.f32 %v806_v53, %v744_v9  ;;  %v745_v54 = vadd.f32 %v740_v46, %v674_v41  ;;  %v2609_v43 = vpop.f32.mrb[7].mxu0  ;;  %v2615_v37 = vpop.f32.mrb[7].mxu1 }
 0x177   : > { %v814_v2 = vadd.f32 %v809_v24, %v745_v54 }
 0x17a   : > { %v858_v56 = vpop.f32.mrb[8].mxu0  ;;  %v927_v39 = vpop.f32.mrb[8].mxu1 }
 0x17b   : > { %v865_v38 = vadd.f32 %v858_v56, %v813_v30  ;;  %v2620_v62 = vpop.f32.mrb[9].mxu0  ;;  %v2626_v1 = vpop.f32.mrb[9].mxu1 }
 0x17c   : > { %v861_v44 = vpop.f32.mrb[10].mxu0  ;;  %v930_v63 = vpop.f32.mrb[10].mxu1 }
 0x17d   : > { %v934_v22 = vadd.f32 %v927_v39, %v865_v38  ;;  %v866_v20 = vadd.f32 %v861_v44, %v814_v2  ;;  %v2621_v33 = vpop.f32.mrb[11].mxu0  ;;  %v2627_v3 = vpop.f32.mrb[11].mxu1 }
 0x17f   : > { %v935_v6 = vadd.f32 %v930_v63, %v866_v20 }
 0x182   : > { %v991_v7 = vpop.f32.mrb[12].mxu0  ;;  %v1055_v26 = vpop.f32.mrb[12].mxu1 }
 0x183   : > { %v998_v50 = vadd.f32 %v991_v7, %v934_v22  ;;  %v2632_v35 = vpop.f32.mrb[13].mxu0  ;;  %v2638_v27 = vpop.f32.mrb[13].mxu1 }
 0x184   : > { %v994_v57 = vpop.f32.mrb[14].mxu0  ;;  %v1058_v19 = vpop.f32.mrb[14].mxu1 }
 0x185   : > { %v1062_v21 = vadd.f32 %v1055_v26, %v998_v50  ;;  %v999_v47 = vadd.f32 %v994_v57, %v935_v6  ;;  %v2633_v58 = vpop.f32.mrb[15].mxu0  ;;  %v2639_v34 = vpop.f32.mrb[15].mxu1 }
 0x187   : > { %v1063_v23 = vadd.f32 %v1058_v19, %v999_v47 }
 0x18a   : > { %v1119_v11 = vpop.f32.mrb[16].mxu0  ;;  %v1181_v14 = vpop.f32.mrb[16].mxu1 }
 0x18b   : > { %v1126_v40 = vadd.f32 %v1119_v11, %v1062_v21  ;;  %v2644_v13 = vpop.f32.mrb[17].mxu0  ;;  %v2650_v17 = vpop.f32.mrb[17].mxu1 }
 0x18c   : > { %v1122_v0 = vpop.f32.mrb[18].mxu0  ;;  %v1184_v52 = vpop.f32.mrb[18].mxu1 }
 0x18d   : > { %v1188_v48 = vadd.f32 %v1181_v14, %v1126_v40  ;;  %v1127_v55 = vadd.f32 %v1122_v0, %v1063_v23  ;;  %v2645_v8 = vpop.f32.mrb[19].mxu0  ;;  %v2651_v10 = vpop.f32.mrb[19].mxu1 }
 0x18f   : > { %v1189_v15 = vadd.f32 %v1184_v52, %v1127_v55 }
 0x192   : > { %v1239_v18 = vpop.f32.mrb[20].mxu0  ;;  %v1297_v29 = vpop.f32.mrb[20].mxu1 }
 0x193   : > { %v1246_v28 = vadd.f32 %v1239_v18, %v1188_v48  ;;  %v2656_v42 = vpop.f32.mrb[21].mxu0  ;;  %v2662_v31 = vpop.f32.mrb[21].mxu1 }
 0x194   : > { %v1242_v32 = vpop.f32.mrb[22].mxu0  ;;  %v1300_v4 = vpop.f32.mrb[22].mxu1 }
 0x195   : > { %v1304_v49 = vadd.f32 %v1297_v29, %v1246_v28  ;;  %v1247_v59 = vadd.f32 %v1242_v32, %v1189_v15  ;;  %v2657_v12 = vpop.f32.mrb[23].mxu0  ;;  %v2663_v16 = vpop.f32.mrb[23].mxu1 }
 0x197   : > { %v1305_v25 = vadd.f32 %v1300_v4, %v1247_v59 }
 0x19a   : > { %v1355_v36 = vpop.f32.mrb[24].mxu0  ;;  %v1411_v61 = vpop.f32.mrb[24].mxu1 }
 0x19b   : > { %v1362_v41 = vadd.f32 %v1355_v36, %v1304_v49  ;;  %v2668_v60 = vpop.f32.mrb[25].mxu0  ;;  %v2674_v9 = vpop.f32.mrb[25].mxu1 }
 0x19c   : > { %v1358_v45 = vpop.f32.mrb[26].mxu0  ;;  %v1414_v46 = vpop.f32.mrb[26].mxu1 }
 0x19d   : > { %v1363_v53 = vadd.f32 %v1358_v45, %v1305_v25  ;;  %v1418_v51 = vadd.f32 %v1411_v61, %v1362_v41  ;;  %v2669_v5 = vpop.f32.mrb[27].mxu0  ;;  %v2675_v30 = vpop.f32.mrb[27].mxu1 }
 0x19f   : > { %v1419_v54 = vadd.f32 %v1414_v46, %v1363_v53 }
 0x1a2   : > { %v1469_v24 = vpop.f32.mrb[28].mxu0  ;;  %v1523_v37 = vpop.f32.mrb[28].mxu1 }
 0x1a3   : > { %v1476_v43 = vadd.f32 %v1469_v24, %v1418_v51  ;;  %v2680_v2 = vpop.f32.mrb[29].mxu0  ;;  %v2686_v56 = vpop.f32.mrb[29].mxu1 }
 0x1a4   : > { %v1472_v38 = vpop.f32.mrb[30].mxu0  ;;  %v1526_v1 = vpop.f32.mrb[30].mxu1 }
 0x1a5   : > { %v1530_v39 = vadd.f32 %v1523_v37, %v1476_v43  ;;  %v1477_v62 = vadd.f32 %v1472_v38, %v1419_v54  ;;  %v2681_v44 = vpop.f32.mrb[31].mxu0  ;;  %v2687_v22 = vpop.f32.mrb[31].mxu1 }
 0x1a6   : > { %v2509_v44 = vld [vmem:[%s3596_s4] ss:$0 sm:$0xff] }
 0x1a7   : > { %v1531_v20 = vadd.f32 %v1526_v1, %v1477_v62 }
 0x1aa   : > { %v1577_v63 = vpop.f32.mrb[32].mxu0  ;;  %v1631_v3 = vpop.f32.mrb[32].mxu1 }
 0x1ab   : > { %v1584_v33 = vadd.f32 %v1577_v63, %v1530_v39  ;;  %v2692_v6 = vpop.f32.mrb[33].mxu0  ;;  %v2698_v7 = vpop.f32.mrb[33].mxu1 }
 0x1ac   : > { %v1580_v50 = vpop.f32.mrb[34].mxu0  ;;  %v1634_v27 = vpop.f32.mrb[34].mxu1 }
 0x1ad   : > { %v1638_v26 = vadd.f32 %v1631_v3, %v1584_v33  ;;  %v1585_v35 = vadd.f32 %v1580_v50, %v1531_v20  ;;  %v2693_v57 = vpop.f32.mrb[35].mxu0  ;;  %v2699_v21 = vpop.f32.mrb[35].mxu1 }
 0x1af   : > { %v1639_v47 = vadd.f32 %v1634_v27, %v1585_v35 }
 0x1b2   : > { %v1703_v19 = vpop.f32.mrb[36].mxu0  ;;  %v1761_v34 = vpop.f32.mrb[36].mxu1 }
 0x1b3   : > { %v1710_v58 = vadd.f32 %v1703_v19, %v1638_v26  ;;  %v2704_v23 = vpop.f32.mrb[37].mxu0  ;;  %v2710_v11 = vpop.f32.mrb[37].mxu1 }
 0x1b4   : > { %v1706_v40 = vpop.f32.mrb[38].mxu0  ;;  %v1764_v17 = vpop.f32.mrb[38].mxu1 }
 0x1b5   : > { %v1768_v14 = vadd.f32 %v1761_v34, %v1710_v58  ;;  %v1711_v13 = vadd.f32 %v1706_v40, %v1639_v47  ;;  %v2705_v0 = vpop.f32.mrb[39].mxu0  ;;  %v2711_v48 = vpop.f32.mrb[39].mxu1 }
 0x1b7   : > { %v1769_v55 = vadd.f32 %v1764_v17, %v1711_v13 }
 0x1ba   : > { %v1819_v52 = vpop.f32.mrb[40].mxu0  ;;  %v1877_v10 = vpop.f32.mrb[40].mxu1 }
 0x1bb   : > { %v1826_v8 = vadd.f32 %v1819_v52, %v1768_v14  ;;  %v2716_v15 = vpop.f32.mrb[41].mxu0  ;;  %v2722_v18 = vpop.f32.mrb[41].mxu1 }
 0x1bc   : > { %v1822_v28 = vpop.f32.mrb[42].mxu0  ;;  %v1880_v31 = vpop.f32.mrb[42].mxu1 }
 0x1bd   : > { %v1884_v29 = vadd.f32 %v1877_v10, %v1826_v8  ;;  %v1827_v42 = vadd.f32 %v1822_v28, %v1769_v55  ;;  %v2717_v32 = vpop.f32.mrb[43].mxu0  ;;  %v2723_v49 = vpop.f32.mrb[43].mxu1 }
 0x1bf   : > { %v1885_v59 = vadd.f32 %v1880_v31, %v1827_v42 }
 0x1c2   : > { %v1929_v4 = vpop.f32.mrb[44].mxu0  ;;  %v1987_v16 = vpop.f32.mrb[44].mxu1 }
 0x1c3   : > { %v1936_v12 = vadd.f32 %v1929_v4, %v1884_v29  ;;  %v2728_v25 = vpop.f32.mrb[45].mxu0  ;;  %v2734_v36 = vpop.f32.mrb[45].mxu1 }
 0x1c4   : > { %v1932_v41 = vpop.f32.mrb[46].mxu0  ;;  %v1990_v45 = vpop.f32.mrb[46].mxu1 }
 0x1c5   : > { %v1994_v60 = vadd.f32 %v1987_v16, %v1936_v12  ;;  %v1937_v61 = vadd.f32 %v1932_v41, %v1885_v59  ;;  %v2729_v9 = vpop.f32.mrb[47].mxu0  ;;  %v2735_v53 = vpop.f32.mrb[47].mxu1 }
 0x1c7   : > { %v1995_v51 = vadd.f32 %v1990_v45, %v1937_v61 }
 0x1ca   : > { %v2041_v5 = vpop.f32.mrb[48].mxu0  ;;  %v2095_v30 = vpop.f32.mrb[48].mxu1 }
 0x1cb   : > { %v2048_v46 = vadd.f32 %v2041_v5, %v1994_v60  ;;  %v2740_v54 = vpop.f32.mrb[49].mxu0  ;;  %v2746_v24 = vpop.f32.mrb[49].mxu1 }
 0x1cc   : > { %v2044_v43 = vpop.f32.mrb[50].mxu0  ;;  %v2098_v56 = vpop.f32.mrb[50].mxu1 }
 0x1cd   : > { %v2102_v37 = vadd.f32 %v2095_v30, %v2048_v46  ;;  %v2049_v2 = vadd.f32 %v2044_v43, %v1995_v51  ;;  %v2741_v38 = vpop.f32.mrb[51].mxu0  ;;  %v2747_v39 = vpop.f32.mrb[51].mxu1 }
 0x1cf   : > { %v2103_v62 = vadd.f32 %v2098_v56, %v2049_v2 }
 0x1d2   : > { %v2149_v1 = vpop.f32.mrb[52].mxu0 }
 0x1d3   : > { %v2156_v22 = vadd.f32 %v2149_v1, %v2102_v37  ;;  %v2752_v20 = vpop.f32.mrb[53].mxu0 }
 0x1d4   : > { %v2152_v63 = vpop.f32.mrb[54].mxu0 }
 0x1d5   : > { %v2165_v33 = vadd.f32 %v2509_v44, %v2156_v22  ;;  %v2157_v3 = vadd.f32 %v2152_v63, %v2103_v62  ;;  %v2753_v6 = vpop.f32.mrb[55].mxu0 }
 0x1d7   : > { %2167 = vst [vmem:[%s493_s11] sm:$0xff] %v2165_v33  ;;  %v2166_v7 = vadd.f32 %v2509_v44, %v2157_v3  ;;  %v2177_v50 = vmul.f32 %v2165_v33, %v2165_v33 }
 0x1d9   : > { %2168 = vst [vmem:[%s493_s11 + $0x8] sm:$0xff] %v2166_v7  ;;  %v2169_v26 = vadd.f32 %v2166_v7, %v2165_v33  ;;  %v2178_v35 = vmul.f32 %v2166_v7, %v2166_v7 }
 0x1db   : > { %v2170_v27 = vrot.slane %v2169_v26, 4  ;;  %v2179_v57 = vadd.f32 %v2178_v35, %v2177_v50 }
 0x1dd   : > { %v2171_v21 = vadd.f32 %v2170_v27, %v2169_v26  ;;  %v2180_v47 = vrot.slane %v2179_v57, 4 }
 0x1df   : > { %v2172_v19 = vrot.slane %v2171_v21, 2  ;;  %v2181_v58 = vadd.f32 %v2180_v47, %v2179_v57 }
 0x1e1   : > { %v2173_v34 = vadd.f32 %v2172_v19, %v2171_v21  ;;  %v2182_v23 = vrot.slane %v2181_v58, 2 }
 0x1e3   : > { %v2174_v11 = vrot.slane %v2173_v34, 1  ;;  %v2183_v40 = vadd.f32 %v2182_v23, %v2181_v58 }
 0x1e5   : > { %v2175_v14 = vadd.f32 %v2174_v11, %v2173_v34  ;;  %v2184_v13 = vrot.slane %v2183_v40, 1 }
 0x1e7   : > { %2176 = vst [vmem:[%s501_s30] sm:$0x1] %v2175_v14  ;;  %v2185_v17 = vadd.f32 %v2184_v13, %v2183_v40 }
 0x1e9   : > { %2186 = vst [vmem:[%s501_s30 + $0x1] sm:$0x1] %v2185_v17 }
 0x1ea PF: > { %s18_s28 = sadd.s32 1, %s2839_s28   ;;  %s3603_s15 = sld [smem:[#allocation2_spill]] }
 0x1eb   : > { %p15_p7 = scmp.ge.s32.totalorder %s18_s28, 10   ;;  %s3604_s24 = smov %s2831_s26 }
 0x1ec   : > { %s3605_s25 = smov %s2835_s27  ;;  %s3606_s26 = smov %s3609_s29 }
 0x1ed   :  { %17 = sbr.rel (!%p15_p7) target bundleno = 3 (0x3), region = 125 }
 0x1f0   : > { %s3607_s27 = smov %s3603_s15 }

// kernel: down_forward.6
= control target key start
LH: loop header
LB: loop body
LE: loop exit
PB: predicated region body
PF: predicated region fallthrough
CT: control target
= control target key end

     0   :  { %s5860_s30 = smov 0   ;;  %s5862_s10 = smov 0   ;;  %s7349_s0 = inlined_call_operand.vmem [shape: f32[2,4,16,128], index: 0, kind: input, shape index: {}, may-alias: {0,1,2}]   ;;  %s7350_s1 = inlined_call_operand.vmem [shape: f32[2,4,16,128], index: 1, kind: input, shape index: {}, may-alias: {0,1,2}]   ;;  %s7351_s2 = inlined_call_operand.vmem [shape: f32[2,4,16,128], index: 2, kind: input, shape index: {}, may-alias: {0,1,2}]   ;;  %s7352_s3 = inlined_call_operand.vmem [shape: bf16[27,128,128], index: 3, kind: input, shape index: {}]   ;;  %s7353_s4 = inlined_call_operand.vmem [shape: f32[1,128], index: 4, kind: input, shape index: {}]   ;;  %s7354_s5 = inlined_call_operand.vmem [shape: f32[9,16,1], index: 5, kind: input, shape index: {}]   ;;  %s7355_s6 = inlined_call_operand.vmem [shape: f32[1,128], index: 6, kind: input, shape index: {}]   ;;  %s7356_s7 = inlined_call_operand.vmem [shape: f32[1,128], index: 7, kind: input, shape index: {}]   ;;  %s7357_s8 = inlined_call_operand.vmem [shape: f32[2,4,16,128], index: 8, kind: output, shape index: {0}]   ;;  %s7358_s9 = inlined_call_operand.vmem [shape: f32[2,4,2,128], index: 9, kind: output, shape index: {1}]  }
   0x1   :  { %s5864_s11 = smov 0   ;;  %s5866_s12 = smov 0  }
   0x2   :  { %s5868_s13 = smov 0  }
   0x3 LB: > { %s29_s14 = sadd.s32 1, %s5797_s11  ;;  %s32_s15 = sadd.s32 1, %s5801_s12  ;;  %s5805_s13 = sphi %s5868_s13, %s20_s13   ;;  %s5801_s12 = sphi %s5866_s12, %s7395_s12   ;;  %s5797_s11 = sphi %s5864_s11, %s7394_s11   ;;  %s5793_s10 = sphi %s5862_s10, %s7393_s10   ;;  %s5789_s30 = sphi %s5860_s30, %s7392_s30  }
   0x4   : > { %p30_p0 = scmp.ge.s32.totalorder %s29_s14, 4  ;;  %p4020_p1 = scmp.ge.s32.totalorder %s5805_s13, 1 }
   0x5   : > { %p400_p2 = scmp.lt.s32.totalorder %s5805_s13, 9 }
   0x6   : > { %s7397_s14 = smov (%p30_p0, %s29_s14), 0  ;;  %s7399_s15 = smov (!%p30_p0, %s32_s15), %s5801_s12 }
   0x7   : > { %p401_p3 = pnand %p4020_p1, %p400_p2  ;;  %p34_p4 = scmp.ge.s32.totalorder %s7399_s15, 2 }
   0x9   : > { %s7401_s15 = smov (%p34_p4, %s7399_s15), 0  ;;  %404 = sbr.rel (%p401_p3) target bundleno = 805 (0x325), region = 52 }
   0xa   : > { %7364 = sst [smem:[#allocation2_spill]] %s7401_s15 }
  0x10   : > { %v4051_v0 = vld [vmem:[%s7354_s5 + $0x10] sm:$0xff]  ;;  %v557_v1 = vld [vmem:[%s7354_s5] sm:$0xff]  ;;  %s5901_s20 = sadd.s32 4294967295, %s5789_s30  ;;  %v5807_v2 = vmov 0   ;;  %p489_p7 = scmp.lt.s32.totalorder %s5793_s10, 1  ;;  %v4052_v3 = vld [vmem:[%s7354_s5 + $0x18] sm:$0xff]  ;;  %v614_v56 = vlaneseq }
  0x11   : > { %5550 = vset.pattern.permute.xlu1 %v5807_v2  ;;  %5549 = vset.pattern.permute.xlu0 %v5807_v2  ;;  %p485_p5 = scmp.gt.s32.totalorder %s5901_s20, 0  ;;  %p4022_p6 = scmp.lt.s32.totalorder %s5901_s20, 3  ;;  %v558_v4 = vld [vmem:[%s7354_s5 + $0x8] sm:$0xff]  ;;  %v7359_v5 = vmov 0.0   ;;  %v4053_v6 = vld [vmem:[%s7354_s5 + $0x20] sm:$0xff]  ;;  %v4055_v11 = vld [vmem:[%s7354_s5 + $0x30] sm:$0xff] }
  0x12   : > { %655 = vperm.xlu0 %5549, %v4051_v0   ;;  %621 = vperm.xlu1 %5550, %v557_v1   ;;  %s7403_s10 = smov (!%p489_p7, %s5793_s10), 1  ;;  %v4054_v7 = vld [vmem:[%s7354_s5 + $0x28] sm:$0xff]  ;;  %v5551_v8 = vld [vmem:[%s7352_s3 + $0x40] sm:$0xff]   ;;  %p503_p8 = scmp.gt.s32.totalorder %s5789_s30, 0  ;;  %v4056_v13 = vld [vmem:[%s7354_s5 + $0x38] sm:$0xff]  ;;  %vm5809_vm0 = vmmov 0  }
  0x13   : > { %4966 = vmatprep.subr.bf16.mxu0 %v7359_v5  ;;  %4986 = vmatprep.subr.bf16.mxu1 %v7359_v5  ;;  %s486_s25 = scalar_select %p485_p5, %s5901_s20, 0  ;;  %v5552_v9 = vld [vmem:[%s7352_s3] sm:$0xff]   ;;  %v5553_v10 = vld [vmem:[%s7352_s3 + $0x48] sm:$0xff]   ;;  %v5555_v14 = vld [vmem:[%s7352_s3 + $0x50] sm:$0xff]   ;;  %v6071_v60 = vshrl.u32 %v614_v56, 7 }
  0x14   : > { %4967 = vmatpush3.bf16.msra.mxu0 %v5551_v8  ;;  %s5935_s23 = sshll.u32 %s7403_s10, 3  ;;  %4987 = vmatpush3.bf16.msra.mxu1 %v5552_v9  ;;  %v5554_v12 = vld [vmem:[%s7352_s3 + $0x8] sm:$0xff]   ;;  %p4030_p10 = scmp.lt.s32.totalorder %s5789_s30, 3  ;;  %v4057_v15 = vld [vmem:[%s7354_s5 + $0x50] sm:$0xff]  ;;  %v4058_v17 = vld [vmem:[%s7354_s5 + $0x58] sm:$0xff] }
  0x15   : > { %s7405_s25 = smov (!%p4022_p6, %s486_s25), 3  ;;  %4968 = vmatprep.subr.bf16.mxu0 %v7359_v5  ;;  %4988 = vmatprep.subr.bf16.mxu1 %v7359_v5  ;;  %s5957_s24 = sadd.s32 1, %s5789_s30  ;;  %v5556_v16 = vld [vmem:[%s7352_s3 + $0x10] sm:$0xff]   ;;  %v5557_v18 = vld [vmem:[%s7352_s3 + $0x58] sm:$0xff]   ;;  %v4059_v20 = vld [vmem:[%s7354_s5 + $0x60] sm:$0xff]  ;;  %vm1224_vm1 = vcmp.lt.s32.totalorder %v6071_v60, 7 }
  0x16   : > { %660 = vperm.xlu0 %5549, %v4052_v3   ;;  %626 = vperm.xlu1 %5550, %v558_v4   ;;  %p491_p9 = scmp.lt.s32.totalorder %s7405_s25, 3  ;;  %p521_p11 = scmp.gt.s32.totalorder %s5957_s24, 0  ;;  %v5558_v19 = vld [vmem:[%s7352_s3 + $0x18] sm:$0xff]   ;;  %v4060_v21 = vld [vmem:[%s7354_s5 + $0x68] sm:$0xff]  ;;  %v5559_v22 = vld [vmem:[%s7352_s3 + $0x60] sm:$0xff]   ;;  %vm650_vm2 = vcmp.lt.s32.totalorder %v6071_v60, 4 }
  0x17   : > { %s504_s17 = scalar_select %p503_p8, %s5789_s30, 0  ;;  %v4065_v23 = vld [vmem:[%s7355_s6] ss:$0 sm:$0xff]  ;;  %v4061_v24 = vld [vmem:[%s7354_s5 + $0x70] sm:$0xff]  ;;  %v4062_v25 = vld [vmem:[%s7354_s5 + $0x78] sm:$0xff]  ;;  %4982 = vmatprep.mubr.msk.bf16.mxu0 %vm5809_vm0, %v7359_v5  ;;  %5002 = vmatprep.mubr.msk.bf16.mxu1 %vm5809_vm0, %v7359_v5  ;;  %vm616_vm3 = vcmp.lt.s32.totalorder %v6071_v60, 5 }
  0x18   : > { %s7407_s25 = smov (!%p491_p9, %s7405_s25), 3  ;;  %4969 = vmatpush3.bf16.msra.mxu0 %v5553_v10  ;;  %4989 = vmatpush3.bf16.msra.mxu1 %v5554_v12  ;;  %p4038_p13 = scmp.lt.s32.totalorder %s5957_s24, 3  ;;  %v5560_v26 = vld [vmem:[%s7352_s3 + $0x20] sm:$0xff]   ;;  %v5561_v28 = vld [vmem:[%s7352_s3 + $0x68] sm:$0xff]   ;;  %v5563_v42 = vld [vmem:[%s7352_s3 + $0x70] sm:$0xff]   ;;  %vm863_vm4 = vcmp.lt.s32.totalorder %v6071_v60, 3 }
  0x19   : > { %s4027_s18 = sshll.u32 %s7407_s25, 1  ;;  %4970 = vmatprep.subr.bf16.mxu0 %v7359_v5  ;;  %4990 = vmatprep.subr.bf16.mxu1 %v7359_v5  ;;  %s7409_s17 = smov (!%p4030_p10, %s504_s17), 3  ;;  %v5562_v30 = vld [vmem:[%s7352_s3 + $0x28] sm:$0xff]   ;;  %v4063_v31 = vld [vmem:[%s7354_s5 + $0x80] sm:$0xff]  ;;  %v5564_v43 = vld [vmem:[%s7352_s3 + $0x30] sm:$0xff]   ;;  %vm989_vm5 = vcmp.lt.s32.totalorder %v6071_v60, 1 }
  0x1a   : > { %868 = vperm.xlu0 %5549, %v4053_v6   ;;  %873 = vperm.xlu1 %5550, %v4054_v7   ;;  %s495_s22 = sadd.s32 %s5935_s23, %s4027_s18  ;;  %p509_p12 = scmp.lt.s32.totalorder %s7409_s17, 3  ;;  %v4064_v38 = vld [vmem:[%s7354_s5 + $0x88] sm:$0xff]  ;;  %v4066_v39 = vld [vmem:[%s7356_s7] ss:$0 sm:$0xff]  ;;  %v5565_v50 = vld [vmem:[%s7352_s3 + $0x78] sm:$0xff]  }
  0x1b   : > { %s4029_s29 = sshll.u32 %s495_s22, 3  ;;  %p603_p0 = scmp.ge.s32.totalorder %s5901_s20, 0  ;;  %v5566_v51 = vld [vmem:[%s7352_s3 + $0x38] sm:$0xff]  }
  0x1c   : > { %4971 = vmatpush3.bf16.msra.mxu0 %v5555_v14  ;;  %s522_s26 = scalar_select %p521_p11, %s5957_s24, 0  ;;  %4991 = vmatpush3.bf16.msra.mxu1 %v5556_v16 }
  0x1d   : > { %4972 = vmatprep.subr.bf16.mxu0 %v7359_v5  ;;  %s497_s16 = scalar_lea.vmem %s7349_s0, %s4029_s29  ;;  %4992 = vmatprep.subr.bf16.mxu1 %v7359_v5  ;;  %s7411_s17 = smov (!%p509_p12, %s7409_s17), 3 }
  0x1e   : > { %994 = vperm.xlu0 %5549, %v4055_v11   ;;  %999 = vperm.xlu1 %5550, %v4056_v13   ;;  %s7413_s26 = smov (!%p4038_p13, %s522_s26), 3  ;;  %s4035_s22 = sshll.u32 %s7411_s17, 1  ;;  %v582_v27 = vld [vmem:[%s497_s16] sm:$0xff]  ;;  %v583_v29 = vld [vmem:[%s497_s16 + $0x8] sm:$0xff] }
  0x1f   : > { %p604_p1 = scmp.le.s32.totalorder %s5901_s20, 3  ;;  %s513_s27 = sadd.s32 %s4035_s22, %s5935_s23  ;;  %v590_v32 = vmul.f32 %v4065_v23, %v582_v27  ;;  %v591_v35 = vmul.f32 %v4065_v23, %v583_v29 }
  0x20   : > { %4973 = vmatpush3.bf16.msra.mxu0 %v5557_v18  ;;  %4993 = vmatpush3.bf16.msra.mxu1 %v5558_v19  ;;  %p527_p2 = scmp.lt.s32.totalorder %s7413_s26, 3  ;;  %s4037_s28 = sshll.u32 %s513_s27, 3 }
  0x21   : > { %4974 = vmatprep.subr.bf16.mxu0 %v7359_v5  ;;  %4994 = vmatprep.subr.bf16.mxu1 %v7359_v5  ;;  %p6017_p3 = pnand %p604_p1, %p603_p0  ;;  %s515_s22 = scalar_lea.vmem %s7350_s1, %s4037_s28  ;;  %v598_v44 = vadd.f32 %v4066_v39, %v590_v32  ;;  %v599_v45 = vadd.f32 %v4066_v39, %v591_v35 }
  0x22   : > { %1229 = vperm.xlu0 %5549, %v4057_v15   ;;  %1234 = vperm.xlu1 %5550, %v4058_v17   ;;  %s7415_s26 = smov (!%p527_p2, %s7413_s26), 3  ;;  %v1711_v33 = vld [vmem:[%s515_s22] sm:$0xff]  ;;  %v1712_v34 = vld [vmem:[%s515_s22 + $0x8] sm:$0xff]  ;;  %p2745_p4 = scmp.ge.s32.totalorder %s5957_s24, 0 }
  0x23   : > { %s4068_s27 = scalar_select %p6017_p3, 0, 1  ;;  %v1713_v36 = vmul.f32 %v4065_v23, %v1711_v33  ;;  %v1714_v37 = vmul.f32 %v4065_v23, %v1712_v34  ;;  %v600_v52 = vmax.f32 %v598_v44, 0.0  ;;  %v601_v53 = vmax.f32 %v599_v45, 0.0 }
  0x24   : > { %4975 = vmatpush3.bf16.msra.mxu0 %v5559_v22  ;;  %4995 = vmatpush3.bf16.msra.mxu1 %v5560_v26  ;;  %s4043_s19 = sshll.u32 %s7415_s26, 1  ;;  %p2746_p5 = scmp.le.s32.totalorder %s5957_s24, 3 }
  0x25   : > { %4976 = vmatprep.subr.bf16.mxu0 %v7359_v5  ;;  %4996 = vmatprep.subr.bf16.mxu1 %v7359_v5  ;;  %s531_s21 = sadd.s32 %s4043_s19, %s5935_s23  ;;  %v1715_v40 = vadd.f32 %v4066_v39, %v1713_v36  ;;  %v1716_v41 = vadd.f32 %v4066_v39, %v1714_v37  ;;  %s608_s28 = scvt.s32.f32 %s4068_s27 }
  0x26   : > { %1350 = vperm.xlu0 %5549, %v4059_v20   ;;  %1355 = vperm.xlu1 %5550, %v4060_v21   ;;  %s4045_s22 = sshll.u32 %s531_s21, 3  ;;  %p2747_p6 = pnand %p2746_p5, %p2745_p4 }
  0x27   : > { %s533_s15 = scalar_lea.vmem %s7351_s2, %s4045_s22  ;;  %v609_v57 = vstv %s608_s28  ;;  %v6088_v2 = vmax.f32 %v1715_v40, 0.0  ;;  %v6090_v3 = vmax.f32 %v1716_v41, 0.0  ;;  %s7417_s30 = smov (!%p4030_p10, %s5789_s30), 3 }
  0x28   : > { %4977 = vmatpush3.bf16.msra.mxu0 %v5561_v28  ;;  %4997 = vmatpush3.bf16.msra.mxu1 %v5562_v30  ;;  %v2736_v46 = vld [vmem:[%s533_s15] sm:$0xff]  ;;  %v2737_v47 = vld [vmem:[%s533_s15 + $0x8] sm:$0xff]  ;;  %v6066_v58 = vmul.f32 %v609_v57, %v600_v52  ;;  %v6068_v59 = vmul.f32 %v609_v57, %v601_v53  ;;  %s4485_s27 = scalar_select %p2747_p6, 0, 1 }
  0x29   : > { %4978 = vmatprep.subr.bf16.mxu0 %v7359_v5  ;;  %4998 = vmatprep.subr.bf16.mxu1 %v7359_v5  ;;  %v2738_v48 = vmul.f32 %v4065_v23, %v2736_v46  ;;  %v2739_v49 = vmul.f32 %v4065_v23, %v2737_v47  ;;  %v1834_v4 = vrot.slane %v6088_v2, 4  ;;  %v1835_v6 = vrot.slane %v6090_v3, 4  ;;  %v5567_v53 = vld [vmem:[%s7352_s3 + $0x80] sm:$0xff]   ;;  %s4046_s17 = sshll.u32 %s7417_s30, 1 }
  0x2a   : > { %1471 = vperm.xlu0 %5549, %v4061_v24   ;;  %1476 = vperm.xlu1 %5550, %v4062_v25   ;;  %v1222_v61 = vrot.slane %v6066_v58, 1  ;;  %v1223_v62 = vrot.slane %v6068_v59, 1  ;;  %s2750_s18 = scvt.s32.f32 %s4485_s27  ;;  %v648_v7 = vrot.slane %v6066_v58, 4  ;;  %v649_v8 = vrot.slane %v6068_v59, 4  ;;  %s545_s19 = sadd.s32 %s4046_s17, %s5935_s23 }
  0x2b   : > { %v2740_v54 = vadd.f32 %v4066_v39, %v2738_v48  ;;  %v2741_v55 = vadd.f32 %v4066_v39, %v2739_v49  ;;  %v612_v12 = vrot.slane %v6066_v58, 3  ;;  %v613_v13 = vrot.slane %v6068_v59, 3  ;;  %s4048_s21 = sshll.u32 %s545_s19, 3  ;;  %s4049_s23 = sshll.u32 %s7403_s10, 2 }
  0x2c   : > { %4979 = vmatpush3.bf16.msra.mxu0 %v5563_v42  ;;  %4999 = vmatpush3.bf16.msra.mxu1 %v5564_v43  ;;  %v6078_v63 = vsel %vm1224_vm1, %v1222_v61, %v1223_v62  ;;  %v6082_v0 = vsel %vm1224_vm1, %v1223_v62, %v1222_v61  ;;  %v2751_v11 = vstv %s2750_s18  ;;  %v1719_v16 = vrot.slane %v6088_v2, 3  ;;  %s547_s22 = scalar_lea.vmem %s7357_s8, %s4048_s21  ;;  %s553_s20 = sadd.s32 %s4049_s23, %s7417_s30 }
  0x2d   : > { %4980 = vmatprep.subr.bf16.mxu0 %v7359_v5  ;;  %5000 = vmatprep.subr.bf16.mxu1 %v7359_v5  ;;  %v2742_v9 = vmax.f32 %v2740_v54, 0.0  ;;  %v2743_v10 = vmax.f32 %v2741_v55, 0.0  ;;  %v1720_v17 = vrot.slane %v6090_v3, 3  ;;  %v2064_v18 = vrot.slane %v6088_v2, 7  ;;  %v5568_v54 = vld [vmem:[%s7352_s3 + $0xc0] sm:$0xff]   ;;  %s4050_s16 = sshll.u32 %s553_s20, 1 }
  0x2e   : > { %1592 = vperm.xlu0 %5549, %v4063_v31   ;;  %1597 = vperm.xlu1 %5550, %v4064_v38   ;;  %v2065_v19 = vrot.slane %v6090_v3, 7  ;;  %v2288_v23 = vrot.slane %v6088_v2, 1  ;;  %v6116_v25 = vsel %vm650_vm2, %v649_v8, %v648_v7  ;;  %v6120_v26 = vsel %vm650_vm2, %v1835_v6, %v1834_v4  ;;  %s555_s15 = scalar_lea.vmem %s7358_s9, %s4050_s16 }
  0x2f   : > { %v6099_v14 = vmul.f32 %v2751_v11, %v2742_v9  ;;  %v6101_v15 = vmul.f32 %v2751_v11, %v2743_v10  ;;  %v6129_v28 = vsel %vm616_vm3, %v613_v13, %v612_v12  ;;  %v6133_v29 = vsel %vm650_vm2, %v648_v7, %v649_v8 }
  0x30   : > { %4981 = vmatpush3.bf16.msra.mxu0 %v5565_v50  ;;  %5001 = vmatpush3.bf16.msra.mxu1 %v5566_v51  ;;  %v1949_v30 = vrot.slane %v6088_v2, 5  ;;  %v1950_v31 = vrot.slane %v6090_v3, 5  ;;  %v6139_v34 = vsel %vm616_vm3, %v1720_v17, %v1719_v16  ;;  %v6143_v35 = vsel %vm650_vm2, %v1834_v4, %v1835_v6 }
  0x31   : > { %5006 = vmatprep.subr.bf16.mxu0 %v7359_v5  ;;  %5026 = vmatprep.subr.bf16.mxu1 %v7359_v5  ;;  %v2869_v20 = vrot.slane %v6099_v14, 4  ;;  %v2870_v21 = vrot.slane %v6101_v15, 4  ;;  %v2754_v22 = vrot.slane %v6099_v14, 3  ;;  %v2755_v24 = vrot.slane %v6101_v15, 3 }
  0x32   : > { %v2984_v36 = vrot.slane %v6099_v14, 5  ;;  %v2985_v37 = vrot.slane %v6101_v15, 5  ;;  %v6159_v41 = vsel %vm616_vm3, %v612_v12, %v613_v13  ;;  %v6173_v45 = vsel %vm616_vm3, %v1719_v16, %v1720_v17 }
  0x33   : > { %v6124_v27 = vsel %vm650_vm2, %v2870_v21, %v2869_v20  ;;  %v6155_v40 = vsel %vm616_vm3, %v2755_v24, %v2754_v22  ;;  %v6169_v44 = vsel %vm650_vm2, %v2869_v20, %v2870_v21  ;;  %v6178_v47 = vsel %vm616_vm3, %v2754_v22, %v2755_v24  ;;  %v5569_v24 = vld [vmem:[%s7352_s3 + $0x88] sm:$0xff]  }
  0x34   : > { %v3099_v48 = vrot.slane %v6099_v14, 7  ;;  %v3100_v49 = vrot.slane %v6101_v15, 7  ;;  %v2289_v55 = vrot.slane %v6090_v3, 1  ;;  %v6192_v56 = vsel %vm863_vm4, %v1949_v30, %v1950_v31 }
  0x35   : > { %v6196_v57 = vsel %vm863_vm4, %v1950_v31, %v1949_v30  ;;  %v6214_v9 = vsel %vm863_vm4, %v2984_v36, %v2985_v37  ;;  %v6218_v10 = vsel %vm863_vm4, %v2985_v37, %v2984_v36  ;;  %v5570_v30 = vld [vmem:[%s7352_s3 + $0xc8] sm:$0xff]   ;;  %v3323_v31 = vrot.slane %v6099_v14, 1 }
  0x91   : > { %v656_v32 = vpop.permute.xlu0 %655  ;;  %v622_v33 = vpop.permute.xlu1 %621 }
  0x92   : > { %v6148_v38 = vmul.f32 %v6120_v26, %v656_v32  ;;  %v6151_v39 = vmul.f32 %v6124_v27, %v656_v32  ;;  %v6162_v42 = vmul.f32 %v6139_v34, %v622_v33  ;;  %v6165_v43 = vmul.f32 %v6155_v40, %v622_v33 }
  0x93   : > { %v629_v46 = vmul.f32 %v622_v33, %v6129_v28  ;;  %v663_v50 = vmul.f32 %v656_v32, %v6116_v25  ;;  %v3324_v32 = vrot.slane %v6101_v15, 1  ;;  %v2067_v33 = vsel %vm989_vm5, %v2065_v19, %v2064_v18 }
  0x95   : > { %v661_v51 = vpop.permute.xlu0 %660  ;;  %v627_v52 = vpop.permute.xlu1 %626  ;;  %v3326_v20 = vsel %vm1224_vm1, %v3324_v32, %v3323_v31 }
  0x96   : > { %v664_v61 = vmul.f32 %v661_v51, %v6133_v29  ;;  %v6200_v62 = vmul.f32 %v6143_v35, %v661_v51  ;;  %v6203_v4 = vmul.f32 %v6169_v44, %v661_v51  ;;  %v630_v6 = vmul.f32 %v627_v52, %v6159_v41 }
  0x97   : > { %v6207_v7 = vmul.f32 %v6173_v45, %v627_v52  ;;  %v6210_v8 = vmul.f32 %v6178_v47, %v627_v52  ;;  %v2066_v52 = vsel %vm989_vm5, %v2064_v18, %v2065_v19  ;;  %v5573_v18 = vld [vmem:[%s7352_s3 + $0x98] sm:$0xff]  }
  0x98   : > { %v665_v13 = vpack.c.bf16 %v664_v61, %v663_v50  ;;  %v631_v16 = vpack.c.bf16 %v630_v6, %v629_v46  ;;  %v3102_v46 = vsel %vm989_vm5, %v3100_v49, %v3099_v48  ;;  %v5571_v6 = vld [vmem:[%s7352_s3 + $0x90] sm:$0xff]  }
  0x99   : > { %v6228_v21 = vpop.permute.xlu0 %868  ;;  %v6230_v22 = vpop.permute.xlu1 %873 }
  0x9a   : > { %4983 = vmatmul.mubr.bf16.vlgmr.msra.gmra.mrb[0].mxu0 %v665_v13  ;;  %5003 = vmatmul.mubr.bf16.vlgmr.msra.gmra.mrb[0].mxu1 %v631_v16  ;;  %v6248_v36 = vmul.f32 %v6192_v56, %v6230_v22  ;;  %v6252_v37 = vmul.f32 %v6214_v9, %v6230_v22  ;;  %v6258_v50 = vmul.f32 %v6196_v57, %v6228_v21  ;;  %v5572_v13 = vld [vmem:[%s7352_s3 + $0xd0] sm:$0xff]  }
  0x9b   : > { %5007 = vmatpush3.bf16.msra.mxu0 %v5567_v53  ;;  %5027 = vmatpush3.bf16.msra.mxu1 %v5568_v54  ;;  %v6262_v51 = vmul.f32 %v6218_v10, %v6228_v21  ;;  %v3101_v53 = vsel %vm989_vm5, %v3099_v48, %v3100_v49  ;;  %v2290_v16 = vsel %vm1224_vm1, %v2288_v23, %v2289_v55 }
  0x9c   : > { %5008 = vmatprep.subr.bf16.mxu0 %v7359_v5  ;;  %5028 = vmatprep.subr.bf16.mxu1 %v7359_v5 }
  0x9d   : > { %v6274_v54 = vpop.permute.xlu0 %994  ;;  %v6276_v61 = vpop.permute.xlu1 %999  ;;  %5022 = vmatprep.mubr.msk.bf16.mxu0 %vm5809_vm0, %v7359_v5  ;;  %5042 = vmatprep.mubr.msk.bf16.mxu1 %vm5809_vm0, %v7359_v5 }
  0x9e   : > { %v6293_v48 = vmul.f32 %v2067_v33, %v6274_v54  ;;  %v6296_v49 = vmul.f32 %v3102_v46, %v6274_v54  ;;  %v6303_v12 = vmul.f32 %v2066_v52, %v6276_v61  ;;  %v6306_v19 = vmul.f32 %v3101_v53, %v6276_v61 }
  0x9f   : > { %5009 = vmatpush3.bf16.msra.mxu0 %v5569_v24  ;;  %5029 = vmatpush3.bf16.msra.mxu1 %v5570_v30  ;;  %v3325_v33 = vsel %vm1224_vm1, %v3323_v31, %v3324_v32  ;;  %v2291_v46 = vsel %vm1224_vm1, %v2289_v55, %v2288_v23  ;;  %v5574_v23 = vld [vmem:[%s7352_s3 + $0xd8] sm:$0xff]  }
  0xa0   : > { %5010 = vmatprep.subr.bf16.mxu0 %v7359_v5  ;;  %5030 = vmatprep.subr.bf16.mxu1 %v7359_v5 }
  0xa1   : > { %v1230_v30 = vpop.permute.xlu0 %1229  ;;  %v1235_v53 = vpop.permute.xlu1 %1234 }
  0xa2   : > { %v6329_v55 = vmul.f32 %v1230_v30, %v6078_v63  ;;  %v6331_v31 = vmul.f32 %v2290_v16, %v1230_v30  ;;  %v6333_v32 = vmul.f32 %v3325_v33, %v1230_v30  ;;  %v6336_v52 = vmul.f32 %v1235_v53, %v6082_v0 }
  0xa3   : > { %v6338_v24 = vmul.f32 %v2291_v46, %v1235_v53  ;;  %v6340_v11 = vmul.f32 %v3326_v20, %v1235_v53  ;;  %5011 = vmatpush3.bf16.msra.mxu0 %v5571_v6  ;;  %5031 = vmatpush3.bf16.msra.mxu1 %v5572_v13  ;;  %v5575_v20 = vld [vmem:[%s7352_s3 + $0xa0] sm:$0xff]  }
  0xa4   : > { %5012 = vmatprep.subr.bf16.mxu0 %v7359_v5  ;;  %5032 = vmatprep.subr.bf16.mxu1 %v7359_v5  ;;  %v5576_v6 = vld [vmem:[%s7352_s3 + $0xe0] sm:$0xff]  }
  0xa5   : > { %v1351_v16 = vpop.permute.xlu0 %1350  ;;  %v1356_v33 = vpop.permute.xlu1 %1355 }
  0xa6   : > { %v6357_v13 = vmul.f32 %v1351_v16, %v6159_v41  ;;  %v6360_v46 = vmul.f32 %v6173_v45, %v1351_v16  ;;  %v6363_v30 = vmul.f32 %v6178_v47, %v1351_v16  ;;  %v6366_v53 = vmul.f32 %v1356_v33, %v6129_v28  ;;  %v5578_v16 = vld [vmem:[%s7352_s3 + $0xe8] sm:$0xff]  }
  0xa7   : > { %v6369_v0 = vmul.f32 %v6139_v34, %v1356_v33  ;;  %v6372_v63 = vmul.f32 %v6155_v40, %v1356_v33  ;;  %5013 = vmatpush3.bf16.msra.mxu0 %v5573_v18  ;;  %5033 = vmatpush3.bf16.msra.mxu1 %v5574_v23  ;;  %v861_v40 = vrot.slane %v6066_v58, 5  ;;  %v862_v18 = vrot.slane %v6068_v59, 5  ;;  %v5577_v23 = vld [vmem:[%s7352_s3 + $0xa8] sm:$0xff]  }
  0xa8   : > { %7366 = vst [vmem:[#allocation3_spill] sm:$0xff] %v6363_v30  ;;  %5014 = vmatprep.subr.bf16.mxu0 %v7359_v5  ;;  %5034 = vmatprep.subr.bf16.mxu1 %v7359_v5  ;;  %v988_v5 = vrot.slane %v6068_v59, 7 }
  0xa9   : > { %v1472_v34 = vpop.permute.xlu0 %1471  ;;  %v1477_v47 = vpop.permute.xlu1 %1476 }
  0xaa   : > { %v6391_v33 = vmul.f32 %v1472_v34, %v6133_v29  ;;  %v6394_v45 = vmul.f32 %v6143_v35, %v1472_v34  ;;  %v6397_v28 = vmul.f32 %v6169_v44, %v1472_v34  ;;  %v6400_v41 = vmul.f32 %v1477_v47, %v6116_v25  ;;  %v5580_v35 = vld [vmem:[%s7352_s3 + $0xf0] sm:$0xff]  }
  0xab   : > { %v6403_v17 = vmul.f32 %v6120_v26, %v1477_v47  ;;  %v6406_v1 = vmul.f32 %v6124_v27, %v1477_v47  ;;  %5015 = vmatpush3.bf16.msra.mxu0 %v5575_v20  ;;  %5035 = vmatpush3.bf16.msra.mxu1 %v5576_v6  ;;  %v987_v29 = vrot.slane %v6066_v58, 7  ;;  %v7369_v44 = vmov 0.0   ;;  %v5579_v47 = vld [vmem:[%s7352_s3 + $0xb0] sm:$0xff]  }
  0xac   : > { %7367 = vst [vmem:[#allocation4_spill] sm:$0xff] %v6397_v28  ;;  %5016 = vmatprep.subr.bf16.mxu0 %v7369_v44  ;;  %5036 = vmatprep.subr.bf16.mxu1 %v7369_v44  ;;  %v864_v20 = vsel %vm863_vm4, %v861_v40, %v862_v18  ;;  %v865_v34 = vsel %vm863_vm4, %v862_v18, %v861_v40 }
  0xad   : > { %7368 = vst [vmem:[#allocation5_spill] sm:$0xff] %v6406_v1  ;;  %v1593_v27 = vpop.permute.xlu0 %1592  ;;  %v1598_v6 = vpop.permute.xlu1 %1597 }
  0xae   : > { %v6428_v25 = vmul.f32 %v1593_v27, %v864_v20  ;;  %v6431_v26 = vmul.f32 %v6192_v56, %v1593_v27  ;;  %v6434_v28 = vmul.f32 %v6214_v9, %v1593_v27  ;;  %v6436_v1 = vmul.f32 %v1598_v6, %v865_v34 }
  0xaf   : > { %v6439_v40 = vmul.f32 %v6196_v57, %v1598_v6  ;;  %v6442_v18 = vmul.f32 %v6218_v10, %v1598_v6  ;;  %5017 = vmatpush3.bf16.msra.mxu0 %v5577_v23  ;;  %5037 = vmatpush3.bf16.msra.mxu1 %v5578_v16  ;;  %v991_v56 = vsel %vm989_vm5, %v988_v5, %v987_v29  ;;  %v5581_v23 = vld [vmem:[%s7352_s3 + $0xb8] sm:$0xff]   ;;  %v5583_v6 = vld [vmem:[%s7352_s3 + $0x100] sm:$0xff]  }
  0xb0   : > { %v1602_v30 = vpack.c.bf16 %v6436_v1, %v6428_v25  ;;  %5018 = vmatprep.subr.bf16.mxu0 %v7369_v44  ;;  %5038 = vmatprep.subr.bf16.mxu1 %v7369_v44  ;;  %v990_v9 = vsel %vm989_vm5, %v987_v29, %v988_v5  ;;  %v5582_v16 = vld [vmem:[%s7352_s3 + $0xf8] sm:$0xff]   ;;  %v877_v27 = vmul.f32 %v6230_v22, %v864_v20  ;;  %v5584_v22 = vld [vmem:[%s7352_s3 + $0x140] sm:$0xff]   ;;  %v5587_v20 = vld [vmem:[%s7352_s3 + $0x110] sm:$0xff]  }
  0xb1   : > { %v2627_v57 = vpack.c.bf16 %v6439_v40, %v6431_v26  ;;  %v3662_v10 = vpack.c.bf16 %v6442_v18, %v6434_v28  ;;  %v1002_v5 = vmul.f32 %v6274_v54, %v991_v56  ;;  %v1003_v60 = vmul.f32 %v6276_v61, %v990_v9  ;;  %v5586_v61 = vld [vmem:[%s7352_s3 + $0x148] sm:$0xff]   ;;  %v5590_v56 = vld [vmem:[%s7352_s3 + $0x158] sm:$0xff]   ;;  %v5591_v9 = vld [vmem:[%s7352_s3 + $0x120] sm:$0xff]  }
  0xb2   : > { %v876_v29 = vmul.f32 %v6228_v21, %v865_v34  ;;  %v5585_v21 = vld [vmem:[%s7352_s3 + $0x108] sm:$0xff]   ;;  %v5588_v34 = vld [vmem:[%s7352_s3 + $0x150] sm:$0xff]   ;;  %v5639_v25 = vld [vmem:[%s7352_s3 + $0x2a0] sm:$0xff]  }
  0xb3   : > { %5019 = vmatpush3.bf16.msra.mxu0 %v5579_v47  ;;  %5039 = vmatpush3.bf16.msra.mxu1 %v5580_v35  ;;  %v1004_v35 = vpack.c.bf16 %v1003_v60, %v1002_v5  ;;  %v5589_v47 = vld [vmem:[%s7352_s3 + $0x118] sm:$0xff]   ;;  %v5595_v5 = vld [vmem:[%s7352_s3 + $0x130] sm:$0xff]  }
  0xb4   : > { %5020 = vmatprep.subr.bf16.mxu0 %v7369_v44  ;;  %5040 = vmatprep.subr.bf16.mxu1 %v7369_v44  ;;  %v878_v54 = vpack.c.bf16 %v877_v27, %v876_v29  ;;  %v5594_v27 = vld [vmem:[%s7352_s3 + $0x168] sm:$0xff]   ;;  %v5596_v60 = vld [vmem:[%s7352_s3 + $0x170] sm:$0xff]   ;;  %v5597_v29 = vld [vmem:[%s7352_s3 + $0x138] sm:$0xff]  }
  0xb5   : > { %v5635_v1 = vld [vmem:[%s7352_s3 + $0x290] sm:$0xff]   ;;  %v5701_v26 = vld [vmem:[%s7352_s3 + $0x498] sm:$0xff]  }
  0xb6   : > { %v5702_v40 = vld [vmem:[%s7352_s3 + $0x4d8] sm:$0xff]  }
  0xb7   : > { %5021 = vmatpush3.bf16.msra.mxu0 %v5581_v23  ;;  %5041 = vmatpush3.bf16.msra.mxu1 %v5582_v16  ;;  %v5592_v23 = vld [vmem:[%s7352_s3 + $0x160] sm:$0xff]   ;;  %v5593_v16 = vld [vmem:[%s7352_s3 + $0x128] sm:$0xff]  }
  0xb8   : > { %5046 = vmatprep.subr.bf16.mxu0 %v7369_v44  ;;  %5066 = vmatprep.subr.bf16.mxu1 %v7369_v44 }
  0xba   : > { %5023 = vmatmul.mubr.bf16.vlgmr.msra.gmra.mrb[4].mxu0 %v878_v54  ;;  %5043 = vmatmul.mubr.bf16.vlgmr.msra.gmra.mrb[4].mxu1 %v1004_v35  ;;  %v5600_v35 = vld [vmem:[%s7352_s3 + $0x1c0] sm:$0xff]   ;;  %v7370_v54 = vpack.c.bf16 %v6068_v59, %v6066_v58  ;;  %v5603_v58 = vld [vmem:[%s7352_s3 + $0x190] sm:$0xff]  }
  0xbb   : > { %5047 = vmatpush3.bf16.msra.mxu0 %v5583_v6  ;;  %5067 = vmatpush3.bf16.msra.mxu1 %v5584_v22  ;;  %v5598_v6 = vld [vmem:[%s7352_s3 + $0x178] sm:$0xff]   ;;  %v5599_v22 = vld [vmem:[%s7352_s3 + $0x180] sm:$0xff]   ;;  %v5604_v59 = vld [vmem:[%s7352_s3 + $0x1d0] sm:$0xff]  }
  0xbc   : > { %5048 = vmatprep.subr.bf16.mxu0 %v7369_v44  ;;  %5068 = vmatprep.subr.bf16.mxu1 %v7369_v44 }
  0xbd   : > { %5062 = vmatprep.mubr.msk.bf16.mxu0 %vm5809_vm0, %v7369_v44  ;;  %5082 = vmatprep.mubr.msk.bf16.mxu1 %vm5809_vm0, %v7369_v44 }
  0xbf   : > { %5049 = vmatpush3.bf16.msra.mxu0 %v5585_v21  ;;  %5069 = vmatpush3.bf16.msra.mxu1 %v5586_v61  ;;  %v7371_v21 = vpack.c.bf16 %v6336_v52, %v6329_v55  ;;  %v5601_v61 = vld [vmem:[%s7352_s3 + $0x188] sm:$0xff]   ;;  %v5605_v52 = vld [vmem:[%s7352_s3 + $0x198] sm:$0xff]  }
  0xc0   : > { %5050 = vmatprep.subr.bf16.mxu0 %v7369_v44  ;;  %5070 = vmatprep.subr.bf16.mxu1 %v7369_v44  ;;  %v5606_v55 = vld [vmem:[%s7352_s3 + $0x1d8] sm:$0xff]  }
  0xc3   : > { %5051 = vmatpush3.bf16.msra.mxu0 %v5587_v20  ;;  %5071 = vmatpush3.bf16.msra.mxu1 %v5588_v34  ;;  %v5602_v20 = vld [vmem:[%s7352_s3 + $0x1c8] sm:$0xff]   ;;  %v5607_v34 = vld [vmem:[%s7352_s3 + $0x1a0] sm:$0xff]  }
  0xc4   : > { %5052 = vmatprep.subr.bf16.mxu0 %v7369_v44  ;;  %5072 = vmatprep.subr.bf16.mxu1 %v7369_v44 }
  0xc7   : > { %5053 = vmatpush3.bf16.msra.mxu0 %v5589_v47  ;;  %5073 = vmatpush3.bf16.msra.mxu1 %v5590_v56  ;;  %v5608_v47 = vld [vmem:[%s7352_s3 + $0x1e0] sm:$0xff]   ;;  %v5609_v56 = vld [vmem:[%s7352_s3 + $0x1a8] sm:$0xff]  }
  0xc8   : > { %5054 = vmatprep.subr.bf16.mxu0 %v7369_v44  ;;  %5074 = vmatprep.subr.bf16.mxu1 %v7369_v44 }
  0xcb   : > { %5055 = vmatpush3.bf16.msra.mxu0 %v5591_v9  ;;  %5075 = vmatpush3.bf16.msra.mxu1 %v5592_v23  ;;  %v5610_v9 = vld [vmem:[%s7352_s3 + $0x1e8] sm:$0xff]   ;;  %v5611_v23 = vld [vmem:[%s7352_s3 + $0x1b0] sm:$0xff]  }
  0xcc   : > { %5056 = vmatprep.subr.bf16.mxu0 %v7369_v44  ;;  %5076 = vmatprep.subr.bf16.mxu1 %v7369_v44 }
  0xcf   : > { %5057 = vmatpush3.bf16.msra.mxu0 %v5593_v16  ;;  %5077 = vmatpush3.bf16.msra.mxu1 %v5594_v27  ;;  %v5612_v16 = vld [vmem:[%s7352_s3 + $0x1f0] sm:$0xff]   ;;  %v5613_v27 = vld [vmem:[%s7352_s3 + $0x1b8] sm:$0xff]  }
  0xd0   : > { %5058 = vmatprep.subr.bf16.mxu0 %v7369_v44  ;;  %5078 = vmatprep.subr.bf16.mxu1 %v7369_v44 }
  0xd3   : > { %5059 = vmatpush3.bf16.msra.mxu0 %v5595_v5  ;;  %5079 = vmatpush3.bf16.msra.mxu1 %v5596_v60  ;;  %v5614_v5 = vld [vmem:[%s7352_s3 + $0x1f8] sm:$0xff]   ;;  %v5615_v60 = vld [vmem:[%s7352_s3 + $0x200] sm:$0xff]  }
  0xd4   : > { %5060 = vmatprep.subr.bf16.mxu0 %v7369_v44  ;;  %5080 = vmatprep.subr.bf16.mxu1 %v7369_v44 }
  0xd7   : > { %5061 = vmatpush3.bf16.msra.mxu0 %v5597_v29  ;;  %5081 = vmatpush3.bf16.msra.mxu1 %v5598_v6  ;;  %v5616_v29 = vld [vmem:[%s7352_s3 + $0x240] sm:$0xff]   ;;  %v7372_v6 = vpack.c.bf16 %v6366_v53, %v6357_v13  ;;  %v5619_v13 = vld [vmem:[%s7352_s3 + $0x210] sm:$0xff]  }
  0xd8   : > { %5086 = vmatprep.subr.bf16.mxu0 %v7369_v44  ;;  %5106 = vmatprep.subr.bf16.mxu1 %v7369_v44  ;;  %v5620_v53 = vld [vmem:[%s7352_s3 + $0x250] sm:$0xff]  }
  0xda   : > { %5063 = vmatmul.mubr.bf16.vlgmr.msra.gmra.mrb[8].mxu0 %v7370_v54  ;;  %5083 = vmatmul.mubr.bf16.vlgmr.msra.gmra.mrb[8].mxu1 %v7371_v21  ;;  %v5618_v54 = vld [vmem:[%s7352_s3 + $0x248] sm:$0xff]   ;;  %v5623_v21 = vld [vmem:[%s7352_s3 + $0x220] sm:$0xff]  }
  0xdb   : > { %5087 = vmatpush3.bf16.msra.mxu0 %v5599_v22  ;;  %5107 = vmatpush3.bf16.msra.mxu1 %v5600_v35  ;;  %v7373_v22 = vpack.c.bf16 %v6400_v41, %v6391_v33  ;;  %v5617_v35 = vld [vmem:[%s7352_s3 + $0x208] sm:$0xff]   ;;  %v5621_v41 = vld [vmem:[%s7352_s3 + $0x218] sm:$0xff]  }
  0xdc   : > { %5088 = vmatprep.subr.bf16.mxu0 %v7369_v44  ;;  %5108 = vmatprep.subr.bf16.mxu1 %v7369_v44  ;;  %v5622_v33 = vld [vmem:[%s7352_s3 + $0x258] sm:$0xff]  }
  0xdd   : > { %5102 = vmatprep.mubr.msk.bf16.mxu0 %vm5809_vm0, %v7369_v44  ;;  %5122 = vmatprep.mubr.msk.bf16.mxu1 %vm5809_vm0, %v7369_v44 }
  0xdf   : > { %5089 = vmatpush3.bf16.msra.mxu0 %v5601_v61  ;;  %5109 = vmatpush3.bf16.msra.mxu1 %v5602_v20  ;;  %v5624_v61 = vld [vmem:[%s7352_s3 + $0x260] sm:$0xff]   ;;  %v5625_v20 = vld [vmem:[%s7352_s3 + $0x228] sm:$0xff]  }
  0xe0   : > { %5090 = vmatprep.subr.bf16.mxu0 %v7369_v44  ;;  %5110 = vmatprep.subr.bf16.mxu1 %v7369_v44 }
  0xe3   : > { %5091 = vmatpush3.bf16.msra.mxu0 %v5603_v58  ;;  %5111 = vmatpush3.bf16.msra.mxu1 %v5604_v59  ;;  %v5626_v58 = vld [vmem:[%s7352_s3 + $0x268] sm:$0xff]   ;;  %v5627_v59 = vld [vmem:[%s7352_s3 + $0x230] sm:$0xff]  }
  0xe4   : > { %5092 = vmatprep.subr.bf16.mxu0 %v7369_v44  ;;  %5112 = vmatprep.subr.bf16.mxu1 %v7369_v44 }
  0xe7   : > { %5093 = vmatpush3.bf16.msra.mxu0 %v5605_v52  ;;  %5113 = vmatpush3.bf16.msra.mxu1 %v5606_v55  ;;  %v5628_v52 = vld [vmem:[%s7352_s3 + $0x270] sm:$0xff]   ;;  %v5629_v55 = vld [vmem:[%s7352_s3 + $0x238] sm:$0xff]  }
  0xe8   : > { %5094 = vmatprep.subr.bf16.mxu0 %v7369_v44  ;;  %5114 = vmatprep.subr.bf16.mxu1 %v7369_v44 }
  0xeb   : > { %5095 = vmatpush3.bf16.msra.mxu0 %v5607_v34  ;;  %5115 = vmatpush3.bf16.msra.mxu1 %v5608_v47  ;;  %v5630_v34 = vld [vmem:[%s7352_s3 + $0x278] sm:$0xff]   ;;  %v5631_v47 = vld [vmem:[%s7352_s3 + $0x280] sm:$0xff]  }
  0xec   : > { %5096 = vmatprep.subr.bf16.mxu0 %v7369_v44  ;;  %5116 = vmatprep.subr.bf16.mxu1 %v7369_v44 }
  0xef   : > { %5097 = vmatpush3.bf16.msra.mxu0 %v5609_v56  ;;  %5117 = vmatpush3.bf16.msra.mxu1 %v5610_v9  ;;  %v5632_v56 = vld [vmem:[%s7352_s3 + $0x2c0] sm:$0xff]   ;;  %v7374_v9 = vpack.c.bf16 %v6207_v7, %v6162_v42  ;;  %v5636_v42 = vld [vmem:[%s7352_s3 + $0x2d0] sm:$0xff]   ;;  %v5637_v7 = vld [vmem:[%s7352_s3 + $0x298] sm:$0xff]  }
  0xf0   : > { %5098 = vmatprep.subr.bf16.mxu0 %v7369_v44  ;;  %5118 = vmatprep.subr.bf16.mxu1 %v7369_v44 }
  0xf3   : > { %5099 = vmatpush3.bf16.msra.mxu0 %v5611_v23  ;;  %5119 = vmatpush3.bf16.msra.mxu1 %v5612_v16  ;;  %v5633_v23 = vld [vmem:[%s7352_s3 + $0x288] sm:$0xff]  }
  0xf4   : > { %5100 = vmatprep.subr.bf16.mxu0 %v7369_v44  ;;  %5120 = vmatprep.subr.bf16.mxu1 %v7369_v44  ;;  %v5634_v16 = vld [vmem:[%s7352_s3 + $0x2c8] sm:$0xff]  }
  0xf7   : > { %5101 = vmatpush3.bf16.msra.mxu0 %v5613_v27  ;;  %5121 = vmatpush3.bf16.msra.mxu1 %v5614_v5  ;;  %v5640_v27 = vld [vmem:[%s7352_s3 + $0x2e0] sm:$0xff]   ;;  %v5641_v5 = vld [vmem:[%s7352_s3 + $0x2a8] sm:$0xff]  }
  0xf8   : > { %5126 = vmatprep.subr.bf16.mxu0 %v7369_v44  ;;  %5146 = vmatprep.subr.bf16.mxu1 %v7369_v44 }
  0xfa   : > { %5103 = vmatmul.mubr.bf16.vlgmr.msra.gmra.mrb[12].mxu0 %v7372_v6  ;;  %5123 = vmatmul.mubr.bf16.vlgmr.msra.gmra.mrb[12].mxu1 %v7373_v22  ;;  %v5644_v6 = vld [vmem:[%s7352_s3 + $0x2f0] sm:$0xff]   ;;  %v5645_v22 = vld [vmem:[%s7352_s3 + $0x2b8] sm:$0xff]  }
  0xfb   : > { %5127 = vmatpush3.bf16.msra.mxu0 %v5615_v60  ;;  %5147 = vmatpush3.bf16.msra.mxu1 %v5616_v29  ;;  %v5642_v60 = vld [vmem:[%s7352_s3 + $0x2e8] sm:$0xff]   ;;  %v5643_v29 = vld [vmem:[%s7352_s3 + $0x2b0] sm:$0xff]  }
  0xfc   : > { %5128 = vmatprep.subr.bf16.mxu0 %v7369_v44  ;;  %5148 = vmatprep.subr.bf16.mxu1 %v7369_v44 }
  0xfd   : > { %5142 = vmatprep.mubr.msk.bf16.mxu0 %vm5809_vm0, %v7369_v44  ;;  %5162 = vmatprep.mubr.msk.bf16.mxu1 %vm5809_vm0, %v7369_v44 }
  0xff   : > { %5129 = vmatpush3.bf16.msra.mxu0 %v5617_v35  ;;  %5149 = vmatpush3.bf16.msra.mxu1 %v5618_v54  ;;  %v5646_v35 = vld [vmem:[%s7352_s3 + $0x2f8] sm:$0xff]   ;;  %v5647_v54 = vld [vmem:[%s7352_s3 + $0x300] sm:$0xff]  }
 0x100   : > { %5130 = vmatprep.subr.bf16.mxu0 %v7369_v44  ;;  %5150 = vmatprep.subr.bf16.mxu1 %v7369_v44 }
 0x103   : > { %5131 = vmatpush3.bf16.msra.mxu0 %v5619_v13  ;;  %5151 = vmatpush3.bf16.msra.mxu1 %v5620_v53  ;;  %v5648_v13 = vld [vmem:[%s7352_s3 + $0x340] sm:$0xff]   ;;  %v7375_v53 = vpack.c.bf16 %v6200_v62, %v6148_v38  ;;  %v5651_v38 = vld [vmem:[%s7352_s3 + $0x310] sm:$0xff]  }
 0x104   : > { %5132 = vmatprep.subr.bf16.mxu0 %v7369_v44  ;;  %5152 = vmatprep.subr.bf16.mxu1 %v7369_v44  ;;  %v5652_v62 = vld [vmem:[%s7352_s3 + $0x350] sm:$0xff]  }
 0x107   : > { %5133 = vmatpush3.bf16.msra.mxu0 %v5621_v41  ;;  %5153 = vmatpush3.bf16.msra.mxu1 %v5622_v33  ;;  %v7376_v41 = vpack.c.bf16 %v6248_v36, %v6258_v50  ;;  %v5649_v33 = vld [vmem:[%s7352_s3 + $0x308] sm:$0xff]   ;;  %v5653_v36 = vld [vmem:[%s7352_s3 + $0x318] sm:$0xff]  }
 0x108   : > { %5134 = vmatprep.subr.bf16.mxu0 %v7369_v44  ;;  %5154 = vmatprep.subr.bf16.mxu1 %v7369_v44  ;;  %v5654_v50 = vld [vmem:[%s7352_s3 + $0x358] sm:$0xff]  }
 0x10b   : > { %5135 = vmatpush3.bf16.msra.mxu0 %v5623_v21  ;;  %5155 = vmatpush3.bf16.msra.mxu1 %v5624_v61  ;;  %v5650_v21 = vld [vmem:[%s7352_s3 + $0x348] sm:$0xff]   ;;  %v5655_v61 = vld [vmem:[%s7352_s3 + $0x320] sm:$0xff]  }
 0x10c   : > { %5136 = vmatprep.subr.bf16.mxu0 %v7369_v44  ;;  %5156 = vmatprep.subr.bf16.mxu1 %v7369_v44 }
 0x10f   : > { %5137 = vmatpush3.bf16.msra.mxu0 %v5625_v20  ;;  %5157 = vmatpush3.bf16.msra.mxu1 %v5626_v58  ;;  %v5656_v20 = vld [vmem:[%s7352_s3 + $0x360] sm:$0xff]   ;;  %v5657_v58 = vld [vmem:[%s7352_s3 + $0x328] sm:$0xff]  }
 0x110   : > { %5138 = vmatprep.subr.bf16.mxu0 %v7369_v44  ;;  %5158 = vmatprep.subr.bf16.mxu1 %v7369_v44 }
 0x113   : > { %5139 = vmatpush3.bf16.msra.mxu0 %v5627_v59  ;;  %5159 = vmatpush3.bf16.msra.mxu1 %v5628_v52  ;;  %v5658_v59 = vld [vmem:[%s7352_s3 + $0x368] sm:$0xff]   ;;  %v5659_v52 = vld [vmem:[%s7352_s3 + $0x330] sm:$0xff]  }
 0x114   : > { %5140 = vmatprep.subr.bf16.mxu0 %v7369_v44  ;;  %5160 = vmatprep.subr.bf16.mxu1 %v7369_v44 }
 0x117   : > { %5141 = vmatpush3.bf16.msra.mxu0 %v5629_v55  ;;  %5161 = vmatpush3.bf16.msra.mxu1 %v5630_v34  ;;  %v5660_v55 = vld [vmem:[%s7352_s3 + $0x370] sm:$0xff]   ;;  %v5661_v34 = vld [vmem:[%s7352_s3 + $0x338] sm:$0xff]  }
 0x118   : > { %5166 = vmatprep.subr.bf16.mxu0 %v7369_v44  ;;  %5186 = vmatprep.subr.bf16.mxu1 %v7369_v44 }
 0x11a   : > { %5143 = vmatmul.mubr.bf16.vlgmr.msra.gmra.mrb[16].mxu0 %v1602_v30  ;;  %5163 = vmatmul.mubr.bf16.vlgmr.msra.gmra.mrb[16].mxu1 %v7374_v9  ;;  %v5638_v30 = vld [vmem:[%s7352_s3 + $0x2d8] sm:$0xff]   ;;  %v5663_v9 = vld [vmem:[%s7352_s3 + $0x380] sm:$0xff]  }
 0x11b   : > { %5167 = vmatpush3.bf16.msra.mxu0 %v5631_v47  ;;  %5187 = vmatpush3.bf16.msra.mxu1 %v5632_v56  ;;  %v5662_v47 = vld [vmem:[%s7352_s3 + $0x378] sm:$0xff]   ;;  %v2179_v56 = vpack.c.bf16 %v6090_v3, %v6088_v2  ;;  %v5665_v2 = vld [vmem:[%s7352_s3 + $0x388] sm:$0xff]  }
 0x11c   : > { %5168 = vmatprep.subr.bf16.mxu0 %v7369_v44  ;;  %5188 = vmatprep.subr.bf16.mxu1 %v7369_v44  ;;  %v5666_v3 = vld [vmem:[%s7352_s3 + $0x3c8] sm:$0xff]  }
 0x11d   : > { %5182 = vmatprep.mubr.msk.bf16.mxu0 %vm5809_vm0, %v7369_v44  ;;  %5202 = vmatprep.mubr.msk.bf16.mxu1 %vm5809_vm0, %v7369_v44 }
 0x11f   : > { %5169 = vmatpush3.bf16.msra.mxu0 %v5633_v23  ;;  %5189 = vmatpush3.bf16.msra.mxu1 %v5634_v16  ;;  %v5664_v23 = vld [vmem:[%s7352_s3 + $0x3c0] sm:$0xff]   ;;  %v7377_v16 = vpack.c.bf16 %v6303_v12, %v6293_v48  ;;  %v5667_v12 = vld [vmem:[%s7352_s3 + $0x390] sm:$0xff]  }
 0x120   : > { %5170 = vmatprep.subr.bf16.mxu0 %v7369_v44  ;;  %5190 = vmatprep.subr.bf16.mxu1 %v7369_v44  ;;  %v5668_v48 = vld [vmem:[%s7352_s3 + $0x3d0] sm:$0xff]  }
 0x123   : > { %5171 = vmatpush3.bf16.msra.mxu0 %v5635_v1  ;;  %5191 = vmatpush3.bf16.msra.mxu1 %v5636_v42  ;;  %v5669_v1 = vld [vmem:[%s7352_s3 + $0x398] sm:$0xff]  }
 0x124   : > { %5172 = vmatprep.subr.bf16.mxu0 %v7369_v44  ;;  %5192 = vmatprep.subr.bf16.mxu1 %v7369_v44  ;;  %v5670_v42 = vld [vmem:[%s7352_s3 + $0x3d8] sm:$0xff]  }
 0x127   : > { %5173 = vmatpush3.bf16.msra.mxu0 %v5637_v7  ;;  %5193 = vmatpush3.bf16.msra.mxu1 %v5638_v30  ;;  %v5671_v7 = vld [vmem:[%s7352_s3 + $0x3a0] sm:$0xff]  }
 0x128   : > { %5174 = vmatprep.subr.bf16.mxu0 %v7369_v44  ;;  %5194 = vmatprep.subr.bf16.mxu1 %v7369_v44  ;;  %v5672_v30 = vld [vmem:[%s7352_s3 + $0x3e0] sm:$0xff]  }
 0x12b   : > { %5175 = vmatpush3.bf16.msra.mxu0 %v5639_v25  ;;  %5195 = vmatpush3.bf16.msra.mxu1 %v5640_v27  ;;  %v5673_v25 = vld [vmem:[%s7352_s3 + $0x3a8] sm:$0xff]  }
 0x12c   : > { %5176 = vmatprep.subr.bf16.mxu0 %v7369_v44  ;;  %5196 = vmatprep.subr.bf16.mxu1 %v7369_v44  ;;  %v5674_v27 = vld [vmem:[%s7352_s3 + $0x3e8] sm:$0xff]  }
 0x12f   : > { %5177 = vmatpush3.bf16.msra.mxu0 %v5641_v5  ;;  %5197 = vmatpush3.bf16.msra.mxu1 %v5642_v60 }
 0x130   : > { %5178 = vmatprep.subr.bf16.mxu0 %v7369_v44  ;;  %5198 = vmatprep.subr.bf16.mxu1 %v7369_v44 }
 0x133   : > { %5179 = vmatpush3.bf16.msra.mxu0 %v5643_v29  ;;  %5199 = vmatpush3.bf16.msra.mxu1 %v5644_v6 }
 0x134   : > { %5180 = vmatprep.subr.bf16.mxu0 %v7369_v44  ;;  %5200 = vmatprep.subr.bf16.mxu1 %v7369_v44 }
 0x137   : > { %5181 = vmatpush3.bf16.msra.mxu0 %v5645_v22  ;;  %5201 = vmatpush3.bf16.msra.mxu1 %v5646_v35 }
 0x138   : > { %5206 = vmatprep.subr.bf16.mxu0 %v7369_v44  ;;  %5226 = vmatprep.subr.bf16.mxu1 %v7369_v44 }
 0x13a   : > { %5183 = vmatmul.mubr.bf16.vlgmr.msra.gmra.mrb[20].mxu0 %v7375_v53  ;;  %5203 = vmatmul.mubr.bf16.vlgmr.msra.gmra.mrb[20].mxu1 %v7376_v41  ;;  %v5676_v53 = vld [vmem:[%s7352_s3 + $0x3f0] sm:$0xff]  }
 0x13b   : > { %5207 = vmatpush3.bf16.msra.mxu0 %v5647_v54  ;;  %5227 = vmatpush3.bf16.msra.mxu1 %v5648_v13  ;;  %v5675_v13 = vld [vmem:[%s7352_s3 + $0x3b0] sm:$0xff]  }
 0x13c   : > { %5208 = vmatprep.subr.bf16.mxu0 %v7369_v44  ;;  %5228 = vmatprep.subr.bf16.mxu1 %v7369_v44 }
 0x13d   : > { %5222 = vmatprep.mubr.msk.bf16.mxu0 %vm5809_vm0, %v7369_v44  ;;  %5242 = vmatprep.mubr.msk.bf16.mxu1 %vm5809_vm0, %v7369_v44 }
 0x13f   : > { %5209 = vmatpush3.bf16.msra.mxu0 %v5649_v33  ;;  %5229 = vmatpush3.bf16.msra.mxu1 %v5650_v21 }
 0x140   : > { %5210 = vmatprep.subr.bf16.mxu0 %v7369_v44  ;;  %5230 = vmatprep.subr.bf16.mxu1 %v7369_v44 }
 0x143   : > { %5211 = vmatpush3.bf16.msra.mxu0 %v5651_v38  ;;  %5231 = vmatpush3.bf16.msra.mxu1 %v5652_v62  ;;  %v5677_v38 = vld [vmem:[%s7352_s3 + $0x3b8] sm:$0xff]  }
 0x144   : > { %5212 = vmatprep.subr.bf16.mxu0 %v7369_v44  ;;  %5232 = vmatprep.subr.bf16.mxu1 %v7369_v44  ;;  %v5678_v62 = vld [vmem:[%s7352_s3 + $0x3f8] sm:$0xff]  }
 0x147   : > { %5213 = vmatpush3.bf16.msra.mxu0 %v5653_v36  ;;  %5233 = vmatpush3.bf16.msra.mxu1 %v5654_v50  ;;  %v5679_v36 = vld [vmem:[%s7352_s3 + $0x400] sm:$0xff]  }
 0x148   : > { %5214 = vmatprep.subr.bf16.mxu0 %v7369_v44  ;;  %5234 = vmatprep.subr.bf16.mxu1 %v7369_v44  ;;  %v5680_v50 = vld [vmem:[%s7352_s3 + $0x440] sm:$0xff]  }
 0x14b   : > { %5215 = vmatpush3.bf16.msra.mxu0 %v5655_v61  ;;  %5235 = vmatpush3.bf16.msra.mxu1 %v5656_v20  ;;  %v7378_v61 = vpack.c.bf16 %v6338_v24, %v6331_v31  ;;  %v7379_v20 = vpack.c.bf16 %v6369_v0, %v6360_v46  ;;  %v5683_v24 = vld [vmem:[%s7352_s3 + $0x410] sm:$0xff]   ;;  %v5685_v0 = vld [vmem:[%s7352_s3 + $0x418] sm:$0xff]  }
 0x14c   : > { %5216 = vmatprep.subr.bf16.mxu0 %v7369_v44  ;;  %5236 = vmatprep.subr.bf16.mxu1 %v7369_v44  ;;  %v5684_v31 = vld [vmem:[%s7352_s3 + $0x450] sm:$0xff]   ;;  %v5686_v46 = vld [vmem:[%s7352_s3 + $0x458] sm:$0xff]  }
 0x14f   : > { %5217 = vmatpush3.bf16.msra.mxu0 %v5657_v58  ;;  %5237 = vmatpush3.bf16.msra.mxu1 %v5658_v59  ;;  %v5681_v58 = vld [vmem:[%s7352_s3 + $0x408] sm:$0xff]  }
 0x150   : > { %5218 = vmatprep.subr.bf16.mxu0 %v7369_v44  ;;  %5238 = vmatprep.subr.bf16.mxu1 %v7369_v44  ;;  %v5682_v59 = vld [vmem:[%s7352_s3 + $0x448] sm:$0xff]  }
 0x153   : > { %5219 = vmatpush3.bf16.msra.mxu0 %v5659_v52  ;;  %5239 = vmatpush3.bf16.msra.mxu1 %v5660_v55  ;;  %v5687_v52 = vld [vmem:[%s7352_s3 + $0x420] sm:$0xff]  }
 0x154   : > { %5220 = vmatprep.subr.bf16.mxu0 %v7369_v44  ;;  %5240 = vmatprep.subr.bf16.mxu1 %v7369_v44  ;;  %v5688_v55 = vld [vmem:[%s7352_s3 + $0x460] sm:$0xff]  }
 0x157   : > { %5221 = vmatpush3.bf16.msra.mxu0 %v5661_v34  ;;  %5241 = vmatpush3.bf16.msra.mxu1 %v5662_v47  ;;  %v5689_v34 = vld [vmem:[%s7352_s3 + $0x428] sm:$0xff]  }
 0x158   : > { %5246 = vmatprep.subr.bf16.mxu0 %v7369_v44  ;;  %5266 = vmatprep.subr.bf16.mxu1 %v7369_v44  ;;  %v5690_v47 = vld [vmem:[%s7352_s3 + $0x468] sm:$0xff]  }
 0x15a   : > { %5223 = vmatmul.mubr.bf16.vlgmr.msra.gmra.mrb[24].mxu0 %v7377_v16  ;;  %5243 = vmatmul.mubr.bf16.vlgmr.msra.gmra.mrb[24].mxu1 %v2179_v56 }
 0x15b   : > { %5247 = vmatpush3.bf16.msra.mxu0 %v5663_v9  ;;  %5267 = vmatpush3.bf16.msra.mxu1 %v5664_v23 }
 0x15c   : > { %5248 = vmatprep.subr.bf16.mxu0 %v7369_v44  ;;  %5268 = vmatprep.subr.bf16.mxu1 %v7369_v44 }
 0x15d   : > { %5262 = vmatprep.mubr.msk.bf16.mxu0 %vm5809_vm0, %v7369_v44  ;;  %5282 = vmatprep.mubr.msk.bf16.mxu1 %vm5809_vm0, %v7369_v44 }
 0x15f   : > { %5249 = vmatpush3.bf16.msra.mxu0 %v5665_v2  ;;  %5269 = vmatpush3.bf16.msra.mxu1 %v5666_v3 }
 0x160   : > { %5250 = vmatprep.subr.bf16.mxu0 %v7369_v44  ;;  %5270 = vmatprep.subr.bf16.mxu1 %v7369_v44 }
 0x163   : > { %5251 = vmatpush3.bf16.msra.mxu0 %v5667_v12  ;;  %5271 = vmatpush3.bf16.msra.mxu1 %v5668_v48  ;;  %v5691_v48 = vld [vmem:[%s7352_s3 + $0x430] sm:$0xff]  }
 0x164   : > { %5252 = vmatprep.subr.bf16.mxu0 %v7369_v44  ;;  %5272 = vmatprep.subr.bf16.mxu1 %v7369_v44 }
 0x167   : > { %5253 = vmatpush3.bf16.msra.mxu0 %v5669_v1  ;;  %5273 = vmatpush3.bf16.msra.mxu1 %v5670_v42  ;;  %v5692_v1 = vld [vmem:[%s7352_s3 + $0x470] sm:$0xff]  }
 0x168   : > { %5254 = vmatprep.subr.bf16.mxu0 %v7369_v44  ;;  %5274 = vmatprep.subr.bf16.mxu1 %v7369_v44 }
 0x16b   : > { %5255 = vmatpush3.bf16.msra.mxu0 %v5671_v7  ;;  %5275 = vmatpush3.bf16.msra.mxu1 %v5672_v30 }
 0x16c   : > { %5256 = vmatprep.subr.bf16.mxu0 %v7369_v44  ;;  %5276 = vmatprep.subr.bf16.mxu1 %v7369_v44 }
 0x16d   : > { %v765_v5 = vpop.f32.mrb[0].mxu0  ;;  %v854_v60 = vpop.f32.mrb[0].mxu1 }
 0x16e   : > { %v855_v29 = vadd.f32 %v854_v60, %v765_v5  ;;  %v4984_v6 = vpop.f32.mrb[1].mxu0  ;;  %v5004_v22 = vpop.f32.mrb[1].mxu1  ;;  %v5693_v5 = vld [vmem:[%s7352_s3 + $0x438] sm:$0xff]  }
 0x16f   : > { %5257 = vmatpush3.bf16.msra.mxu0 %v5673_v25  ;;  %5277 = vmatpush3.bf16.msra.mxu1 %v5674_v27  ;;  %v768_v35 = vpop.f32.mrb[2].mxu0  ;;  %v857_v54 = vpop.f32.mrb[2].mxu1  ;;  %v5694_v60 = vld [vmem:[%s7352_s3 + $0x478] sm:$0xff]   ;;  %v5696_v6 = vld [vmem:[%s7352_s3 + $0x4c0] sm:$0xff]   ;;  %v7380_v22 = vpack.c.bf16 %v6403_v17, %v6394_v45  ;;  %v5699_v17 = vld [vmem:[%s7352_s3 + $0x490] sm:$0xff]  }
 0x170   : > { %v6895_v41 = vadd.f32 %v857_v54, %v768_v35  ;;  %v4985_v33 = vpop.f32.mrb[3].mxu0  ;;  %5258 = vmatprep.subr.bf16.mxu0 %v7369_v44  ;;  %5278 = vmatprep.subr.bf16.mxu1 %v7369_v44  ;;  %v5005_v21 = vpop.f32.mrb[3].mxu1  ;;  %v5697_v35 = vld [vmem:[%s7352_s3 + $0x488] sm:$0xff]   ;;  %v5700_v45 = vld [vmem:[%s7352_s3 + $0x4d0] sm:$0xff]  }
 0x171   : > { %v5698_v54 = vld [vmem:[%s7352_s3 + $0x4c8] sm:$0xff]  }
 0x173   : > { %5259 = vmatpush3.bf16.msra.mxu0 %v5675_v13  ;;  %5279 = vmatpush3.bf16.msra.mxu1 %v5676_v53  ;;  %v5704_v13 = vld [vmem:[%s7352_s3 + $0x4e0] sm:$0xff]   ;;  %v5705_v53 = vld [vmem:[%s7352_s3 + $0x4a8] sm:$0xff]  }
 0x174   : > { %5260 = vmatprep.subr.bf16.mxu0 %v7369_v44  ;;  %5280 = vmatprep.subr.bf16.mxu1 %v7369_v44 }
 0x177   : > { %5261 = vmatpush3.bf16.msra.mxu0 %v5677_v38  ;;  %5281 = vmatpush3.bf16.msra.mxu1 %v5678_v62 }
 0x178   : > { %5286 = vmatprep.subr.bf16.mxu0 %v7369_v44  ;;  %5306 = vmatprep.subr.bf16.mxu1 %v7369_v44 }
 0x17a   : > { %5263 = vmatmul.mubr.bf16.vlgmr.msra.gmra.mrb[28].mxu0 %v7378_v61  ;;  %5283 = vmatmul.mubr.bf16.vlgmr.msra.gmra.mrb[28].mxu1 %v7379_v20  ;;  %v5707_v20 = vld [vmem:[%s7352_s3 + $0x4b0] sm:$0xff]  }
 0x17b   : > { %5287 = vmatpush3.bf16.msra.mxu0 %v5679_v36  ;;  %5307 = vmatpush3.bf16.msra.mxu1 %v5680_v50 }
 0x17c   : > { %5288 = vmatprep.subr.bf16.mxu0 %v7369_v44  ;;  %5308 = vmatprep.subr.bf16.mxu1 %v7369_v44 }
 0x17d   : > { %5302 = vmatprep.mubr.msk.bf16.mxu0 %vm5809_vm0, %v7369_v44  ;;  %5322 = vmatprep.mubr.msk.bf16.mxu1 %vm5809_vm0, %v7369_v44 }
 0x17f   : > { %5289 = vmatpush3.bf16.msra.mxu0 %v5681_v58  ;;  %5309 = vmatpush3.bf16.msra.mxu1 %v5682_v59  ;;  %v5708_v58 = vld [vmem:[%s7352_s3 + $0x4f0] sm:$0xff]  }
 0x180   : > { %5290 = vmatprep.subr.bf16.mxu0 %v7369_v44  ;;  %5310 = vmatprep.subr.bf16.mxu1 %v7369_v44 }
 0x183   : > { %5291 = vmatpush3.bf16.msra.mxu0 %v5683_v24  ;;  %5311 = vmatpush3.bf16.msra.mxu1 %v5684_v31 }
 0x184   : > { %5292 = vmatprep.subr.bf16.mxu0 %v7369_v44  ;;  %5312 = vmatprep.subr.bf16.mxu1 %v7369_v44 }
 0x187   : > { %5293 = vmatpush3.bf16.msra.mxu0 %v5685_v0  ;;  %5313 = vmatpush3.bf16.msra.mxu1 %v5686_v46 }
 0x188   : > { %5294 = vmatprep.subr.bf16.mxu0 %v7369_v44  ;;  %5314 = vmatprep.subr.bf16.mxu1 %v7369_v44 }
 0x18b   : > { %5295 = vmatpush3.bf16.msra.mxu0 %v5687_v52  ;;  %5315 = vmatpush3.bf16.msra.mxu1 %v5688_v55  ;;  %v5709_v52 = vld [vmem:[%s7352_s3 + $0x4b8] sm:$0xff]  }
 0x18c   : > { %5296 = vmatprep.subr.bf16.mxu0 %v7369_v44  ;;  %5316 = vmatprep.subr.bf16.mxu1 %v7369_v44  ;;  %v5710_v55 = vld [vmem:[%s7352_s3 + $0x4f8] sm:$0xff]  }
 0x18d   : > { %v978_v56 = vpop.f32.mrb[4].mxu0  ;;  %v1104_v9 = vpop.f32.mrb[4].mxu1 }
 0x18e   : > { %v985_v23 = vadd.f32 %v978_v56, %v855_v29  ;;  %v5024_v16 = vpop.f32.mrb[5].mxu0  ;;  %v5044_v2 = vpop.f32.mrb[5].mxu1  ;;  %v5695_v29 = vld [vmem:[%s7352_s3 + $0x480] sm:$0xff]   ;;  %v7381_v56 = vpack.c.bf16 %v6210_v8, %v6165_v43  ;;  %v5716_v43 = vld [vmem:[%s7352_s3 + $0x550] sm:$0xff]   ;;  %v5718_v8 = vld [vmem:[%s7352_s3 + $0x558] sm:$0xff]  }
 0x18f   : > { %v981_v3 = vpop.f32.mrb[6].mxu0  ;;  %v1107_v12 = vpop.f32.mrb[6].mxu1  ;;  %5297 = vmatpush3.bf16.msra.mxu0 %v5689_v34  ;;  %5317 = vmatpush3.bf16.msra.mxu1 %v5690_v47  ;;  %v5711_v34 = vld [vmem:[%s7352_s3 + $0x500] sm:$0xff]   ;;  %v5714_v16 = vld [vmem:[%s7352_s3 + $0x548] sm:$0xff]  }
 0x190   : > { %v1111_v42 = vadd.f32 %v1104_v9, %v985_v23  ;;  %v986_v7 = vadd.f32 %v981_v3, %v6895_v41  ;;  %v5025_v30 = vpop.f32.mrb[7].mxu0  ;;  %v5045_v25 = vpop.f32.mrb[7].mxu1  ;;  %5298 = vmatprep.subr.bf16.mxu0 %v7369_v44  ;;  %5318 = vmatprep.subr.bf16.mxu1 %v7369_v44  ;;  %v5706_v41 = vld [vmem:[%s7352_s3 + $0x4e8] sm:$0xff]   ;;  %v5712_v47 = vld [vmem:[%s7352_s3 + $0x540] sm:$0xff]   ;;  %v7382_v9 = vpack.c.bf16 %v6203_v4, %v6151_v39  ;;  %v5715_v39 = vld [vmem:[%s7352_s3 + $0x510] sm:$0xff]  }
 0x191   : > { %v5713_v23 = vld [vmem:[%s7352_s3 + $0x508] sm:$0xff]   ;;  %v5717_v4 = vld [vmem:[%s7352_s3 + $0x518] sm:$0xff]   ;;  %v5719_v2 = vld [vmem:[%s7352_s3 + $0x520] sm:$0xff]  }
 0x192   : > { %v1112_v27 = vadd.f32 %v1107_v12, %v986_v7  ;;  %v5720_v3 = vld [vmem:[%s7352_s3 + $0x560] sm:$0xff]   ;;  %v5721_v12 = vld [vmem:[%s7352_s3 + $0x528] sm:$0xff]  }
 0x193   : > { %5299 = vmatpush3.bf16.msra.mxu0 %v5691_v48  ;;  %5319 = vmatpush3.bf16.msra.mxu1 %v5692_v1  ;;  %v5722_v48 = vld [vmem:[%s7352_s3 + $0x568] sm:$0xff]  }
 0x194   : > { %5300 = vmatprep.subr.bf16.mxu0 %v7369_v44  ;;  %5320 = vmatprep.subr.bf16.mxu1 %v7369_v44 }
 0x197   : > { %5301 = vmatpush3.bf16.msra.mxu0 %v5693_v5  ;;  %5321 = vmatpush3.bf16.msra.mxu1 %v5694_v60  ;;  %v5723_v60 = vld [vmem:[%s7352_s3 + $0x530] sm:$0xff]  }
 0x198   : > { %5326 = vmatprep.subr.bf16.mxu0 %v7369_v44  ;;  %5346 = vmatprep.subr.bf16.mxu1 %v7369_v44 }
 0x19a   : > { %5303 = vmatmul.mubr.bf16.vlgmr.msra.gmra.mrb[32].mxu0 %v7380_v22  ;;  %5323 = vmatmul.mubr.bf16.vlgmr.msra.gmra.mrb[32].mxu1 %v2627_v57  ;;  %v5703_v57 = vld [vmem:[%s7352_s3 + $0x4a0] sm:$0xff]  }
 0x19b   : > { %5327 = vmatpush3.bf16.msra.mxu0 %v5695_v29  ;;  %5347 = vmatpush3.bf16.msra.mxu1 %v5696_v6  ;;  %v5724_v29 = vld [vmem:[%s7352_s3 + $0x570] sm:$0xff]  }
 0x19c   : > { %5328 = vmatprep.subr.bf16.mxu0 %v7369_v44  ;;  %5348 = vmatprep.subr.bf16.mxu1 %v7369_v44 }
 0x19d   : > { %5342 = vmatprep.mubr.msk.bf16.mxu0 %vm5809_vm0, %v7369_v44  ;;  %5362 = vmatprep.mubr.msk.bf16.mxu1 %vm5809_vm0, %v7369_v44 }
 0x19f   : > { %5329 = vmatpush3.bf16.msra.mxu0 %v5697_v35  ;;  %5349 = vmatpush3.bf16.msra.mxu1 %v5698_v54 }
 0x1a0   : > { %5330 = vmatprep.subr.bf16.mxu0 %v7369_v44  ;;  %5350 = vmatprep.subr.bf16.mxu1 %v7369_v44 }
 0x1a3   : > { %5331 = vmatpush3.bf16.msra.mxu0 %v5699_v17  ;;  %5351 = vmatpush3.bf16.msra.mxu1 %v5700_v45  ;;  %v5725_v45 = vld [vmem:[%s7352_s3 + $0x538] sm:$0xff]  }
 0x1a4   : > { %5332 = vmatprep.subr.bf16.mxu0 %v7369_v44  ;;  %5352 = vmatprep.subr.bf16.mxu1 %v7369_v44 }
 0x1a7   : > { %5333 = vmatpush3.bf16.msra.mxu0 %v5701_v26  ;;  %5353 = vmatpush3.bf16.msra.mxu1 %v5702_v40  ;;  %v5726_v26 = vld [vmem:[%s7352_s3 + $0x578] sm:$0xff]   ;;  %v5727_v40 = vld [vmem:[%s7352_s3 + $0x580] sm:$0xff]  }
 0x1a8   : > { %5334 = vmatprep.subr.bf16.mxu0 %v7369_v44  ;;  %5354 = vmatprep.subr.bf16.mxu1 %v7369_v44 }
 0x1ab   : > { %5335 = vmatpush3.bf16.msra.mxu0 %v5703_v57  ;;  %5355 = vmatpush3.bf16.msra.mxu1 %v5704_v13  ;;  %v5728_v57 = vld [vmem:[%s7352_s3 + $0x5c0] sm:$0xff]   ;;  %v7383_v13 = vpack.c.bf16 %v6252_v37, %v6262_v51  ;;  %v5731_v37 = vld [vmem:[%s7352_s3 + $0x590] sm:$0xff]  }
 0x1ac   : > { %5336 = vmatprep.subr.bf16.mxu0 %v7369_v44  ;;  %5356 = vmatprep.subr.bf16.mxu1 %v7369_v44  ;;  %v5732_v51 = vld [vmem:[%s7352_s3 + $0x5d0] sm:$0xff]  }
 0x1ad   : > { %v1213_v33 = vpop.f32.mrb[8].mxu0  ;;  %v1339_v21 = vpop.f32.mrb[8].mxu1 }
 0x1ae   : > { %v1220_v38 = vadd.f32 %v1213_v33, %v1111_v42  ;;  %v5064_v62 = vpop.f32.mrb[9].mxu0  ;;  %v5084_v36 = vpop.f32.mrb[9].mxu1  ;;  %v5730_v33 = vld [vmem:[%s7352_s3 + $0x5c8] sm:$0xff]  }
 0x1af   : > { %v1216_v50 = vpop.f32.mrb[10].mxu0  ;;  %v1342_v61 = vpop.f32.mrb[10].mxu1  ;;  %5337 = vmatpush3.bf16.msra.mxu0 %v5705_v53  ;;  %5357 = vmatpush3.bf16.msra.mxu1 %v5706_v41  ;;  %v7384_v53 = vpack.c.bf16 %v6306_v19, %v6296_v49  ;;  %v5729_v41 = vld [vmem:[%s7352_s3 + $0x588] sm:$0xff]   ;;  %v5733_v19 = vld [vmem:[%s7352_s3 + $0x598] sm:$0xff]  }
 0x1b0   : > { %v1346_v59 = vadd.f32 %v1339_v21, %v1220_v38  ;;  %v1221_v24 = vadd.f32 %v1216_v50, %v1112_v27  ;;  %v5065_v31 = vpop.f32.mrb[11].mxu0  ;;  %v5085_v0 = vpop.f32.mrb[11].mxu1  ;;  %5338 = vmatprep.subr.bf16.mxu0 %v7369_v44  ;;  %5358 = vmatprep.subr.bf16.mxu1 %v7369_v44  ;;  %v5734_v49 = vld [vmem:[%s7352_s3 + $0x5d8] sm:$0xff]   ;;  %v5735_v21 = vld [vmem:[%s7352_s3 + $0x5a0] sm:$0xff]   ;;  %v5737_v62 = vld [vmem:[%s7352_s3 + $0x5a8] sm:$0xff]  }
 0x1b1   : > { %v5736_v38 = vld [vmem:[%s7352_s3 + $0x5e0] sm:$0xff]   ;;  %v5738_v36 = vld [vmem:[%s7352_s3 + $0x5e8] sm:$0xff]   ;;  %v5739_v0 = vld [vmem:[%s7352_s3 + $0x5b0] sm:$0xff]  }
 0x1b2   : > { %v1347_v46 = vadd.f32 %v1342_v61, %v1221_v24 }
 0x1b3   : > { %5339 = vmatpush3.bf16.msra.mxu0 %v5707_v20  ;;  %5359 = vmatpush3.bf16.msra.mxu1 %v5708_v58 }
 0x1b4   : > { %5340 = vmatprep.subr.bf16.mxu0 %v7369_v44  ;;  %5360 = vmatprep.subr.bf16.mxu1 %v7369_v44 }
 0x1b7   : > { %5341 = vmatpush3.bf16.msra.mxu0 %v5709_v52  ;;  %5361 = vmatpush3.bf16.msra.mxu1 %v5710_v55 }
 0x1b8   : > { %5366 = vmatprep.subr.bf16.mxu0 %v7369_v44  ;;  %5386 = vmatprep.subr.bf16.mxu1 %v7369_v44 }
 0x1ba   : > { %5343 = vmatmul.mubr.bf16.vlgmr.msra.gmra.mrb[36].mxu0 %v7381_v56  ;;  %5363 = vmatmul.mubr.bf16.vlgmr.msra.gmra.mrb[36].mxu1 %v7382_v9  ;;  %v5741_v9 = vld [vmem:[%s7352_s3 + $0x5b8] sm:$0xff]  }
 0x1bb   : > { %5367 = vmatpush3.bf16.msra.mxu0 %v5711_v34  ;;  %5387 = vmatpush3.bf16.msra.mxu1 %v5712_v47 }
 0x1bc   : > { %5368 = vmatprep.subr.bf16.mxu0 %v7369_v44  ;;  %5388 = vmatprep.subr.bf16.mxu1 %v7369_v44 }
 0x1bd   : > { %5382 = vmatprep.mubr.msk.bf16.mxu0 %vm5809_vm0, %v7369_v44  ;;  %5402 = vmatprep.mubr.msk.bf16.mxu1 %vm5809_vm0, %v7369_v44 }
 0x1bf   : > { %5369 = vmatpush3.bf16.msra.mxu0 %v5713_v23  ;;  %5389 = vmatpush3.bf16.msra.mxu1 %v5714_v16  ;;  %v5742_v23 = vld [vmem:[%s7352_s3 + $0x5f8] sm:$0xff]   ;;  %v3214_v16 = vpack.c.bf16 %v6101_v15, %v6099_v14  ;;  %v5745_v14 = vld [vmem:[%s7352_s3 + $0x608] sm:$0xff]  }
 0x1c0   : > { %5370 = vmatprep.subr.bf16.mxu0 %v7369_v44  ;;  %5390 = vmatprep.subr.bf16.mxu1 %v7369_v44  ;;  %v5746_v15 = vld [vmem:[%s7352_s3 + $0x648] sm:$0xff]  }
 0x1c3   : > { %5371 = vmatpush3.bf16.msra.mxu0 %v5715_v39  ;;  %5391 = vmatpush3.bf16.msra.mxu1 %v5716_v43  ;;  %v5743_v39 = vld [vmem:[%s7352_s3 + $0x600] sm:$0xff]  }
 0x1c4   : > { %5372 = vmatprep.subr.bf16.mxu0 %v7369_v44  ;;  %5392 = vmatprep.subr.bf16.mxu1 %v7369_v44  ;;  %v5744_v43 = vld [vmem:[%s7352_s3 + $0x640] sm:$0xff]  }
 0x1c7   : > { %5373 = vmatpush3.bf16.msra.mxu0 %v5717_v4  ;;  %5393 = vmatpush3.bf16.msra.mxu1 %v5718_v8  ;;  %v7385_v4 = vpack.c.bf16 %v6340_v11, %v6333_v32  ;;  %v5747_v11 = vld [vmem:[%s7352_s3 + $0x610] sm:$0xff]   ;;  %v5749_v8 = vld [vmem:[%s7352_s3 + $0x618] sm:$0xff]  }
 0x1c8   : > { %5374 = vmatprep.subr.bf16.mxu0 %v7369_v44  ;;  %5394 = vmatprep.subr.bf16.mxu1 %v7369_v44  ;;  %v5748_v32 = vld [vmem:[%s7352_s3 + $0x650] sm:$0xff]  }
 0x1cb   : > { %5375 = vmatpush3.bf16.msra.mxu0 %v5719_v2  ;;  %5395 = vmatpush3.bf16.msra.mxu1 %v5720_v3  ;;  %v5750_v2 = vld [vmem:[%s7352_s3 + $0x658] sm:$0xff]   ;;  %v5751_v3 = vld [vmem:[%s7352_s3 + $0x620] sm:$0xff]  }
 0x1cc   : > { %5376 = vmatprep.subr.bf16.mxu0 %v7369_v44  ;;  %5396 = vmatprep.subr.bf16.mxu1 %v7369_v44 }
 0x1cd   : > { %v1460_v1 = vpop.f32.mrb[12].mxu0  ;;  %v1581_v42 = vpop.f32.mrb[12].mxu1 }
 0x1ce   : > { %v1467_v7 = vadd.f32 %v1460_v1, %v1346_v59  ;;  %v5104_v30 = vpop.f32.mrb[13].mxu0  ;;  %v5124_v25 = vpop.f32.mrb[13].mxu1  ;;  %v5754_v1 = vld [vmem:[%s7352_s3 + $0x668] sm:$0xff]  }
 0x1cf   : > { %v1463_v27 = vpop.f32.mrb[14].mxu0  ;;  %v1584_v5 = vpop.f32.mrb[14].mxu1  ;;  %5377 = vmatpush3.bf16.msra.mxu0 %v5721_v12  ;;  %5397 = vmatpush3.bf16.msra.mxu1 %v5722_v48  ;;  %v5752_v12 = vld [vmem:[%s7352_s3 + $0x660] sm:$0xff]   ;;  %v5753_v48 = vld [vmem:[%s7352_s3 + $0x628] sm:$0xff]  }
 0x1d0   : > { %v1588_v6 = vadd.f32 %v1581_v42, %v1467_v7  ;;  %v1468_v22 = vadd.f32 %v1463_v27, %v1347_v46  ;;  %v5105_v35 = vpop.f32.mrb[15].mxu0  ;;  %v5125_v54 = vpop.f32.mrb[15].mxu1  ;;  %5378 = vmatprep.subr.bf16.mxu0 %v7369_v44  ;;  %5398 = vmatprep.subr.bf16.mxu1 %v7369_v44  ;;  %v5740_v46 = vld [vmem:[%s7352_s3 + $0x5f0] sm:$0xff]  }
 0x1d2   : > { %v1589_v17 = vadd.f32 %v1584_v5, %v1468_v22 }
 0x1d3   : > { %5379 = vmatpush3.bf16.msra.mxu0 %v5723_v60  ;;  %5399 = vmatpush3.bf16.msra.mxu1 %v5724_v29  ;;  %v5755_v29 = vld [vmem:[%s7352_s3 + $0x630] sm:$0xff]  }
 0x1d4   : > { %5380 = vmatprep.subr.bf16.mxu0 %v7369_v44  ;;  %5400 = vmatprep.subr.bf16.mxu1 %v7369_v44 }
 0x1d7   : > { %5381 = vmatpush3.bf16.msra.mxu0 %v5725_v45  ;;  %5401 = vmatpush3.bf16.msra.mxu1 %v5726_v26  ;;  %v5757_v26 = vld [vmem:[%s7352_s3 + $0x638] sm:$0xff]  }
 0x1d8   : > { %5406 = vmatprep.subr.bf16.mxu0 %v7369_v44  ;;  %5426 = vmatprep.subr.bf16.mxu1 %v7369_v44 }
 0x1da   : > { %5383 = vmatmul.mubr.bf16.vlgmr.msra.gmra.mrb[40].mxu0 %v7383_v13  ;;  %5403 = vmatmul.mubr.bf16.vlgmr.msra.gmra.mrb[40].mxu1 %v7384_v53  ;;  %v7386_v13 = vld [vmem:[#allocation3_spill] sm:$0xff] }
 0x1db   : > { %5407 = vmatpush3.bf16.msra.mxu0 %v5727_v40  ;;  %5427 = vmatpush3.bf16.msra.mxu1 %v5728_v57  ;;  %v5758_v40 = vld [vmem:[%s7352_s3 + $0x678] sm:$0xff]   ;;  %v5759_v57 = vld [vmem:[%s7352_s3 + $0x680] sm:$0xff]   ;;  %v7387_v53 = vpack.c.bf16 %v6372_v63, %v7386_v13  ;;  %v5761_v63 = vld [vmem:[%s7352_s3 + $0x690] sm:$0xff]  }
 0x1dc   : > { %5408 = vmatprep.subr.bf16.mxu0 %v7369_v44  ;;  %5428 = vmatprep.subr.bf16.mxu1 %v7369_v44 }
 0x1dd   : > { %5422 = vmatprep.mubr.msk.bf16.mxu0 %vm5809_vm0, %v7369_v44  ;;  %5442 = vmatprep.mubr.msk.bf16.mxu1 %vm5809_vm0, %v7369_v44 }
 0x1df   : > { %5409 = vmatpush3.bf16.msra.mxu0 %v5729_v41  ;;  %5429 = vmatpush3.bf16.msra.mxu1 %v5730_v33  ;;  %v7388_v41 = vld [vmem:[#allocation5_spill] sm:$0xff]  ;;  %v7389_v33 = vld [vmem:[#allocation4_spill] sm:$0xff] }
 0x1e0   : > { %5410 = vmatprep.subr.bf16.mxu0 %v7369_v44  ;;  %5430 = vmatprep.subr.bf16.mxu1 %v7369_v44 }
 0x1e3   : > { %5411 = vmatpush3.bf16.msra.mxu0 %v5731_v37  ;;  %5431 = vmatpush3.bf16.msra.mxu1 %v5732_v51  ;;  %v7390_v37 = vpack.c.bf16 %v7388_v41, %v7389_v33  ;;  %v5760_v51 = vld [vmem:[%s7352_s3 + $0x688] sm:$0xff]  }
 0x1e4   : > { %5412 = vmatprep.subr.bf16.mxu0 %v7369_v44  ;;  %5432 = vmatprep.subr.bf16.mxu1 %v7369_v44 }
 0x1e7   : > { %5413 = vmatpush3.bf16.msra.mxu0 %v5733_v19  ;;  %5433 = vmatpush3.bf16.msra.mxu1 %v5734_v49  ;;  %v5762_v19 = vld [vmem:[%s7352_s3 + $0x698] sm:$0xff]   ;;  %v5763_v49 = vld [vmem:[%s7352_s3 + $0x6a0] sm:$0xff]  }
 0x1e8   : > { %5414 = vmatprep.subr.bf16.mxu0 %v7369_v44  ;;  %5434 = vmatprep.subr.bf16.mxu1 %v7369_v44 }
 0x1eb   : > { %5415 = vmatpush3.bf16.msra.mxu0 %v5735_v21  ;;  %5435 = vmatpush3.bf16.msra.mxu1 %v5736_v38  ;;  %v5764_v21 = vld [vmem:[%s7352_s3 + $0x6a8] sm:$0xff]  }
 0x1ec   : > { %5416 = vmatprep.subr.bf16.mxu0 %v7369_v44  ;;  %5436 = vmatprep.subr.bf16.mxu1 %v7369_v44 }
 0x1ed   : > { %v1702_v50 = vpop.f32.mrb[16].mxu0  ;;  %v1825_v61 = vpop.f32.mrb[16].mxu1 }
 0x1ee   : > { %v1709_v20 = vadd.f32 %v1702_v50, %v1588_v6  ;;  %v5144_v58 = vpop.f32.mrb[17].mxu0  ;;  %v5164_v59 = vpop.f32.mrb[17].mxu1  ;;  %v5756_v6 = vld [vmem:[%s7352_s3 + $0x670] sm:$0xff]  }
 0x1ef   : > { %v1705_v24 = vpop.f32.mrb[18].mxu0  ;;  %v1828_v31 = vpop.f32.mrb[18].mxu1  ;;  %5417 = vmatpush3.bf16.msra.mxu0 %v5737_v62  ;;  %5437 = vmatpush3.bf16.msra.mxu1 %v5738_v36  ;;  %v5765_v59 = vld [vmem:[%s7352_s3 + $0x6b0] sm:$0xff]  }
 0x1f0   : > { %v1832_v52 = vadd.f32 %v1825_v61, %v1709_v20  ;;  %v1710_v55 = vadd.f32 %v1705_v24, %v1589_v17  ;;  %v5145_v34 = vpop.f32.mrb[19].mxu0  ;;  %v5165_v47 = vpop.f32.mrb[19].mxu1  ;;  %5418 = vmatprep.subr.bf16.mxu0 %v7369_v44  ;;  %5438 = vmatprep.subr.bf16.mxu1 %v7369_v44 }
 0x1f2   : > { %v1833_v56 = vadd.f32 %v1828_v31, %v1710_v55  ;;  %v5766_v55 = vld [vmem:[%s7352_s3 + $0x6b8] sm:$0xff]  }
 0x1f3   : > { %5419 = vmatpush3.bf16.msra.mxu0 %v5739_v0  ;;  %5439 = vmatpush3.bf16.msra.mxu1 %v5740_v46 }
 0x1f4   : > { %5420 = vmatprep.subr.bf16.mxu0 %v7369_v44  ;;  %5440 = vmatprep.subr.bf16.mxu1 %v7369_v44 }
 0x1f7   : > { %5421 = vmatpush3.bf16.msra.mxu0 %v5741_v9  ;;  %5441 = vmatpush3.bf16.msra.mxu1 %v5742_v23 }
 0x1f8   : > { %5446 = vmatprep.subr.bf16.mxu0 %v7369_v44  ;;  %5466 = vmatprep.subr.bf16.mxu1 %v7369_v44 }
 0x1fa   : > { %5423 = vmatmul.mubr.bf16.vlgmr.msra.gmra.mrb[44].mxu0 %v3214_v16  ;;  %5443 = vmatmul.mubr.bf16.vlgmr.msra.gmra.mrb[44].mxu1 %v7385_v4 }
 0x1fb   : > { %5447 = vmatpush3.bf16.msra.mxu0 %v5743_v39  ;;  %5467 = vmatpush3.bf16.msra.mxu1 %v5744_v43 }
 0x1fc   : > { %5448 = vmatprep.subr.bf16.mxu0 %v7369_v44  ;;  %5468 = vmatprep.subr.bf16.mxu1 %v7369_v44 }
 0x1fd   : > { %5462 = vmatprep.mubr.msk.bf16.mxu0 %vm5809_vm0, %v7369_v44  ;;  %5482 = vmatprep.mubr.msk.bf16.mxu1 %vm5809_vm0, %v7369_v44 }
 0x1ff   : > { %5449 = vmatpush3.bf16.msra.mxu0 %v5745_v14  ;;  %5469 = vmatpush3.bf16.msra.mxu1 %v5746_v15 }
 0x200   : > { %5450 = vmatprep.subr.bf16.mxu0 %v7369_v44  ;;  %5470 = vmatprep.subr.bf16.mxu1 %v7369_v44 }
 0x203   : > { %5451 = vmatpush3.bf16.msra.mxu0 %v5747_v11  ;;  %5471 = vmatpush3.bf16.msra.mxu1 %v5748_v32 }
 0x204   : > { %5452 = vmatprep.subr.bf16.mxu0 %v7369_v44  ;;  %5472 = vmatprep.subr.bf16.mxu1 %v7369_v44 }
 0x207   : > { %5453 = vmatpush3.bf16.msra.mxu0 %v5749_v8  ;;  %5473 = vmatpush3.bf16.msra.mxu1 %v5750_v2 }
 0x208   : > { %5454 = vmatprep.subr.bf16.mxu0 %v7369_v44  ;;  %5474 = vmatprep.subr.bf16.mxu1 %v7369_v44 }
 0x20b   : > { %5455 = vmatpush3.bf16.msra.mxu0 %v5751_v3  ;;  %5475 = vmatpush3.bf16.msra.mxu1 %v5752_v12 }
 0x20c   : > { %5456 = vmatprep.subr.bf16.mxu0 %v7369_v44  ;;  %5476 = vmatprep.subr.bf16.mxu1 %v7369_v44 }
 0x20d   : > { %v1940_v42 = vpop.f32.mrb[20].mxu0  ;;  %v2055_v7 = vpop.f32.mrb[20].mxu1 }
 0x20e   : > { %v1947_v30 = vadd.f32 %v1940_v42, %v1832_v52  ;;  %v5184_v25 = vpop.f32.mrb[21].mxu0  ;;  %v5204_v27 = vpop.f32.mrb[21].mxu1 }
 0x20f   : > { %v1943_v5 = vpop.f32.mrb[22].mxu0  ;;  %v2058_v60 = vpop.f32.mrb[22].mxu1  ;;  %5457 = vmatpush3.bf16.msra.mxu0 %v5753_v48  ;;  %5477 = vmatpush3.bf16.msra.mxu1 %v5754_v1 }
 0x210   : > { %v2062_v22 = vadd.f32 %v2055_v7, %v1947_v30  ;;  %v1948_v35 = vadd.f32 %v1943_v5, %v1833_v56  ;;  %v5185_v54 = vpop.f32.mrb[23].mxu0  ;;  %v5205_v17 = vpop.f32.mrb[23].mxu1  ;;  %5458 = vmatprep.subr.bf16.mxu0 %v7369_v44  ;;  %5478 = vmatprep.subr.bf16.mxu1 %v7369_v44 }
 0x212   : > { %v2063_v45 = vadd.f32 %v2058_v60, %v1948_v35 }
 0x213   : > { %5459 = vmatpush3.bf16.msra.mxu0 %v5755_v29  ;;  %5479 = vmatpush3.bf16.msra.mxu1 %v5756_v6 }
 0x214   : > { %5460 = vmatprep.subr.bf16.mxu0 %v7369_v44  ;;  %5480 = vmatprep.subr.bf16.mxu1 %v7369_v44 }
 0x217   : > { %5461 = vmatpush3.bf16.msra.mxu0 %v5757_v26  ;;  %5481 = vmatpush3.bf16.msra.mxu1 %v5758_v40 }
 0x218   : > { %5486 = vmatprep.subr.bf16.mxu0 %v7369_v44 }
 0x21a   : > { %5463 = vmatmul.mubr.bf16.vlgmr.msra.gmra.mrb[48].mxu0 %v7387_v53  ;;  %5483 = vmatmul.mubr.bf16.vlgmr.msra.gmra.mrb[48].mxu1 %v7390_v37 }
 0x21b   : > { %5487 = vmatpush3.bf16.msra.mxu0 %v5759_v57  ;;  %5502 = vmatprep.mubr.msk.bf16.mxu0 %vm5809_vm0, %v7369_v44 }
 0x21c   : > { %5488 = vmatprep.subr.bf16.mxu0 %v7369_v44 }
 0x21f   : > { %5489 = vmatpush3.bf16.msra.mxu0 %v5760_v51 }
 0x220   : > { %5490 = vmatprep.subr.bf16.mxu0 %v7369_v44 }
 0x223   : > { %5491 = vmatpush3.bf16.msra.mxu0 %v5761_v63 }
 0x224   : > { %5492 = vmatprep.subr.bf16.mxu0 %v7369_v44 }
 0x227   : > { %5493 = vmatpush3.bf16.msra.mxu0 %v5762_v19 }
 0x228   : > { %5494 = vmatprep.subr.bf16.mxu0 %v7369_v44 }
 0x22b   : > { %5495 = vmatpush3.bf16.msra.mxu0 %v5763_v49 }
 0x22c   : > { %5496 = vmatprep.subr.bf16.mxu0 %v7369_v44 }
 0x22d   : > { %v2170_v38 = vpop.f32.mrb[24].mxu0  ;;  %v2279_v62 = vpop.f32.mrb[24].mxu1 }
 0x22e   : > { %v2177_v36 = vadd.f32 %v2170_v38, %v2062_v22  ;;  %v5224_v50 = vpop.f32.mrb[25].mxu0  ;;  %v5244_v61 = vpop.f32.mrb[25].mxu1 }
 0x22f   : > { %v2173_v20 = vpop.f32.mrb[26].mxu0  ;;  %5497 = vmatpush3.bf16.msra.mxu0 %v5764_v21  ;;  %v2282_v58 = vpop.f32.mrb[26].mxu1 }
 0x230   : > { %v2178_v24 = vadd.f32 %v2173_v20, %v2063_v45  ;;  %v2286_v31 = vadd.f32 %v2279_v62, %v2177_v36  ;;  %v5225_v0 = vpop.f32.mrb[27].mxu0  ;;  %5498 = vmatprep.subr.bf16.mxu0 %v7369_v44  ;;  %v5245_v46 = vpop.f32.mrb[27].mxu1 }
 0x232   : > { %v2287_v52 = vadd.f32 %v2282_v58, %v2178_v24 }
 0x233   : > { %5499 = vmatpush3.bf16.msra.mxu0 %v5765_v59 }
 0x234   : > { %5500 = vmatprep.subr.bf16.mxu0 %v7369_v44 }
 0x237   : > { %5501 = vmatpush3.bf16.msra.mxu0 %v5766_v55 }
 0x23a   : > { %5503 = vmatmul.mubr.bf16.vlgmr.msra.gmra.mrb[52].mxu0 %v3662_v10 }
 0x24d   : > { %v2394_v34 = vpop.f32.mrb[28].mxu0  ;;  %v2505_v47 = vpop.f32.mrb[28].mxu1 }
 0x24e   : > { %v2401_v56 = vadd.f32 %v2394_v34, %v2286_v31  ;;  %v5264_v9 = vpop.f32.mrb[29].mxu0  ;;  %v5284_v23 = vpop.f32.mrb[29].mxu1 }
 0x24f   : > { %v2397_v16 = vpop.f32.mrb[30].mxu0  ;;  %v2508_v39 = vpop.f32.mrb[30].mxu1 }
 0x250   : > { %v2512_v43 = vadd.f32 %v2505_v47, %v2401_v56  ;;  %v2402_v4 = vadd.f32 %v2397_v16, %v2287_v52  ;;  %v5265_v14 = vpop.f32.mrb[31].mxu0  ;;  %v5285_v15 = vpop.f32.mrb[31].mxu1 }
 0x251   : > { %v4702_v14 = vld [vmem:[%s7353_s4] ss:$0 sm:$0xff] }
 0x252   : > { %v2513_v11 = vadd.f32 %v2508_v39, %v2402_v4 }
 0x26d   : > { %v2616_v32 = vpop.f32.mrb[32].mxu0  ;;  %v2727_v8 = vpop.f32.mrb[32].mxu1 }
 0x26e   : > { %v2623_v44 = vadd.f32 %v2616_v32, %v2512_v43  ;;  %v5304_v2 = vpop.f32.mrb[33].mxu0  ;;  %v5324_v3 = vpop.f32.mrb[33].mxu1 }
 0x26f   : > { %v2619_v12 = vpop.f32.mrb[34].mxu0  ;;  %v2730_v28 = vpop.f32.mrb[34].mxu1 }
 0x270   : > { %v2734_v18 = vadd.f32 %v2727_v8, %v2623_v44  ;;  %v2624_v10 = vadd.f32 %v2619_v12, %v2513_v11  ;;  %v5305_v48 = vpop.f32.mrb[35].mxu0  ;;  %v5325_v1 = vpop.f32.mrb[35].mxu1 }
 0x272   : > { %v2735_v42 = vadd.f32 %v2730_v28, %v2624_v10 }
 0x28d   : > { %v2860_v7 = vpop.f32.mrb[36].mxu0  ;;  %v2975_v30 = vpop.f32.mrb[36].mxu1 }
 0x28e   : > { %v2867_v25 = vadd.f32 %v2860_v7, %v2734_v18  ;;  %v5344_v27 = vpop.f32.mrb[37].mxu0  ;;  %v5364_v5 = vpop.f32.mrb[37].mxu1 }
 0x28f   : > { %v2863_v60 = vpop.f32.mrb[38].mxu0  ;;  %v2978_v29 = vpop.f32.mrb[38].mxu1 }
 0x290   : > { %v2982_v6 = vadd.f32 %v2975_v30, %v2867_v25  ;;  %v2868_v22 = vadd.f32 %v2863_v60, %v2735_v42  ;;  %v5345_v35 = vpop.f32.mrb[39].mxu0  ;;  %v5365_v54 = vpop.f32.mrb[39].mxu1 }
 0x292   : > { %v2983_v17 = vadd.f32 %v2978_v29, %v2868_v22 }
 0x2ad   : > { %v3090_v45 = vpop.f32.mrb[40].mxu0  ;;  %v3205_v26 = vpop.f32.mrb[40].mxu1 }
 0x2ae   : > { %v3097_v40 = vadd.f32 %v3090_v45, %v2982_v6  ;;  %v5384_v57 = vpop.f32.mrb[41].mxu0  ;;  %v5404_v13 = vpop.f32.mrb[41].mxu1 }
 0x2af   : > { %v3093_v53 = vpop.f32.mrb[42].mxu0  ;;  %v3208_v41 = vpop.f32.mrb[42].mxu1 }
 0x2b0   : > { %v3212_v33 = vadd.f32 %v3205_v26, %v3097_v40  ;;  %v3098_v37 = vadd.f32 %v3093_v53, %v2983_v17  ;;  %v5385_v51 = vpop.f32.mrb[43].mxu0  ;;  %v5405_v63 = vpop.f32.mrb[43].mxu1 }
 0x2b2   : > { %v3213_v19 = vadd.f32 %v3208_v41, %v3098_v37 }
 0x2cd   : > { %v3314_v49 = vpop.f32.mrb[44].mxu0  ;;  %v3429_v21 = vpop.f32.mrb[44].mxu1 }
 0x2ce   : > { %v3321_v38 = vadd.f32 %v3314_v49, %v3212_v33  ;;  %v5424_v62 = vpop.f32.mrb[45].mxu0  ;;  %v5444_v36 = vpop.f32.mrb[45].mxu1 }
 0x2cf   : > { %v3317_v50 = vpop.f32.mrb[46].mxu0  ;;  %v3432_v61 = vpop.f32.mrb[46].mxu1 }
 0x2d0   : > { %v3436_v20 = vadd.f32 %v3429_v21, %v3321_v38  ;;  %v3322_v58 = vadd.f32 %v3317_v50, %v3213_v19  ;;  %v5425_v59 = vpop.f32.mrb[47].mxu0  ;;  %v5445_v24 = vpop.f32.mrb[47].mxu1 }
 0x2d2   : > { %v3437_v31 = vadd.f32 %v3432_v61, %v3322_v58 }
 0x2ed   : > { %v3540_v0 = vpop.f32.mrb[48].mxu0  ;;  %v3651_v46 = vpop.f32.mrb[48].mxu1 }
 0x2ee   : > { %v3547_v52 = vadd.f32 %v3540_v0, %v3436_v20  ;;  %v5464_v55 = vpop.f32.mrb[49].mxu0  ;;  %v5484_v34 = vpop.f32.mrb[49].mxu1 }
 0x2ef   : > { %v3543_v47 = vpop.f32.mrb[50].mxu0  ;;  %v3654_v56 = vpop.f32.mrb[50].mxu1 }
 0x2f0   : > { %v3658_v9 = vadd.f32 %v3651_v46, %v3547_v52  ;;  %v3548_v23 = vadd.f32 %v3543_v47, %v3437_v31  ;;  %v5465_v16 = vpop.f32.mrb[51].mxu0  ;;  %v5485_v39 = vpop.f32.mrb[51].mxu1 }
 0x2f2   : > { %v3659_v43 = vadd.f32 %v3654_v56, %v3548_v23 }
 0x30d   : > { %v3762_v4 = vpop.f32.mrb[52].mxu0 }
 0x30e   : > { %v3769_v15 = vadd.f32 %v3762_v4, %v3658_v9  ;;  %v5504_v11 = vpop.f32.mrb[53].mxu0 }
 0x30f   : > { %v3765_v32 = vpop.f32.mrb[54].mxu0 }
 0x310   : > { %v3778_v8 = vadd.f32 %v4702_v14, %v3769_v15  ;;  %v3770_v44 = vadd.f32 %v3765_v32, %v3659_v43  ;;  %v5505_v2 = vpop.f32.mrb[55].mxu0 }
 0x312   : > { %3780 = vst [vmem:[%s547_s22] sm:$0xff] %v3778_v8  ;;  %v3779_v3 = vadd.f32 %v4702_v14, %v3770_v44  ;;  %v3790_v12 = vmul.f32 %v3778_v8, %v3778_v8 }
 0x314   : > { %3781 = vst [vmem:[%s547_s22 + $0x8] sm:$0xff] %v3779_v3  ;;  %v3782_v28 = vadd.f32 %v3779_v3, %v3778_v8  ;;  %v3791_v18 = vmul.f32 %v3779_v3, %v3779_v3 }
 0x316   : > { %v3783_v10 = vrot.slane %v3782_v28, 4  ;;  %v3792_v48 = vadd.f32 %v3791_v18, %v3790_v12 }
 0x318   : > { %v3784_v1 = vadd.f32 %v3783_v10, %v3782_v28  ;;  %v3793_v42 = vrot.slane %v3792_v48, 4 }
 0x31a   : > { %v3785_v7 = vrot.slane %v3784_v1, 2  ;;  %v3794_v30 = vadd.f32 %v3793_v42, %v3792_v48 }
 0x31c   : > { %v3786_v25 = vadd.f32 %v3785_v7, %v3784_v1  ;;  %v3795_v27 = vrot.slane %v3794_v30, 2 }
 0x31e   : > { %v3787_v5 = vrot.slane %v3786_v25, 1  ;;  %v3796_v60 = vadd.f32 %v3795_v27, %v3794_v30 }
 0x320   : > { %v3788_v29 = vadd.f32 %v3787_v5, %v3786_v25  ;;  %v3797_v6 = vrot.slane %v3796_v60, 1 }
 0x322   : > { %3789 = vst [vmem:[%s555_s15] sm:$0x1] %v3788_v29  ;;  %v3798_v22 = vadd.f32 %v3797_v6, %v3796_v60 }
 0x324   : > { %3799 = vst [vmem:[%s555_s15 + $0x1] sm:$0x1] %v3798_v22 }
 0x325 PF: > { %s20_s13 = sadd.s32 1, %s5805_s13   ;;  %s7391_s28 = sld [smem:[#allocation2_spill]] }
 0x326   : > { %p17_p7 = scmp.ge.s32.totalorder %s20_s13, 10   ;;  %s7392_s30 = smov %s5797_s11 }
 0x327   : > { %s7393_s10 = smov %s5801_s12  ;;  %s7394_s11 = smov %s7397_s14 }
 0x328   :  { %19 = sbr.rel (!%p17_p7) target bundleno = 3 (0x3), region = 133 }
 0x32b   : > { %s7395_s12 = smov %s7391_s28 }

</bundles_post_ra>
